<compile_context>
chip_gen: v7x
topology: tpu7x:2x2x1
jax: 0.10.0
libtpu: 0.0.40
codegen_flags: <defaults>
</compile_context>

<pallas_src>
import functools

import jax
import jax.numpy as jnp
from jax.experimental import pallas as pl
from jax.experimental.pallas import tpu as pltpu


# ----------------------------- Pallas kernels ------------------------------


def pab_attention_kernel(xp_ref, w_tc_ref, b_tc_ref, wb_ref, bb_ref,
                         out_ref, top_s, bot_s, *, kv_tile):
    """Per batch element:
       * fused top/center 1x1 convs (f32, they feed the softmax logits),
       * bottom 3x3 conv via 9 in-kernel shifted-tap matmuls (bf16 MXU, f32 acc),
       * attention with GLOBAL softmax (one max/sum over all HW*HW logits),
         computed online over kv chunks so the (HW, HW) map is never stored.
    """
    H = xp_ref.shape[1] - 2
    W = xp_ref.shape[2] - 2
    C = xp_ref.shape[3]
    HW = H * W
    P = w_tc_ref.shape[1] // 2

    xp = xp_ref[0]                                    # (H+2, W+2, C) f32, haloed

    # Fused top & center 1x1 convs (kept f32: their outputs go through exp()).
    xf = xp[1:H + 1, 1:W + 1, :].reshape(HW, C)
    tc = (jnp.dot(xf, w_tc_ref[...], preferred_element_type=jnp.float32)
          + b_tc_ref[...])                            # (HW, 2P)
    top_s[...] = tc[:, :P]                            # keys    (HW, P)
    cen = tc[:, P:]                                   # queries (HW, P)

    # Bottom 3x3 conv: 9 shifted taps of the haloed block (no host im2col).
    bot = jnp.zeros((HW, C), jnp.float32)
    for k in range(9):
        dy, dx = k // 3, k % 3
        xs = xp[dy:dy + H, dx:dx + W, :].reshape(HW, C)
        bot = bot + jnp.dot(xs.astype(jnp.bfloat16), wb_ref[k],
                            preferred_element_type=jnp.float32)
    bot_s[...] = (bot + bb_ref[...]).astype(jnp.bfloat16)   # values (HW, C)

    # Online GLOBAL softmax (torch: Softmax over the flattened HW*HW vector):
    # one running scalar max and one running scalar sum shared by every row.
    nk = HW // kv_tile

    def body(j, carry):
        m_old, l_old, acc = carry
        ks = pl.multiple_of(j * kv_tile, kv_tile)
        top_j = top_s[pl.ds(ks, kv_tile), :]                           # (TK, P)
        s_j = jax.lax.dot_general(cen, top_j, (((1,), (1,)), ((), ())),
                                  preferred_element_type=jnp.float32)  # (HW, TK)
        m_new = jnp.maximum(m_old, jnp.max(s_j))                       # (1, 1)
        alpha = jnp.exp(m_old - m_new)
        p = jnp.exp(s_j - m_new)
        l_new = alpha * l_old + jnp.sum(p)
        pv = jnp.dot(p.astype(jnp.bfloat16), bot_s[pl.ds(ks, kv_tile), :],
                     preferred_element_type=jnp.float32)               # (HW, C)
        return m_new, l_new, alpha * acc + pv

    m0 = jnp.full((1, 1), -1e30, jnp.float32)
    l0 = jnp.zeros((1, 1), jnp.float32)
    acc0 = jnp.zeros((HW, C), jnp.float32)
    _, l, acc = jax.lax.fori_loop(0, nk, body, (m0, l0, acc0))

    # Normalize after the PV matmul: reciprocal goes to the EUP slot.
    out_ref[0] = (acc * pl.reciprocal(l, approx=True)).astype(out_ref.dtype)


def conv3x3_kernel(yp_ref, w_ref, b_ref, out_ref):
    """Per-batch 3x3 conv as 9 in-kernel shifted-tap matmuls (bf16 MXU, f32 acc)."""
    H = yp_ref.shape[1] - 2
    W = yp_ref.shape[2] - 2
    C = yp_ref.shape[3]
    HW = H * W
    yp = yp_ref[0]                                    # (H+2, W+2, C) haloed
    acc = jnp.zeros((HW, w_ref.shape[2]), jnp.float32)
    for k in range(9):
        dy, dx = k // 3, k % 3
        ys = yp[dy:dy + H, dx:dx + W, :].reshape(HW, C)
        acc = acc + jnp.dot(ys.astype(jnp.bfloat16), w_ref[k],
                            preferred_element_type=jnp.float32)
    out_ref[0] = (acc + b_ref[...]).astype(out_ref.dtype)


# ------------------------------ host-side glue ------------------------------


def _pick_kv_tile(hw, target):
    """Largest tile <= target that divides hw (multiples of 128 preferred via target)."""
    t = min(target, hw)
    while hw % t:
        t -= 1
    return t


def init_pab_params(key, in_channels, pab_channels):
    C, P = in_channels, pab_channels
    ks = jax.random.split(key, 8)

    def w(k, shape, fan_in):
        return jax.random.normal(k, shape, jnp.float32) / jnp.sqrt(fan_in)

    return dict(
        wt=w(ks[0], (P, C, 1, 1), C),            bt=w(ks[1], (P,), C),
        wc=w(ks[2], (P, C, 1, 1), C),            bc=w(ks[3], (P,), C),
        wb=w(ks[4], (C, C, 3, 3), 9 * C),        bb=w(ks[5], (C,), 9 * C),
        wo=w(ks[6], (C, C, 3, 3), 9 * C),        bo=w(ks[7], (C,), 9 * C),
    )


@functools.partial(jax.jit, static_argnames=("pab_channels", "kv_block"))
def pab_forward(x, params, *, pab_channels, kv_block=128):
    B, C, H, W = x.shape
    HW = H * W
    P = pab_channels

    # ---- weight prep ----
    w_tc = jnp.concatenate([params["wt"].reshape(P, C).T,
                            params["wc"].reshape(P, C).T], axis=1)       # (C, 2P)
    b_tc = jnp.concatenate([params["bt"], params["bc"]]).reshape(1, 2 * P)
    # 3x3 weights as 9 per-tap (C_in, C_out) matrices, tap k = dy*3 + dx, bf16.
    wb_taps = params["wb"].transpose(2, 3, 1, 0).reshape(9, C, C).astype(jnp.bfloat16)
    wo_taps = params["wo"].transpose(2, 3, 1, 0).reshape(9, C, C).astype(jnp.bfloat16)
    bb = params["bb"].reshape(1, C)
    bo = params["bo"].reshape(1, C)

    kv_tile = _pick_kv_tile(HW, kv_block)

    # Channels-last + 1-pixel halo: the kernels slice the 3x3 taps themselves, so
    # HBM traffic is ~1.3x the input instead of the old 9x im2col expansion.
    xp = jnp.pad(x.transpose(0, 2, 3, 1), ((0, 0), (1, 1), (1, 1), (0, 0)))

    def rep(shape):
        return pl.BlockSpec(shape, lambda b: (0,) * len(shape))

    att = pl.pallas_call(
        functools.partial(pab_attention_kernel, kv_tile=kv_tile),
        out_shape=jax.ShapeDtypeStruct((B, HW, C), jnp.float32),
        grid_spec=pltpu.PrefetchScalarGridSpec(
            num_scalar_prefetch=0,
            grid=(B,),
            in_specs=[
                pl.BlockSpec((1, H + 2, W + 2, C), lambda b: (b, 0, 0, 0)),  # haloed x
                rep((C, 2 * P)), rep((1, 2 * P)),        # fused top/center 1x1 conv
                rep((9, C, C)), rep((1, C)),             # bottom 3x3 conv taps
            ],
            out_specs=pl.BlockSpec((1, HW, C), lambda b: (b, 0, 0)),
            scratch_shapes=[pltpu.VMEM((HW, P), jnp.float32),       # keys (top)
                            pltpu.VMEM((HW, C), jnp.bfloat16)]),    # values (bottom)
        compiler_params=pltpu.CompilerParams(dimension_semantics=("parallel",)),
    )(xp, w_tc, b_tc, wb_taps, bb)

    # Residual + the PyTorch raw reshape (B, HW, C) -> (B, C, H, W)  (NOT a transpose).
    y = x + att.reshape(B, C, H, W)

    # out_conv (3x3) on y, again with in-kernel taps of a haloed channels-last block.
    yp = jnp.pad(y.transpose(0, 2, 3, 1), ((0, 0), (1, 1), (1, 1), (0, 0)))
    out_f = pl.pallas_call(
        conv3x3_kernel,
        out_shape=jax.ShapeDtypeStruct((B, HW, C), jnp.float32),
        grid=(B,),
        in_specs=[
            pl.BlockSpec((1, H + 2, W + 2, C), lambda b: (b, 0, 0, 0)),
            rep((9, C, C)), rep((1, C)),
        ],
        out_specs=pl.BlockSpec((1, HW, C), lambda b: (b, 0, 0)),
        compiler_params=pltpu.CompilerParams(dimension_semantics=("parallel",)),
    )(yp, wo_taps, bo)

    # back to NCHW
    return out_f.reshape(B, H, W, C).transpose(0, 3, 1, 2)


# ------------------------- pure-JAX reference check -------------------------


def _conv2d(x, w, b, pad):
    out = jax.lax.conv_general_dilated(
        x, w, window_strides=(1, 1), padding=[(pad, pad), (pad, pad)],
        dimension_numbers=("NCHW", "OIHW", "NCHW"))
    return out + b.reshape(1, -1, 1, 1)


def pab_reference(x, params, *, pab_channels):
    B, C, H, W = x.shape
    x_top = _conv2d(x, params["wt"], params["bt"], 0)
    x_center = _conv2d(x, params["wc"], params["bc"], 0)
    x_bottom = _conv2d(x, params["wb"], params["bb"], 1)
    x_top = x_top.reshape(B, pab_channels, H * W)
    x_center = x_center.reshape(B, pab_channels, H * W).transpose(0, 2, 1)
    x_bottom = x_bottom.reshape(B, C, H * W).transpose(0, 2, 1)
    sp = jnp.einsum("bip,bpj->bij", x_center, x_top)
    sp = jax.nn.softmax(sp.reshape(B, -1), axis=1).reshape(B, H * W, H * W)
    sp = jnp.einsum("bij,bjc->bic", sp, x_bottom)
    sp = sp.reshape(B, C, H, W)          # same raw reshape as the torch code
    y = x + sp
    return _conv2d(y, params["wo"], params["bo"], 1)


# ----------------------------------- main -----------------------------------

if __name__ == "__main__":
    B, C, H, W = 2, 4, 16, 16
    PAB_CH = 8

    key = jax.random.PRNGKey(0)
    kx, kp = jax.random.split(key)
    x = jax.random.normal(kx, (B, C, H, W), jnp.float32)
    params = init_pab_params(kp, C, PAB_CH)

    out = jax.block_until_ready(pab_forward(x, params, pab_channels=PAB_CH))
    ref = jax.block_until_ready(pab_reference(x, params, pab_channels=PAB_CH))

    assert out.shape == (B, C, H, W)
    # The kernel runs the 3x3 convs and the probs@values matmul with bf16 MXU
    # operands (f32 accumulation) while the reference is pure f32, so a looser
    # tolerance than the f32-only path is expected.
    err = float(jnp.max(jnp.abs(out - ref)))
    assert jnp.allclose(out, ref, atol=5e-2, rtol=5e-2), err

    print("KERNEL_OK")
</pallas_src>

<mosaic_0001>
module attributes {stable_mosaic.version = 11 : i64} {
  func.func @pab_attention_kernel(%arg0: i32, %arg1: memref<1x18x18x4xf32, #tpu.memory_space<vmem>>, %arg2: memref<4x16xf32, #tpu.memory_space<vmem>>, %arg3: memref<1x16xf32, #tpu.memory_space<vmem>>, %arg4: memref<9x4x4xbf16, #tpu.memory_space<vmem>>, %arg5: memref<1x4xf32, #tpu.memory_space<vmem>>, %arg6: memref<1x256x4xf32, #tpu.memory_space<vmem>>, %arg7: memref<256x8xf32, #tpu.memory_space<vmem>>, %arg8: memref<256x4xbf16, #tpu.memory_space<vmem>>) attributes {dimension_semantics = [#tpu.dimension_semantics<parallel>], iteration_bounds = array<i64: 2>, scalar_prefetch = 0 : i64, scratch_operands = 2 : i64, tpu.core_type = #tpu.core_type<tc>, window_params = [{transform_indices = @transform_0, window_bounds = array<i64: 1, 18, 18, 4>}, {pipeline_mode = #tpu.pipeline_mode<synchronous>, transform_indices = @transform_1, window_bounds = array<i64: 4, 16>}, {pipeline_mode = #tpu.pipeline_mode<synchronous>, transform_indices = @transform_2, window_bounds = array<i64: 1, 16>}, {pipeline_mode = #tpu.pipeline_mode<synchronous>, transform_indices = @transform_3, window_bounds = array<i64: 9, 4, 4>}, {pipeline_mode = #tpu.pipeline_mode<synchronous>, transform_indices = @transform_4, window_bounds = array<i64: 1, 4>}, {transform_indices = @transform_5, window_bounds = array<i64: 1, 256, 4>}]} {
    %c0 = arith.constant 0 : index
    %c0_0 = arith.constant 0 : index
    %c0_1 = arith.constant 0 : index
    %c0_2 = arith.constant 0 : index
    %0 = vector.load %arg1[%c0, %c0_0, %c0_1, %c0_2] : memref<1x18x18x4xf32, #tpu.memory_space<vmem>>, vector<1x18x18x4xf32>
    %1 = vector.shape_cast %0 : vector<1x18x18x4xf32> to vector<18x18x4xf32>
    %2 = vector.extract_strided_slice %1 {offsets = [1, 1, 0], sizes = [16, 16, 4], strides = [1, 1, 1]} : vector<18x18x4xf32> to vector<16x16x4xf32>
    %3 = vector.shape_cast %2 : vector<16x16x4xf32> to vector<256x4xf32>
    %c0_3 = arith.constant 0 : index
    %c0_4 = arith.constant 0 : index
    %4 = vector.load %arg2[%c0_3, %c0_4] : memref<4x16xf32, #tpu.memory_space<vmem>>, vector<4x16xf32>
    %cst = arith.constant dense<0.000000e+00> : vector<256x16xf32>
    %5 = tpu.matmul %3, %4, %cst {dimension_numbers = #tpu.dot_dimension_numbers<[1], [0], [0], [1], [0, 0, 1, 1], [], []>} : vector<256x4xf32>, vector<4x16xf32>, vector<256x16xf32> -> vector<256x16xf32>
    %c0_5 = arith.constant 0 : index
    %c0_6 = arith.constant 0 : index
    %6 = vector.load %arg3[%c0_5, %c0_6] : memref<1x16xf32, #tpu.memory_space<vmem>>, vector<1x16xf32>
    %7 = vector.broadcast %6 : vector<1x16xf32> to vector<256x16xf32>
    %8 = arith.addf %5, %7 : vector<256x16xf32>
    %9 = vector.extract_strided_slice %8 {offsets = [0, 0], sizes = [256, 8], strides = [1, 1]} : vector<256x16xf32> to vector<256x8xf32>
    %c0_7 = arith.constant 0 : index
    %c0_8 = arith.constant 0 : index
    %10 = vector.load %arg7[%c0_7, %c0_8] : memref<256x8xf32, #tpu.memory_space<vmem>>, vector<256x8xf32>
    tpu.vector_store %arg7[%c0_7, %c0_8], %9 {strides = array<i32>} : memref<256x8xf32, #tpu.memory_space<vmem>>, vector<256x8xf32>,
    %11 = vector.extract_strided_slice %8 {offsets = [0, 8], sizes = [256, 8], strides = [1, 1]} : vector<256x16xf32> to vector<256x8xf32>
    %cst_9 = arith.constant 0.000000e+00 : f32
    %12 = vector.broadcast %cst_9 : f32 to vector<256x4xf32>
    %13 = vector.extract_strided_slice %1 {offsets = [0, 0, 0], sizes = [16, 16, 4], strides = [1, 1, 1]} : vector<18x18x4xf32> to vector<16x16x4xf32>
    %14 = vector.shape_cast %13 : vector<16x16x4xf32> to vector<256x4xf32>
    %15 = arith.truncf %14 : vector<256x4xf32> to vector<256x4xbf16>
    %c0_10 = arith.constant 0 : index
    %c0_11 = arith.constant 0 : index
    %c0_12 = arith.constant 0 : index
    %16 = vector.load %arg4[%c0_10, %c0_11, %c0_12] : memref<9x4x4xbf16, #tpu.memory_space<vmem>>, vector<1x4x4xbf16>
    %17 = vector.shape_cast %16 : vector<1x4x4xbf16> to vector<4x4xbf16>
    %cst_13 = arith.constant dense<0.000000e+00> : vector<256x4xf32>
    %18 = tpu.matmul %15, %17, %cst_13 {dimension_numbers = #tpu.dot_dimension_numbers<[1], [0], [0], [1], [0, 0, 1, 1], [], []>} : vector<256x4xbf16>, vector<4x4xbf16>, vector<256x4xf32> -> vector<256x4xf32>
    %19 = arith.addf %12, %18 : vector<256x4xf32>
    %20 = vector.extract_strided_slice %1 {offsets = [0, 1, 0], sizes = [16, 16, 4], strides = [1, 1, 1]} : vector<18x18x4xf32> to vector<16x16x4xf32>
    %21 = vector.shape_cast %20 : vector<16x16x4xf32> to vector<256x4xf32>
    %22 = arith.truncf %21 : vector<256x4xf32> to vector<256x4xbf16>
    %c1 = arith.constant 1 : index
    %c0_14 = arith.constant 0 : index
    %c0_15 = arith.constant 0 : index
    %23 = vector.load %arg4[%c1, %c0_14, %c0_15] : memref<9x4x4xbf16, #tpu.memory_space<vmem>>, vector<1x4x4xbf16>
    %24 = vector.shape_cast %23 : vector<1x4x4xbf16> to vector<4x4xbf16>
    %cst_16 = arith.constant dense<0.000000e+00> : vector<256x4xf32>
    %25 = tpu.matmul %22, %24, %cst_16 {dimension_numbers = #tpu.dot_dimension_numbers<[1], [0], [0], [1], [0, 0, 1, 1], [], []>} : vector<256x4xbf16>, vector<4x4xbf16>, vector<256x4xf32> -> vector<256x4xf32>
    %26 = arith.addf %19, %25 : vector<256x4xf32>
    %27 = vector.extract_strided_slice %1 {offsets = [0, 2, 0], sizes = [16, 16, 4], strides = [1, 1, 1]} : vector<18x18x4xf32> to vector<16x16x4xf32>
    %28 = vector.shape_cast %27 : vector<16x16x4xf32> to vector<256x4xf32>
    %29 = arith.truncf %28 : vector<256x4xf32> to vector<256x4xbf16>
    %c2 = arith.constant 2 : index
    %c0_17 = arith.constant 0 : index
    %c0_18 = arith.constant 0 : index
    %30 = vector.load %arg4[%c2, %c0_17, %c0_18] : memref<9x4x4xbf16, #tpu.memory_space<vmem>>, vector<1x4x4xbf16>
    %31 = vector.shape_cast %30 : vector<1x4x4xbf16> to vector<4x4xbf16>
    %cst_19 = arith.constant dense<0.000000e+00> : vector<256x4xf32>
    %32 = tpu.matmul %29, %31, %cst_19 {dimension_numbers = #tpu.dot_dimension_numbers<[1], [0], [0], [1], [0, 0, 1, 1], [], []>} : vector<256x4xbf16>, vector<4x4xbf16>, vector<256x4xf32> -> vector<256x4xf32>
    %33 = arith.addf %26, %32 : vector<256x4xf32>
    %34 = vector.extract_strided_slice %1 {offsets = [1, 0, 0], sizes = [16, 16, 4], strides = [1, 1, 1]} : vector<18x18x4xf32> to vector<16x16x4xf32>
    %35 = vector.shape_cast %34 : vector<16x16x4xf32> to vector<256x4xf32>
    %36 = arith.truncf %35 : vector<256x4xf32> to vector<256x4xbf16>
    %c3 = arith.constant 3 : index
    %c0_20 = arith.constant 0 : index
    %c0_21 = arith.constant 0 : index
    %37 = vector.load %arg4[%c3, %c0_20, %c0_21] : memref<9x4x4xbf16, #tpu.memory_space<vmem>>, vector<1x4x4xbf16>
    %38 = vector.shape_cast %37 : vector<1x4x4xbf16> to vector<4x4xbf16>
    %cst_22 = arith.constant dense<0.000000e+00> : vector<256x4xf32>
    %39 = tpu.matmul %36, %38, %cst_22 {dimension_numbers = #tpu.dot_dimension_numbers<[1], [0], [0], [1], [0, 0, 1, 1], [], []>} : vector<256x4xbf16>, vector<4x4xbf16>, vector<256x4xf32> -> vector<256x4xf32>
    %40 = arith.addf %33, %39 : vector<256x4xf32>
    %41 = vector.extract_strided_slice %1 {offsets = [1, 1, 0], sizes = [16, 16, 4], strides = [1, 1, 1]} : vector<18x18x4xf32> to vector<16x16x4xf32>
    %42 = vector.shape_cast %41 : vector<16x16x4xf32> to vector<256x4xf32>
    %43 = arith.truncf %42 : vector<256x4xf32> to vector<256x4xbf16>
    %c4 = arith.constant 4 : index
    %c0_23 = arith.constant 0 : index
    %c0_24 = arith.constant 0 : index
    %44 = vector.load %arg4[%c4, %c0_23, %c0_24] : memref<9x4x4xbf16, #tpu.memory_space<vmem>>, vector<1x4x4xbf16>
    %45 = vector.shape_cast %44 : vector<1x4x4xbf16> to vector<4x4xbf16>
    %cst_25 = arith.constant dense<0.000000e+00> : vector<256x4xf32>
    %46 = tpu.matmul %43, %45, %cst_25 {dimension_numbers = #tpu.dot_dimension_numbers<[1], [0], [0], [1], [0, 0, 1, 1], [], []>} : vector<256x4xbf16>, vector<4x4xbf16>, vector<256x4xf32> -> vector<256x4xf32>
    %47 = arith.addf %40, %46 : vector<256x4xf32>
    %48 = vector.extract_strided_slice %1 {offsets = [1, 2, 0], sizes = [16, 16, 4], strides = [1, 1, 1]} : vector<18x18x4xf32> to vector<16x16x4xf32>
    %49 = vector.shape_cast %48 : vector<16x16x4xf32> to vector<256x4xf32>
    %50 = arith.truncf %49 : vector<256x4xf32> to vector<256x4xbf16>
    %c5 = arith.constant 5 : index
    %c0_26 = arith.constant 0 : index
    %c0_27 = arith.constant 0 : index
    %51 = vector.load %arg4[%c5, %c0_26, %c0_27] : memref<9x4x4xbf16, #tpu.memory_space<vmem>>, vector<1x4x4xbf16>
    %52 = vector.shape_cast %51 : vector<1x4x4xbf16> to vector<4x4xbf16>
    %cst_28 = arith.constant dense<0.000000e+00> : vector<256x4xf32>
    %53 = tpu.matmul %50, %52, %cst_28 {dimension_numbers = #tpu.dot_dimension_numbers<[1], [0], [0], [1], [0, 0, 1, 1], [], []>} : vector<256x4xbf16>, vector<4x4xbf16>, vector<256x4xf32> -> vector<256x4xf32>
    %54 = arith.addf %47, %53 : vector<256x4xf32>
    %55 = vector.extract_strided_slice %1 {offsets = [2, 0, 0], sizes = [16, 16, 4], strides = [1, 1, 1]} : vector<18x18x4xf32> to vector<16x16x4xf32>
    %56 = vector.shape_cast %55 : vector<16x16x4xf32> to vector<256x4xf32>
    %57 = arith.truncf %56 : vector<256x4xf32> to vector<256x4xbf16>
    %c6 = arith.constant 6 : index
    %c0_29 = arith.constant 0 : index
    %c0_30 = arith.constant 0 : index
    %58 = vector.load %arg4[%c6, %c0_29, %c0_30] : memref<9x4x4xbf16, #tpu.memory_space<vmem>>, vector<1x4x4xbf16>
    %59 = vector.shape_cast %58 : vector<1x4x4xbf16> to vector<4x4xbf16>
    %cst_31 = arith.constant dense<0.000000e+00> : vector<256x4xf32>
    %60 = tpu.matmul %57, %59, %cst_31 {dimension_numbers = #tpu.dot_dimension_numbers<[1], [0], [0], [1], [0, 0, 1, 1], [], []>} : vector<256x4xbf16>, vector<4x4xbf16>, vector<256x4xf32> -> vector<256x4xf32>
    %61 = arith.addf %54, %60 : vector<256x4xf32>
    %62 = vector.extract_strided_slice %1 {offsets = [2, 1, 0], sizes = [16, 16, 4], strides = [1, 1, 1]} : vector<18x18x4xf32> to vector<16x16x4xf32>
    %63 = vector.shape_cast %62 : vector<16x16x4xf32> to vector<256x4xf32>
    %64 = arith.truncf %63 : vector<256x4xf32> to vector<256x4xbf16>
    %c7 = arith.constant 7 : index
    %c0_32 = arith.constant 0 : index
    %c0_33 = arith.constant 0 : index
    %65 = vector.load %arg4[%c7, %c0_32, %c0_33] : memref<9x4x4xbf16, #tpu.memory_space<vmem>>, vector<1x4x4xbf16>
    %66 = vector.shape_cast %65 : vector<1x4x4xbf16> to vector<4x4xbf16>
    %cst_34 = arith.constant dense<0.000000e+00> : vector<256x4xf32>
    %67 = tpu.matmul %64, %66, %cst_34 {dimension_numbers = #tpu.dot_dimension_numbers<[1], [0], [0], [1], [0, 0, 1, 1], [], []>} : vector<256x4xbf16>, vector<4x4xbf16>, vector<256x4xf32> -> vector<256x4xf32>
    %68 = arith.addf %61, %67 : vector<256x4xf32>
    %69 = vector.extract_strided_slice %1 {offsets = [2, 2, 0], sizes = [16, 16, 4], strides = [1, 1, 1]} : vector<18x18x4xf32> to vector<16x16x4xf32>
    %70 = vector.shape_cast %69 : vector<16x16x4xf32> to vector<256x4xf32>
    %71 = arith.truncf %70 : vector<256x4xf32> to vector<256x4xbf16>
    %c8 = arith.constant 8 : index
    %c0_35 = arith.constant 0 : index
    %c0_36 = arith.constant 0 : index
    %72 = vector.load %arg4[%c8, %c0_35, %c0_36] : memref<9x4x4xbf16, #tpu.memory_space<vmem>>, vector<1x4x4xbf16>
    %73 = vector.shape_cast %72 : vector<1x4x4xbf16> to vector<4x4xbf16>
    %cst_37 = arith.constant dense<0.000000e+00> : vector<256x4xf32>
    %74 = tpu.matmul %71, %73, %cst_37 {dimension_numbers = #tpu.dot_dimension_numbers<[1], [0], [0], [1], [0, 0, 1, 1], [], []>} : vector<256x4xbf16>, vector<4x4xbf16>, vector<256x4xf32> -> vector<256x4xf32>
    %75 = arith.addf %68, %74 : vector<256x4xf32>
    %c0_38 = arith.constant 0 : index
    %c0_39 = arith.constant 0 : index
    %76 = vector.load %arg5[%c0_38, %c0_39] : memref<1x4xf32, #tpu.memory_space<vmem>>, vector<1x4xf32>
    %77 = vector.broadcast %76 : vector<1x4xf32> to vector<256x4xf32>
    %78 = arith.addf %75, %77 : vector<256x4xf32>
    %79 = arith.truncf %78 : vector<256x4xf32> to vector<256x4xbf16>
    %c0_40 = arith.constant 0 : index
    %c0_41 = arith.constant 0 : index
    %80 = vector.load %arg8[%c0_40, %c0_41] : memref<256x4xbf16, #tpu.memory_space<vmem>>, vector<256x4xbf16>
    tpu.vector_store %arg8[%c0_40, %c0_41], %79 {strides = array<i32>} : memref<256x4xbf16, #tpu.memory_space<vmem>>, vector<256x4xbf16>,
    %cst_42 = arith.constant -1.000000e+30 : f32
    %81 = vector.broadcast %cst_42 : f32 to vector<1x1xf32>
    %cst_43 = arith.constant 0.000000e+00 : f32
    %82 = vector.broadcast %cst_43 : f32 to vector<1x1xf32>
    %cst_44 = arith.constant 0.000000e+00 : f32
    %83 = vector.broadcast %cst_44 : f32 to vector<256x4xf32>
    %c0_i32 = arith.constant 0 : i32
    %c2_i32 = arith.constant 2 : i32
    %84 = arith.addi %c0_i32, %c2_i32 : i32
    %c1_i32 = arith.constant 1 : i32
    %85:3 = scf.for %arg9 = %c0_i32 to %84 step %c1_i32 iter_args(%arg10 = %81, %arg11 = %82, %arg12 = %83) -> (vector<1x1xf32>, vector<1x1xf32>, vector<256x4xf32>)  : i32 {
      %c128_i32 = arith.constant 128 : i32
      %92 = arith.muli %arg9, %c128_i32 : i32
      %93 = tpu.assume_multiple %92, 128 : i32
      %94 = arith.index_cast %93 : i32 to index
      %c0_49 = arith.constant 0 : index
      %95 = vector.load %arg7[%94, %c0_49] : memref<256x8xf32, #tpu.memory_space<vmem>>, vector<128x8xf32>
      %cst_50 = arith.constant dense<0.000000e+00> : vector<256x128xf32>
      %96 = tpu.matmul %11, %95, %cst_50 {dimension_numbers = #tpu.dot_dimension_numbers<[1], [1], [0], [0], [0, 0, 1, 0], [], []>} : vector<256x8xf32>, vector<128x8xf32>, vector<256x128xf32> -> vector<256x128xf32>
      %97 = vector.shape_cast %96 : vector<256x128xf32> to vector<1x256x128xf32>
      %cst_51 = arith.constant dense<0xFF800000> : vector<1xf32>
      %98 = vector.multi_reduction <maximumf>, %97, %cst_51 [1, 2] : vector<1x256x128xf32> to vector<1xf32>
      %99 = vector.shape_cast %98 : vector<1xf32> to vector<1x1x1xf32>
      %100 = vector.extract %99[0, 0, 0] : f32 from vector<1x1x1xf32>
      %101 = vector.broadcast %100 : f32 to vector<1x1xf32>
      %102 = arith.maximumf %arg10, %101 : vector<1x1xf32>
      %103 = arith.subf %arg10, %102 : vector<1x1xf32>
      %104 = math.exp %103 : vector<1x1xf32>
      %105 = vector.broadcast %102 : vector<1x1xf32> to vector<256x128xf32>
      %106 = arith.subf %96, %105 : vector<256x128xf32>
      %107 = math.exp %106 : vector<256x128xf32>
      %108 = arith.mulf %104, %arg11 : vector<1x1xf32>
      %109 = vector.shape_cast %107 : vector<256x128xf32> to vector<1x256x128xf32>
      %cst_52 = arith.constant dense<0.000000e+00> : vector<1xf32>
      %110 = vector.multi_reduction <add>, %109, %cst_52 [1, 2] : vector<1x256x128xf32> to vector<1xf32>
      %111 = vector.shape_cast %110 : vector<1xf32> to vector<1x1x1xf32>
      %112 = vector.extract %111[0, 0, 0] : f32 from vector<1x1x1xf32>
      %113 = vector.broadcast %112 : f32 to vector<1x1xf32>
      %114 = arith.addf %108, %113 : vector<1x1xf32>
      %115 = arith.truncf %107 : vector<256x128xf32> to vector<256x128xbf16>
      %116 = arith.index_cast %93 : i32 to index
      %c0_53 = arith.constant 0 : index
      %117 = vector.load %arg8[%116, %c0_53] : memref<256x4xbf16, #tpu.memory_space<vmem>>, vector<128x4xbf16>
      %cst_54 = arith.constant dense<0.000000e+00> : vector<256x4xf32>
      %118 = tpu.matmul %115, %117, %cst_54 {dimension_numbers = #tpu.dot_dimension_numbers<[1], [0], [0], [1], [0, 0, 1, 1], [], []>} : vector<256x128xbf16>, vector<128x4xbf16>, vector<256x4xf32> -> vector<256x4xf32>
      %119 = vector.broadcast %104 : vector<1x1xf32> to vector<256x4xf32>
      %120 = arith.mulf %119, %arg12 : vector<256x4xf32>
      %121 = arith.addf %120, %118 : vector<256x4xf32>
      scf.yield %102, %114, %121 : vector<1x1xf32>, vector<1x1xf32>, vector<256x4xf32>
    }
    %c2_i32_45 = arith.constant 2 : i32
    %86 = tpu.reciprocal %85#1 {approx = true} : vector<1x1xf32> -> vector<1x1xf32>
    %87 = vector.broadcast %86 : vector<1x1xf32> to vector<256x4xf32>
    %88 = arith.mulf %85#2, %87 : vector<256x4xf32>
    %c0_46 = arith.constant 0 : index
    %c0_47 = arith.constant 0 : index
    %c0_48 = arith.constant 0 : index
    %89 = vector.load %arg6[%c0_46, %c0_47, %c0_48] : memref<1x256x4xf32, #tpu.memory_space<vmem>>, vector<1x256x4xf32>
    %90 = vector.shape_cast %89 : vector<1x256x4xf32> to vector<256x4xf32>
    %91 = vector.shape_cast %88 : vector<256x4xf32> to vector<1x256x4xf32>
    tpu.vector_store %arg6[%c0_46, %c0_47, %c0_48], %91 {strides = array<i32>} : memref<1x256x4xf32, #tpu.memory_space<vmem>>, vector<1x256x4xf32>,
    return
  }
  func.func @transform_0(%arg0: i32) -> (i32, i32, i32, i32) {
    %c0_i32 = arith.constant 0 : i32
    %c0_i32_0 = arith.constant 0 : i32
    %c0_i32_1 = arith.constant 0 : i32
    %c0_i32_2 = arith.constant 0 : i32
    return %arg0, %c0_i32, %c0_i32_0, %c0_i32_1 : i32, i32, i32, i32
  }
  func.func @transform_1(%arg0: i32) -> (i32, i32) {
    %c0_i32 = arith.constant 0 : i32
    %c0_i32_0 = arith.constant 0 : i32
    %c0_i32_1 = arith.constant 0 : i32
    return %c0_i32, %c0_i32_0 : i32, i32
  }
  func.func @transform_2(%arg0: i32) -> (i32, i32) {
    %c0_i32 = arith.constant 0 : i32
    %c0_i32_0 = arith.constant 0 : i32
    %c0_i32_1 = arith.constant 0 : i32
    return %c0_i32, %c0_i32_0 : i32, i32
  }
  func.func @transform_3(%arg0: i32) -> (i32, i32, i32) {
    %c0_i32 = arith.constant 0 : i32
    %c0_i32_0 = arith.constant 0 : i32
    %c0_i32_1 = arith.constant 0 : i32
    %c0_i32_2 = arith.constant 0 : i32
    return %c0_i32, %c0_i32_0, %c0_i32_1 : i32, i32, i32
  }
  func.func @transform_4(%arg0: i32) -> (i32, i32) {
    %c0_i32 = arith.constant 0 : i32
    %c0_i32_0 = arith.constant 0 : i32
    %c0_i32_1 = arith.constant 0 : i32
    return %c0_i32, %c0_i32_0 : i32, i32
  }
  func.func @transform_5(%arg0: i32) -> (i32, i32, i32) {
    %c0_i32 = arith.constant 0 : i32
    %c0_i32_0 = arith.constant 0 : i32
    %c0_i32_1 = arith.constant 0 : i32
    return %arg0, %c0_i32, %c0_i32_0 : i32, i32, i32
  }
}

module attributes {stable_mosaic.version = 11 : i64} {
  func.func @conv3x3_kernel(%arg0: i32, %arg1: memref<1x18x18x4xf32, #tpu.memory_space<vmem>>, %arg2: memref<9x4x4xbf16, #tpu.memory_space<vmem>>, %arg3: memref<1x4xf32, #tpu.memory_space<vmem>>, %arg4: memref<1x256x4xf32, #tpu.memory_space<vmem>>) attributes {dimension_semantics = [#tpu.dimension_semantics<parallel>], iteration_bounds = array<i64: 2>, scalar_prefetch = 0 : i64, scratch_operands = 0 : i64, tpu.core_type = #tpu.core_type<tc>, window_params = [{transform_indices = @transform_0, window_bounds = array<i64: 1, 18, 18, 4>}, {pipeline_mode = #tpu.pipeline_mode<synchronous>, transform_indices = @transform_1, window_bounds = array<i64: 9, 4, 4>}, {pipeline_mode = #tpu.pipeline_mode<synchronous>, transform_indices = @transform_2, window_bounds = array<i64: 1, 4>}, {transform_indices = @transform_3, window_bounds = array<i64: 1, 256, 4>}]} {
    %c0 = arith.constant 0 : index
    %c0_0 = arith.constant 0 : index
    %c0_1 = arith.constant 0 : index
    %c0_2 = arith.constant 0 : index
    %0 = vector.load %arg1[%c0, %c0_0, %c0_1, %c0_2] : memref<1x18x18x4xf32, #tpu.memory_space<vmem>>, vector<1x18x18x4xf32>
    %1 = vector.shape_cast %0 : vector<1x18x18x4xf32> to vector<18x18x4xf32>
    %cst = arith.constant 0.000000e+00 : f32
    %2 = vector.broadcast %cst : f32 to vector<256x4xf32>
    %3 = vector.extract_strided_slice %1 {offsets = [0, 0, 0], sizes = [16, 16, 4], strides = [1, 1, 1]} : vector<18x18x4xf32> to vector<16x16x4xf32>
    %4 = vector.shape_cast %3 : vector<16x16x4xf32> to vector<256x4xf32>
    %5 = arith.truncf %4 : vector<256x4xf32> to vector<256x4xbf16>
    %c0_3 = arith.constant 0 : index
    %c0_4 = arith.constant 0 : index
    %c0_5 = arith.constant 0 : index
    %6 = vector.load %arg2[%c0_3, %c0_4, %c0_5] : memref<9x4x4xbf16, #tpu.memory_space<vmem>>, vector<1x4x4xbf16>
    %7 = vector.shape_cast %6 : vector<1x4x4xbf16> to vector<4x4xbf16>
    %cst_6 = arith.constant dense<0.000000e+00> : vector<256x4xf32>
    %8 = tpu.matmul %5, %7, %cst_6 {dimension_numbers = #tpu.dot_dimension_numbers<[1], [0], [0], [1], [0, 0, 1, 1], [], []>} : vector<256x4xbf16>, vector<4x4xbf16>, vector<256x4xf32> -> vector<256x4xf32>
    %9 = arith.addf %2, %8 : vector<256x4xf32>
    %10 = vector.extract_strided_slice %1 {offsets = [0, 1, 0], sizes = [16, 16, 4], strides = [1, 1, 1]} : vector<18x18x4xf32> to vector<16x16x4xf32>
    %11 = vector.shape_cast %10 : vector<16x16x4xf32> to vector<256x4xf32>
    %12 = arith.truncf %11 : vector<256x4xf32> to vector<256x4xbf16>
    %c1 = arith.constant 1 : index
    %c0_7 = arith.constant 0 : index
    %c0_8 = arith.constant 0 : index
    %13 = vector.load %arg2[%c1, %c0_7, %c0_8] : memref<9x4x4xbf16, #tpu.memory_space<vmem>>, vector<1x4x4xbf16>
    %14 = vector.shape_cast %13 : vector<1x4x4xbf16> to vector<4x4xbf16>
    %cst_9 = arith.constant dense<0.000000e+00> : vector<256x4xf32>
    %15 = tpu.matmul %12, %14, %cst_9 {dimension_numbers = #tpu.dot_dimension_numbers<[1], [0], [0], [1], [0, 0, 1, 1], [], []>} : vector<256x4xbf16>, vector<4x4xbf16>, vector<256x4xf32> -> vector<256x4xf32>
    %16 = arith.addf %9, %15 : vector<256x4xf32>
    %17 = vector.extract_strided_slice %1 {offsets = [0, 2, 0], sizes = [16, 16, 4], strides = [1, 1, 1]} : vector<18x18x4xf32> to vector<16x16x4xf32>
    %18 = vector.shape_cast %17 : vector<16x16x4xf32> to vector<256x4xf32>
    %19 = arith.truncf %18 : vector<256x4xf32> to vector<256x4xbf16>
    %c2 = arith.constant 2 : index
    %c0_10 = arith.constant 0 : index
    %c0_11 = arith.constant 0 : index
    %20 = vector.load %arg2[%c2, %c0_10, %c0_11] : memref<9x4x4xbf16, #tpu.memory_space<vmem>>, vector<1x4x4xbf16>
    %21 = vector.shape_cast %20 : vector<1x4x4xbf16> to vector<4x4xbf16>
    %cst_12 = arith.constant dense<0.000000e+00> : vector<256x4xf32>
    %22 = tpu.matmul %19, %21, %cst_12 {dimension_numbers = #tpu.dot_dimension_numbers<[1], [0], [0], [1], [0, 0, 1, 1], [], []>} : vector<256x4xbf16>, vector<4x4xbf16>, vector<256x4xf32> -> vector<256x4xf32>
    %23 = arith.addf %16, %22 : vector<256x4xf32>
    %24 = vector.extract_strided_slice %1 {offsets = [1, 0, 0], sizes = [16, 16, 4], strides = [1, 1, 1]} : vector<18x18x4xf32> to vector<16x16x4xf32>
    %25 = vector.shape_cast %24 : vector<16x16x4xf32> to vector<256x4xf32>
    %26 = arith.truncf %25 : vector<256x4xf32> to vector<256x4xbf16>
    %c3 = arith.constant 3 : index
    %c0_13 = arith.constant 0 : index
    %c0_14 = arith.constant 0 : index
    %27 = vector.load %arg2[%c3, %c0_13, %c0_14] : memref<9x4x4xbf16, #tpu.memory_space<vmem>>, vector<1x4x4xbf16>
    %28 = vector.shape_cast %27 : vector<1x4x4xbf16> to vector<4x4xbf16>
    %cst_15 = arith.constant dense<0.000000e+00> : vector<256x4xf32>
    %29 = tpu.matmul %26, %28, %cst_15 {dimension_numbers = #tpu.dot_dimension_numbers<[1], [0], [0], [1], [0, 0, 1, 1], [], []>} : vector<256x4xbf16>, vector<4x4xbf16>, vector<256x4xf32> -> vector<256x4xf32>
    %30 = arith.addf %23, %29 : vector<256x4xf32>
    %31 = vector.extract_strided_slice %1 {offsets = [1, 1, 0], sizes = [16, 16, 4], strides = [1, 1, 1]} : vector<18x18x4xf32> to vector<16x16x4xf32>
    %32 = vector.shape_cast %31 : vector<16x16x4xf32> to vector<256x4xf32>
    %33 = arith.truncf %32 : vector<256x4xf32> to vector<256x4xbf16>
    %c4 = arith.constant 4 : index
    %c0_16 = arith.constant 0 : index
    %c0_17 = arith.constant 0 : index
    %34 = vector.load %arg2[%c4, %c0_16, %c0_17] : memref<9x4x4xbf16, #tpu.memory_space<vmem>>, vector<1x4x4xbf16>
    %35 = vector.shape_cast %34 : vector<1x4x4xbf16> to vector<4x4xbf16>
    %cst_18 = arith.constant dense<0.000000e+00> : vector<256x4xf32>
    %36 = tpu.matmul %33, %35, %cst_18 {dimension_numbers = #tpu.dot_dimension_numbers<[1], [0], [0], [1], [0, 0, 1, 1], [], []>} : vector<256x4xbf16>, vector<4x4xbf16>, vector<256x4xf32> -> vector<256x4xf32>
    %37 = arith.addf %30, %36 : vector<256x4xf32>
    %38 = vector.extract_strided_slice %1 {offsets = [1, 2, 0], sizes = [16, 16, 4], strides = [1, 1, 1]} : vector<18x18x4xf32> to vector<16x16x4xf32>
    %39 = vector.shape_cast %38 : vector<16x16x4xf32> to vector<256x4xf32>
    %40 = arith.truncf %39 : vector<256x4xf32> to vector<256x4xbf16>
    %c5 = arith.constant 5 : index
    %c0_19 = arith.constant 0 : index
    %c0_20 = arith.constant 0 : index
    %41 = vector.load %arg2[%c5, %c0_19, %c0_20] : memref<9x4x4xbf16, #tpu.memory_space<vmem>>, vector<1x4x4xbf16>
    %42 = vector.shape_cast %41 : vector<1x4x4xbf16> to vector<4x4xbf16>
    %cst_21 = arith.constant dense<0.000000e+00> : vector<256x4xf32>
    %43 = tpu.matmul %40, %42, %cst_21 {dimension_numbers = #tpu.dot_dimension_numbers<[1], [0], [0], [1], [0, 0, 1, 1], [], []>} : vector<256x4xbf16>, vector<4x4xbf16>, vector<256x4xf32> -> vector<256x4xf32>
    %44 = arith.addf %37, %43 : vector<256x4xf32>
    %45 = vector.extract_strided_slice %1 {offsets = [2, 0, 0], sizes = [16, 16, 4], strides = [1, 1, 1]} : vector<18x18x4xf32> to vector<16x16x4xf32>
    %46 = vector.shape_cast %45 : vector<16x16x4xf32> to vector<256x4xf32>
    %47 = arith.truncf %46 : vector<256x4xf32> to vector<256x4xbf16>
    %c6 = arith.constant 6 : index
    %c0_22 = arith.constant 0 : index
    %c0_23 = arith.constant 0 : index
    %48 = vector.load %arg2[%c6, %c0_22, %c0_23] : memref<9x4x4xbf16, #tpu.memory_space<vmem>>, vector<1x4x4xbf16>
    %49 = vector.shape_cast %48 : vector<1x4x4xbf16> to vector<4x4xbf16>
    %cst_24 = arith.constant dense<0.000000e+00> : vector<256x4xf32>
    %50 = tpu.matmul %47, %49, %cst_24 {dimension_numbers = #tpu.dot_dimension_numbers<[1], [0], [0], [1], [0, 0, 1, 1], [], []>} : vector<256x4xbf16>, vector<4x4xbf16>, vector<256x4xf32> -> vector<256x4xf32>
    %51 = arith.addf %44, %50 : vector<256x4xf32>
    %52 = vector.extract_strided_slice %1 {offsets = [2, 1, 0], sizes = [16, 16, 4], strides = [1, 1, 1]} : vector<18x18x4xf32> to vector<16x16x4xf32>
    %53 = vector.shape_cast %52 : vector<16x16x4xf32> to vector<256x4xf32>
    %54 = arith.truncf %53 : vector<256x4xf32> to vector<256x4xbf16>
    %c7 = arith.constant 7 : index
    %c0_25 = arith.constant 0 : index
    %c0_26 = arith.constant 0 : index
    %55 = vector.load %arg2[%c7, %c0_25, %c0_26] : memref<9x4x4xbf16, #tpu.memory_space<vmem>>, vector<1x4x4xbf16>
    %56 = vector.shape_cast %55 : vector<1x4x4xbf16> to vector<4x4xbf16>
    %cst_27 = arith.constant dense<0.000000e+00> : vector<256x4xf32>
    %57 = tpu.matmul %54, %56, %cst_27 {dimension_numbers = #tpu.dot_dimension_numbers<[1], [0], [0], [1], [0, 0, 1, 1], [], []>} : vector<256x4xbf16>, vector<4x4xbf16>, vector<256x4xf32> -> vector<256x4xf32>
    %58 = arith.addf %51, %57 : vector<256x4xf32>
    %59 = vector.extract_strided_slice %1 {offsets = [2, 2, 0], sizes = [16, 16, 4], strides = [1, 1, 1]} : vector<18x18x4xf32> to vector<16x16x4xf32>
    %60 = vector.shape_cast %59 : vector<16x16x4xf32> to vector<256x4xf32>
    %61 = arith.truncf %60 : vector<256x4xf32> to vector<256x4xbf16>
    %c8 = arith.constant 8 : index
    %c0_28 = arith.constant 0 : index
    %c0_29 = arith.constant 0 : index
    %62 = vector.load %arg2[%c8, %c0_28, %c0_29] : memref<9x4x4xbf16, #tpu.memory_space<vmem>>, vector<1x4x4xbf16>
    %63 = vector.shape_cast %62 : vector<1x4x4xbf16> to vector<4x4xbf16>
    %cst_30 = arith.constant dense<0.000000e+00> : vector<256x4xf32>
    %64 = tpu.matmul %61, %63, %cst_30 {dimension_numbers = #tpu.dot_dimension_numbers<[1], [0], [0], [1], [0, 0, 1, 1], [], []>} : vector<256x4xbf16>, vector<4x4xbf16>, vector<256x4xf32> -> vector<256x4xf32>
    %65 = arith.addf %58, %64 : vector<256x4xf32>
    %c0_31 = arith.constant 0 : index
    %c0_32 = arith.constant 0 : index
    %66 = vector.load %arg3[%c0_31, %c0_32] : memref<1x4xf32, #tpu.memory_space<vmem>>, vector<1x4xf32>
    %67 = vector.broadcast %66 : vector<1x4xf32> to vector<256x4xf32>
    %68 = arith.addf %65, %67 : vector<256x4xf32>
    %c0_33 = arith.constant 0 : index
    %c0_34 = arith.constant 0 : index
    %c0_35 = arith.constant 0 : index
    %69 = vector.load %arg4[%c0_33, %c0_34, %c0_35] : memref<1x256x4xf32, #tpu.memory_space<vmem>>, vector<1x256x4xf32>
    %70 = vector.shape_cast %69 : vector<1x256x4xf32> to vector<256x4xf32>
    %71 = vector.shape_cast %68 : vector<256x4xf32> to vector<1x256x4xf32>
    tpu.vector_store %arg4[%c0_33, %c0_34, %c0_35], %71 {strides = array<i32>} : memref<1x256x4xf32, #tpu.memory_space<vmem>>, vector<1x256x4xf32>,
    return
  }
  func.func @transform_0(%arg0: i32) -> (i32, i32, i32, i32) {
    %c0_i32 = arith.constant 0 : i32
    %c0_i32_0 = arith.constant 0 : i32
    %c0_i32_1 = arith.constant 0 : i32
    %c0_i32_2 = arith.constant 0 : i32
    return %arg0, %c0_i32, %c0_i32_0, %c0_i32_1 : i32, i32, i32, i32
  }
  func.func @transform_1(%arg0: i32) -> (i32, i32, i32) {
    %c0_i32 = arith.constant 0 : i32
    %c0_i32_0 = arith.constant 0 : i32
    %c0_i32_1 = arith.constant 0 : i32
    %c0_i32_2 = arith.constant 0 : i32
    return %c0_i32, %c0_i32_0, %c0_i32_1 : i32, i32, i32
  }
  func.func @transform_2(%arg0: i32) -> (i32, i32) {
    %c0_i32 = arith.constant 0 : i32
    %c0_i32_0 = arith.constant 0 : i32
    %c0_i32_1 = arith.constant 0 : i32
    return %c0_i32, %c0_i32_0 : i32, i32
  }
  func.func @transform_3(%arg0: i32) -> (i32, i32, i32) {
    %c0_i32 = arith.constant 0 : i32
    %c0_i32_0 = arith.constant 0 : i32
    %c0_i32_1 = arith.constant 0 : i32
    return %arg0, %c0_i32, %c0_i32_0 : i32, i32, i32
  }
}

</mosaic_0001>

<bundles_post_ra>
// kernel: pab_forward.3
= control target key start
LH: loop header
LB: loop body
LE: loop exit
PB: predicated region body
PF: predicated region fallthrough
CT: control target
= control target key end

     0   :  { %s3523_s12 = smov 0   ;;  %s4462_s0 = inlined_call_operand.vmem [shape: f32[2,18,18,4], index: 0, kind: input, shape index: {}]   ;;  %s4463_s1 = inlined_call_operand.vmem [shape: bf16[9,4,4], index: 1, kind: input, shape index: {}]   ;;  %s4464_s2 = inlined_call_operand.vmem [shape: f32[1,4], index: 2, kind: input, shape index: {}]   ;;  %s4465_s3 = inlined_call_operand.vmem [shape: f32[2,256,4], index: 3, kind: output, shape index: {}]  }
   0x1 LB: > { %s2595_s13 = sadd.s32 4294967295, %s3501_s12   ;;  %p2599_p0 = scmp.ge.s32.totalorder %s3501_s12, 1  ;;  %s3501_s12 = sphi %s3523_s12, %s13_s12  }
   0x2   : > { %p137_p1 = scmp.lt.s32.totalorder %s3501_s12, 3 }
   0x4   : > { %p138_p2 = pnand %p2599_p0, %p137_p1 }
   0x6   : > { %141 = sbr.rel (%p138_p2) target bundleno = 529 (0x211), region = 32 }
   0xd   : > { %v2603_v0 = vld [vmem:[%s4463_s1 + $0x2] sm:$0x3]  ;;  %vm471_vm0 = vcmask 1041408   ;;  %v3537_v1 = vld [vmem:[%s4463_s1 + $0x8] sm:$0x3]  ;;  %p161_p3 = scmp.lt.s32.totalorder %s2595_s13, 1 }
   0xe   : > { %4491 = vst [vmem:[#allocation2_spill] sm:$0xff] %v3537_v1  ;;  %3476 = vmatprep.subr.msk.bf16.mxu1 %vm471_vm0, %v2603_v0  ;;  %3480 = vmatprep.subr.msk.bf16.mxu0 %vm471_vm0, %v3537_v1  ;;  %v473_v2 = vsel %vm471_vm0, %v2603_v0, 0  ;;  %v3545_v3 = vsel %vm471_vm0, %v3537_v1, 0  ;;  %v242_v4 = vld [vmem:[%s4463_s1] sm:$0x3]  ;;  %vm291_vm1 = vcmask 1046528  }
   0xf   : > { %4492 = vst [vmem:[#allocation3_spill] sm:$0xff] %v3545_v3  ;;  %2913 = vmatpush3.bf16.msra.mxu1 %v473_v2  ;;  %3049 = vmatpush3.bf16.msra.mxu0 %v3545_v3  ;;  %s4526_s13 = smov (!%p161_p3, %s2595_s13), 1  ;;  %v2687_v5 = vld [vmem:[%s4463_s1 + $0xa] sm:$0x3]  ;;  %vm422_vm2 = vcmask 31744   ;;  %v685_v25 = vsel %vm471_vm0, %v242_v4, 0 }
  0x10   : > { %3477 = vmatprep.subr.msk.bf16.mxu1 %vm471_vm0, %v242_v4  ;;  %3482 = vmatprep.subr.msk.bf16.mxu0 %vm471_vm0, %v2687_v5  ;;  %s3486_s22 = smul.u32 432, %s4526_s13  ;;  %v3634_v39 = vld [vmem:[%s4463_s1 + $0x4] sm:$0x3]  ;;  %v1651_v41 = vsel %vm471_vm0, %v2687_v5, 0  ;;  %v3663_v57 = vld [vmem:[%s4463_s1 + $0xc] sm:$0x3] }
  0x11   : > { %vm848_vm3 = vcmask 1045504   ;;  %s2758_s9 = sshll.u32 %s4526_s13, 8 }
  0x12   : > { %s3562_s25 = scalar_lea.vmem %s4462_s0, %s3486_s22  ;;  %s4361_s16 = scalar_lea.vmem %s4465_s3, %s2758_s9 }
  0x13   : > { %v3565_v6 = vld [vmem:[%s3562_s25] sm:$0xff]  ;;  %v3568_v7 = vld [vmem:[%s3562_s25 + $0x8] sm:$0xff]  ;;  %v3571_v8 = vld [vmem:[%s3562_s25 + $0x10] sm:$0x3] }
  0x14   : > { %v292_v9 = vrot.slane %v3565_v6, 1  ;;  %v293_v10 = vrot.slane %v3568_v7, 1  ;;  %v295_v11 = vrot.slane %v3571_v8, 1  ;;  %v3577_v12 = vld [vmem:[%s3562_s25 + $0x18] sm:$0xff]  ;;  %v3580_v13 = vld [vmem:[%s3562_s25 + $0x20] sm:$0xff]  ;;  %v3591_v17 = vld [vmem:[%s3562_s25 + $0x30] sm:$0xff] }
  0x15   : > { %v3583_v14 = vld [vmem:[%s3562_s25 + $0x28] sm:$0x3]  ;;  %v3587_v15 = vpack.c.bf16 %v3580_v13, %v3577_v12  ;;  %v297_v16 = vrot.slane %v3577_v12, 1  ;;  %v298_v20 = vrot.slane %v3580_v13, 1  ;;  %v3598_v22 = vld [vmem:[%s3562_s25 + $0x38] sm:$0xff]  ;;  %v3608_v27 = vld [vmem:[%s3562_s25 + $0x50] sm:$0xff] }
  0x16   : > { %v294_v18 = vsel %vm291_vm1, %v292_v9, %v293_v10  ;;  %v296_v19 = vsel %vm291_vm1, %v293_v10, %v295_v11  ;;  %v300_v21 = vrot.slane %v3583_v14, 1  ;;  %v3601_v23 = vld [vmem:[%s3562_s25 + $0x40] sm:$0x3]  ;;  %v3605_v26 = vld [vmem:[%s3562_s25 + $0x48] sm:$0xff]  ;;  %v302_v30 = vrot.slane %v3591_v17, 1  ;;  %v3629_v38 = vld [vmem:[%s3562_s25 + $0x78] sm:$0xff] }
  0x17   : > { %v404_v24 = vpack.c.bf16 %v296_v19, %v294_v18  ;;  %v299_v28 = vsel %vm291_vm1, %v297_v16, %v298_v20  ;;  %v303_v31 = vrot.slane %v3598_v22, 1  ;;  %v3615_v32 = vld [vmem:[%s3562_s25 + $0x58] sm:$0x3]  ;;  %v3618_v33 = vld [vmem:[%s3562_s25 + $0x60] sm:$0xff]  ;;  %v3621_v34 = vld [vmem:[%s3562_s25 + $0x68] sm:$0xff]  ;;  %v305_v36 = vrot.slane %v3601_v23, 1 }
  0x18   : > { %v301_v29 = vsel %vm291_vm1, %v298_v20, %v300_v21  ;;  %v3626_v37 = vld [vmem:[%s3562_s25 + $0x70] sm:$0x3]  ;;  %v307_v42 = vrot.slane %v3605_v26, 1  ;;  %v308_v43 = vrot.slane %v3608_v27, 1  ;;  %v3641_v44 = vld [vmem:[%s3562_s25 + $0x80] sm:$0xff]  ;;  %v310_v47 = vrot.slane %v3615_v32, 1 }
  0x19   : > { %2914 = vmatprep.mubr.msk.bf16.mxu1 %vm422_vm2, %v404_v24  ;;  %v405_v35 = vpack.c.bf16 %v301_v29, %v299_v28  ;;  %v304_v40 = vsel %vm291_vm1, %v302_v30, %v303_v31  ;;  %v3644_v45 = vld [vmem:[%s3562_s25 + $0x88] sm:$0x3]  ;;  %v306_v46 = vsel %vm291_vm1, %v303_v31, %v305_v36  ;;  %v312_v48 = vrot.slane %v3618_v33, 1  ;;  %v3680_v63 = vld [vmem:[%s3562_s25 + $0x90] sm:$0xff]  ;;  %v3683_v0 = vld [vmem:[%s3562_s25 + $0x98] sm:$0xff] }
  0x1a   : > { %v313_v49 = vrot.slane %v3621_v34, 1  ;;  %v3652_v50 = vpack.c.bf16 %v306_v46, %v304_v40  ;;  %v309_v51 = vsel %vm291_vm1, %v307_v42, %v308_v43  ;;  %v315_v52 = vrot.slane %v3626_v37, 1  ;;  %v3686_v2 = vld [vmem:[%s3562_s25 + $0xa0] sm:$0x3]  ;;  %v3691_v4 = vld [vmem:[%s3562_s25 + $0xa8] sm:$0xff]  ;;  %v3694_v5 = vld [vmem:[%s3562_s25 + $0xb0] sm:$0xff] }
  0x1b   : > { %3050 = vmatprep.mubr.msk.bf16.mxu0 %vm422_vm2, %v405_v35  ;;  %2915 = vmatmul.mubr.msk.bf16.vlgmr.msra.gmra.mrb[0].mxu1 %vm422_vm2, %v405_v35  ;;  %v317_v53 = vrot.slane %v3629_v38, 1  ;;  %v311_v54 = vsel %vm291_vm1, %v308_v43, %v310_v47  ;;  %v318_v55 = vrot.slane %v3641_v44, 1  ;;  %v320_v56 = vrot.slane %v3644_v45, 1  ;;  %v3697_v9 = vld [vmem:[%s3562_s25 + $0xb8] sm:$0x3]  ;;  %v3720_v29 = vld [vmem:[%s3562_s25 + $0xc0] sm:$0xff] }
  0x1c   : > { %2947 = vmatpush3.bf16.msra.mxu1 %v685_v25  ;;  %4493 = vst [vmem:[#allocation4_spill] sm:$0xff] %v3652_v50  ;;  %3051 = vmatmul.mubr.msk.bf16.vlgmr.msra.gmra.mrb[0].mxu0 %vm422_vm2, %v3652_v50  ;;  %v3671_v58 = vpack.c.bf16 %v311_v54, %v309_v51  ;;  %v314_v59 = vsel %vm291_vm1, %v312_v48, %v313_v49  ;;  %v322_v16 = vrot.slane %v3680_v63, 1  ;;  %v323_v18 = vrot.slane %v3683_v0, 1  ;;  %v3723_v30 = vld [vmem:[%s3562_s25 + $0xc8] sm:$0xff]  ;;  %v3728_v36 = vld [vmem:[%s3562_s25 + $0xd0] sm:$0x3] }
  0x1d   : > { %3478 = vmatprep.subr.msk.bf16.mxu1 %vm471_vm0, %v3634_v39  ;;  %2918 = vmatprep.mubr.msk.bf16.mxu1 %vm422_vm2, %v3652_v50  ;;  %v316_v60 = vsel %vm291_vm1, %v313_v49, %v315_v52  ;;  %v319_v61 = vsel %vm291_vm1, %v317_v53, %v318_v55  ;;  %v321_v62 = vsel %vm291_vm1, %v318_v55, %v320_v56  ;;  %v325_v19 = vrot.slane %v3686_v2, 1  ;;  %v3751_v49 = vld [vmem:[%s3562_s25 + $0xe8] sm:$0x3]  ;;  %v3756_v53 = vld [vmem:[%s3562_s25 + $0xf0] sm:$0xff]  ;;  %v3759_v54 = vld [vmem:[%s3562_s25 + $0xf8] sm:$0xff] }
  0x1e   : > { %4494 = vst [vmem:[#allocation5_spill] sm:$0xff] %v3671_v58  ;;  %3083 = vmatpush3.bf16.msra.mxu0 %v1651_v41  ;;  %3054 = vmatprep.mubr.msk.bf16.mxu0 %vm422_vm2, %v3671_v58  ;;  %v3699_v10 = vpack.c.bf16 %v316_v60, %v314_v59  ;;  %v3703_v11 = vpack.c.bf16 %v321_v62, %v319_v61  ;;  %v327_v20 = vrot.slane %v3691_v4, 1  ;;  %v328_v21 = vrot.slane %v3694_v5, 1  ;;  %v3768_v61 = vld [vmem:[%s3562_s25 + $0x100] sm:$0x3] }
  0x1f   : > { %3483 = vmatprep.subr.msk.bf16.mxu0 %vm471_vm0, %v3663_v57  ;;  %v330_v24 = vrot.slane %v3697_v9, 1  ;;  %v324_v25 = vsel %vm291_vm1, %v322_v16, %v323_v18  ;;  %v326_v28 = vsel %vm291_vm1, %v323_v18, %v325_v19  ;;  %v854_v40 = vrot.slane %v3577_v12, 2 }
  0x20   : > { %4495 = vst [vmem:[#allocation6_spill] sm:$0xff] %v3699_v10  ;;  %4496 = vst [vmem:[#allocation7_spill] sm:$0xff] %v3703_v11  ;;  %v329_v31 = vsel %vm291_vm1, %v327_v20, %v328_v21  ;;  %v855_v41 = vrot.slane %v3580_v13, 2  ;;  %v857_v42 = vrot.slane %v3583_v14, 2  ;;  %v3733_v43 = vpack.c.bf16 %v326_v28, %v324_v25  ;;  %v3745_v13 = vld [vmem:[%s3562_s25 + $0xd8] sm:$0xff]  ;;  %v3748_v14 = vld [vmem:[%s3562_s25 + $0xe0] sm:$0xff] }
  0x21   : > { %v331_v35 = vsel %vm291_vm1, %v328_v21, %v330_v24  ;;  %v332_v46 = vrot.slane %v3720_v29, 1  ;;  %v333_v47 = vrot.slane %v3723_v30, 1  ;;  %v335_v12 = vrot.slane %v3728_v36, 1  ;;  %v3784_v28 = vld [vmem:[%s3562_s25 + $0x108] sm:$0xff] }
  0x22   : > { %4497 = vst [vmem:[#allocation8_spill] sm:$0xff] %v3733_v43  ;;  %v3739_v48 = vpack.c.bf16 %v331_v35, %v329_v31  ;;  %v859_v51 = vrot.slane %v3591_v17, 2  ;;  %v860_v52 = vrot.slane %v3598_v22, 2  ;;  %v862_v55 = vrot.slane %v3601_v23, 2  ;;  %v3787_v31 = vld [vmem:[%s3562_s25 + $0x110] sm:$0xff] }
  0x23   : > { %2919 = vmatmul.mubr.msk.bf16.gmra.mrb[4].mxu1 %vm422_vm2, %v3671_v58  ;;  %v334_v56 = vsel %vm291_vm1, %v332_v46, %v333_v47  ;;  %v856_v59 = vsel %vm848_vm3, %v854_v40, %v855_v41  ;;  %v858_v60 = vsel %vm848_vm3, %v855_v41, %v857_v42  ;;  %v336_v62 = vsel %vm291_vm1, %v333_v47, %v335_v12  ;;  %v3790_v35 = vld [vmem:[%s3562_s25 + $0x118] sm:$0x3]  ;;  %v3799_v47 = vld [vmem:[%s3562_s25 + $0x120] sm:$0xff] }
  0x24   : > { %2922 = vmatprep.mubr.msk.bf16.mxu1 %vm422_vm2, %v3699_v10  ;;  %3055 = vmatmul.mubr.msk.bf16.gmra.mrb[4].mxu0 %vm422_vm2, %v3699_v10  ;;  %4498 = vst [vmem:[#allocation9_spill] sm:$0xff] %v3739_v48  ;;  %v337_v23 = vrot.slane %v3745_v13, 1  ;;  %v338_v16 = vrot.slane %v3748_v14, 1  ;;  %v340_v18 = vrot.slane %v3751_v49, 1  ;;  %v342_v19 = vrot.slane %v3756_v53, 1  ;;  %v3839_v10 = vld [vmem:[%s3562_s25 + $0x138] sm:$0xff] }
  0x25   : > { %3058 = vmatprep.mubr.msk.bf16.mxu0 %vm422_vm2, %v3703_v11  ;;  %v343_v20 = vrot.slane %v3759_v54, 1  ;;  %v345_v21 = vrot.slane %v3768_v61, 1  ;;  %v3779_v24 = vpack.c.bf16 %v336_v62, %v334_v56  ;;  %v3781_v25 = vpack.c.bf16 %v858_v60, %v856_v59  ;;  %v3808_v62 = vld [vmem:[%s3562_s25 + $0x128] sm:$0xff] }
  0x26   : > { %v339_v40 = vsel %vm291_vm1, %v337_v23, %v338_v16  ;;  %v341_v41 = vsel %vm291_vm1, %v338_v16, %v340_v18  ;;  %v861_v42 = vsel %vm848_vm3, %v859_v51, %v860_v52  ;;  %v863_v46 = vsel %vm848_vm3, %v860_v52, %v862_v55  ;;  %v3811_v23 = vld [vmem:[%s3562_s25 + $0x130] sm:$0x3] }
  0x27   : > { %4499 = vst [vmem:[#allocation10_spill] sm:$0xff] %v3779_v24  ;;  %v344_v12 = vsel %vm291_vm1, %v342_v19, %v343_v20  ;;  %v864_v56 = vrot.slane %v3605_v26, 2  ;;  %v865_v59 = vrot.slane %v3608_v27, 2  ;;  %v867_v60 = vrot.slane %v3615_v32, 2 }
  0x28   : > { %v346_v51 = vsel %vm291_vm1, %v343_v20, %v345_v21  ;;  %v347_v52 = vrot.slane %v3784_v28, 1  ;;  %v348_v55 = vrot.slane %v3787_v31, 1  ;;  %v350_v16 = vrot.slane %v3790_v35, 1 }
  0x29   : > { %v1853_v32 = vsel %vm471_vm0, %v3663_v57, 0  ;;  %v3823_v18 = vpack.c.bf16 %v341_v41, %v339_v40  ;;  %v352_v19 = vrot.slane %v3799_v47, 1  ;;  %v353_v20 = vrot.slane %v3808_v62, 1 }
  0x2a   : > { %v355_v21 = vrot.slane %v3811_v23, 1  ;;  %v3828_v3 = vpack.c.bf16 %v863_v46, %v861_v42  ;;  %v868_v57 = vsel %vm848_vm3, %v865_v59, %v867_v60  ;;  %v351_v40 = vsel %vm291_vm1, %v348_v55, %v350_v16  ;;  %v3842_v42 = vld [vmem:[%s3562_s25 + $0x140] sm:$0xff] }
  0x2b   : > { %2923 = vmatmul.mubr.msk.bf16.gmra.mrb[8].mxu1 %vm422_vm2, %v3703_v11  ;;  %4500 = vst [vmem:[#allocation11_spill] sm:$0xff] %v3823_v18  ;;  %v869_v41 = vrot.slane %v3618_v33, 2  ;;  %v870_v11 = vrot.slane %v3621_v34, 2  ;;  %v872_v46 = vrot.slane %v3626_v37, 2  ;;  %v3852_v60 = vpack.c.bf16 %v3598_v22, %v3591_v17  ;;  %v3866_v17 = vld [vmem:[%s3562_s25 + $0x150] sm:$0xff]  ;;  %v3869_v22 = vld [vmem:[%s3562_s25 + $0x158] sm:$0xff] }
  0x2c   : > { %2926 = vmatprep.mubr.msk.bf16.mxu1 %vm422_vm2, %v3733_v43  ;;  %3059 = vmatmul.mubr.msk.bf16.gmra.mrb[8].mxu0 %vm422_vm2, %v3733_v43  ;;  %4501 = vst [vmem:[#allocation12_spill] sm:$0xff] %v3828_v3  ;;  %v349_v43 = vsel %vm291_vm1, %v347_v52, %v348_v55  ;;  %v354_v52 = vsel %vm291_vm1, %v352_v19, %v353_v20  ;;  %v877_v37 = vrot.slane %v3644_v45, 2  ;;  %v357_v16 = vrot.slane %v3839_v10, 1 }
  0x2d   : > { %3062 = vmatprep.mubr.msk.bf16.mxu0 %vm422_vm2, %v3739_v48  ;;  %v356_v55 = vsel %vm291_vm1, %v353_v20, %v355_v21  ;;  %v358_v58 = vrot.slane %v3842_v42, 1  ;;  %v871_v19 = vsel %vm848_vm3, %v869_v41, %v870_v11  ;;  %v3880_v45 = vpack.c.bf16 %v3608_v27, %v3605_v26  ;;  %v3885_v21 = vld [vmem:[%s4463_s1 + $0xe] sm:$0x3] }
  0x2e   : > { %v3895_v41 = vpack.c.bf16 %v3621_v34, %v3618_v33  ;;  %v362_v27 = vrot.slane %v3866_v17, 1  ;;  %v880_v33 = vrot.slane %v3683_v0, 2  ;;  %v3908_v34 = vpack.c.bf16 %v3641_v44, %v3629_v38 }
  0x33   : > { %2927 = vmatmul.mubr.msk.bf16.gmra.mrb[12].mxu1 %vm422_vm2, %v3739_v48  ;;  %v3830_v48 = vpack.c.bf16 %v346_v51, %v344_v12  ;;  %v874_v12 = vrot.slane %v3629_v38, 2  ;;  %v3922_v38 = vld [vmem:[%s3562_s25 + $0x168] sm:$0xff] }
  0x34   : > { %2930 = vmatprep.mubr.msk.bf16.mxu1 %vm422_vm2, %v3779_v24  ;;  %3063 = vmatmul.mubr.msk.bf16.gmra.mrb[12].mxu0 %vm422_vm2, %v3779_v24  ;;  %v866_v24 = vsel %vm848_vm3, %v864_v56, %v865_v59  ;;  %v875_v56 = vrot.slane %v3641_v44, 2  ;;  %v3848_v59 = vld [vmem:[%s3562_s25 + $0x148] sm:$0x3]  ;;  %v3926_v44 = vpack.c.bf16 %v3683_v0, %v3680_v63  ;;  %v852_v0 = vrot.slane %v3571_v8, 2 }
  0x35   : > { %3084 = vmatprep.mubr.msk.bf16.mxu0 %vm422_vm2, %v3781_v25  ;;  %4502 = vst [vmem:[#allocation13_spill] sm:$0xff] %v3830_v48  ;;  %v3856_v51 = vpack.c.bf16 %v868_v57, %v866_v24  ;;  %v3874_v24 = vpack.c.bf16 %v351_v40, %v349_v43  ;;  %v360_v20 = vrot.slane %v3848_v59, 1  ;;  %v873_v57 = vsel %vm848_vm3, %v870_v11, %v872_v46 }
  0x36   : > { %v3890_v43 = vpack.c.bf16 %v356_v55, %v354_v52  ;;  %v876_v40 = vsel %vm848_vm3, %v874_v12, %v875_v56  ;;  %v878_v26 = vsel %vm848_vm3, %v875_v56, %v877_v37  ;;  %v359_v46 = vsel %vm291_vm1, %v357_v16, %v358_v58 }
  0x37   : > { %4503 = vst [vmem:[#allocation14_spill] sm:$0xff] %v3856_v51  ;;  %4504 = vst [vmem:[#allocation15_spill] sm:$0xff] %v3874_v24  ;;  %v879_v12 = vrot.slane %v3680_v63, 2  ;;  %v882_v56 = vrot.slane %v3686_v2, 2  ;;  %v884_v52 = vrot.slane %v3691_v4, 2  ;;  %v885_v55 = vrot.slane %v3694_v5, 2 }
  0x38   : > { %4505 = vst [vmem:[#allocation16_spill] sm:$0xff] %v3890_v43  ;;  %v849_v37 = vrot.slane %v3565_v6, 2  ;;  %v3917_v16 = vpack.c.bf16 %v873_v57, %v871_v19  ;;  %v3919_v50 = vpack.c.bf16 %v878_v26, %v876_v40  ;;  %v3937_v19 = vld [vmem:[%s3562_s25 + $0x178] sm:$0x3]  ;;  %v3941_v57 = vpack.c.bf16 %v3694_v5, %v3691_v4 }
  0x39   : > { %v850_v63 = vrot.slane %v3568_v7, 2  ;;  %v886_v26 = vsel %vm848_vm3, %v884_v52, %v885_v55  ;;  %v3955_v4 = vpack.c.bf16 %v3723_v30, %v3720_v29  ;;  %v3984_v52 = vpack.c.bf16 %v3842_v42, %v3839_v10 }
  0x3a   : > { %4506 = vst [vmem:[#allocation17_spill] sm:$0xff] %v3917_v16  ;;  %4507 = vst [vmem:[#allocation18_spill] sm:$0xff] %v3919_v50 }
  0x3b   : > { %2931 = vmatmul.mubr.msk.bf16.gmra.mrb[16].mxu1 %vm422_vm2, %v3823_v18  ;;  %v3872_v18 = vld [vmem:[%s3562_s25 + $0x160] sm:$0x3] }
  0x3c   : > { %2934 = vmatprep.mubr.msk.bf16.mxu1 %vm422_vm2, %v3830_v48  ;;  %3085 = vmatmul.mubr.msk.bf16.vlgmr.msra.gmra.mrb[0].mxu0 %vm422_vm2, %v3828_v3  ;;  %v363_v48 = vrot.slane %v3869_v22, 1  ;;  %v365_v11 = vrot.slane %v3872_v18, 1  ;;  %v892_v3 = vrot.slane %v3728_v36, 2 }
  0x3d   : > { %3117 = vmatpush3.bf16.msra.mxu0 %v1853_v32  ;;  %3088 = vmatprep.mubr.msk.bf16.mxu0 %vm422_vm2, %v3856_v51  ;;  %v361_v32 = vsel %vm291_vm1, %v358_v58, %v360_v20  ;;  %v887_v20 = vrot.slane %v3697_v9, 2  ;;  %v3934_v51 = vld [vmem:[%s3562_s25 + $0x170] sm:$0xff]  ;;  %v883_v9 = vsel %vm848_vm3, %v880_v33, %v882_v56  ;;  %v3980_v56 = vpack.c.bf16 %v3808_v62, %v3799_v47 }
  0x3e   : > { %3484 = vmatprep.subr.msk.bf16.mxu0 %vm471_vm0, %v3885_v21  ;;  %v364_v58 = vsel %vm291_vm1, %v362_v27, %v363_v48  ;;  %v366_v2 = vsel %vm291_vm1, %v363_v48, %v365_v11  ;;  %v3947_v40 = vpack.c.bf16 %v361_v32, %v359_v46  ;;  %v881_v48 = vsel %vm848_vm3, %v879_v12, %v880_v33 }
  0x3f   : > { %v367_v27 = vrot.slane %v3922_v38, 1  ;;  %v3959_v8 = vpack.c.bf16 %v366_v2, %v364_v58  ;;  %v368_v5 = vrot.slane %v3934_v51, 1  ;;  %v370_v11 = vrot.slane %v3937_v19, 1 }
  0x40   : > { %v3965_v46 = vpack.c.bf16 %v3748_v14, %v3745_v13  ;;  %v888_v12 = vsel %vm848_vm3, %v885_v55, %v887_v20  ;;  %v3972_v33 = vpack.c.bf16 %v3759_v54, %v3756_v53  ;;  %v3976_v32 = vpack.c.bf16 %v3787_v31, %v3784_v28 }
  0x41   : > { %v3988_v58 = vpack.c.bf16 %v3869_v22, %v3866_v17  ;;  %v3992_v55 = vpack.c.bf16 %v3934_v51, %v3922_v38  ;;  %v3995_v2 = vsel %vm848_vm3, %v849_v37, %v850_v63  ;;  %v3998_v20 = vsel %vm848_vm3, %v850_v63, %v852_v0 }
  0x42   : > { %v369_v1 = vsel %vm291_vm1, %v367_v27, %v368_v5  ;;  %v890_v37 = vrot.slane %v3723_v30, 2  ;;  %v371_v63 = vsel %vm291_vm1, %v368_v5, %v370_v11  ;;  %v895_v0 = vrot.slane %v3748_v14, 2 }
  0x43   : > { %2935 = vmatmul.mubr.msk.bf16.gmra.mrb[20].mxu1 %vm422_vm2, %v3874_v24  ;;  %v889_v24 = vrot.slane %v3720_v29, 2  ;;  %v894_v29 = vrot.slane %v3745_v13, 2  ;;  %v4022_v30 = vpack.c.bf16 %v371_v63, %v369_v1  ;;  %v899_v1 = vrot.slane %v3756_v53, 2 }
  0x44   : > { %2938 = vmatprep.mubr.msk.bf16.mxu1 %vm422_vm2, %v3890_v43  ;;  %3089 = vmatmul.mubr.msk.bf16.gmra.mrb[4].mxu0 %vm422_vm2, %v3917_v16  ;;  %v4000_v43 = vpack.c.bf16 %v883_v9, %v881_v48  ;;  %v4007_v16 = vpack.c.bf16 %v888_v12, %v886_v26  ;;  %v897_v48 = vrot.slane %v3751_v49, 2  ;;  %v893_v9 = vsel %vm848_vm3, %v890_v37, %v892_v3 }
  0x45   : > { %3092 = vmatprep.mubr.msk.bf16.mxu0 %vm422_vm2, %v3919_v50  ;;  %v961_v50 = vpack.c.bf16 %v3998_v20, %v3995_v2  ;;  %v891_v36 = vsel %vm848_vm3, %v889_v24, %v890_v37  ;;  %v226_v26 = vpack.c.bf16 %v3568_v7, %v3565_v6  ;;  %v896_v13 = vsel %vm848_vm3, %v894_v29, %v895_v0  ;;  %v4509_v2 = vld [vmem:[#allocation2_spill] sm:$0xff]  ;;  %v4511_v20 = vld [vmem:[#allocation17_spill] sm:$0xff] }
  0x46   : > { %v898_v14 = vsel %vm848_vm3, %v895_v0, %v897_v48  ;;  %v4030_v49 = vpack.c.bf16 %v893_v9, %v891_v36  ;;  %v900_v24 = vrot.slane %v3759_v54, 2  ;;  %v902_v3 = vrot.slane %v3768_v61, 2 }
  0x47   : > { %v4034_v27 = vpack.c.bf16 %v898_v14, %v896_v13  ;;  %v904_v6 = vrot.slane %v3784_v28, 2  ;;  %v905_v7 = vrot.slane %v3787_v31, 2  ;;  %v907_v5 = vrot.slane %v3790_v35, 2  ;;  %v4058_v35 = vld [vmem:[%s4463_s1 + $0x6] sm:$0x3] }
  0x48   : > { %v901_v53 = vsel %vm848_vm3, %v899_v1, %v900_v24  ;;  %v903_v54 = vsel %vm848_vm3, %v900_v24, %v902_v3  ;;  %v1028_v28 = vsel %vm471_vm0, %v3634_v39, 0  ;;  %v909_v37 = vrot.slane %v3799_v47, 2  ;;  %v220_v3 = vld [vmem:[%s3562_s25 + $0x180] sm:$0xff] }
  0x49   : > { %v906_v61 = vsel %vm848_vm3, %v904_v6, %v905_v7  ;;  %v908_v11 = vsel %vm848_vm3, %v905_v7, %v907_v5  ;;  %v4053_v31 = vpack.c.bf16 %v903_v54, %v901_v53  ;;  %v910_v63 = vrot.slane %v3808_v62, 2  ;;  %v222_v6 = vld [vmem:[%s3562_s25 + $0x190] sm:$0x3] }
  0x4a   : > { %v4062_v12 = vpack.c.bf16 %v908_v11, %v906_v61  ;;  %v912_v29 = vrot.slane %v3811_v23, 2  ;;  %v914_v39 = vrot.slane %v3839_v10, 2  ;;  %v915_v0 = vrot.slane %v3842_v42, 2 }
  0x4b   : > { %2939 = vmatmul.mubr.msk.bf16.gmra.mrb[24].mxu1 %vm422_vm2, %v3947_v40  ;;  %v917_v48 = vrot.slane %v3848_v59, 2  ;;  %v911_v47 = vsel %vm848_vm3, %v909_v37, %v910_v63  ;;  %v919_v36 = vrot.slane %v3866_v17, 2  ;;  %v920_v9 = vrot.slane %v3869_v22, 2 }
  0x4c   : > { %2942 = vmatprep.mubr.msk.bf16.mxu1 %vm422_vm2, %v3959_v8  ;;  %3093 = vmatmul.mubr.msk.bf16.gmra.mrb[8].mxu0 %vm422_vm2, %v4000_v43  ;;  %v913_v62 = vsel %vm848_vm3, %v910_v63, %v912_v29  ;;  %v916_v23 = vsel %vm848_vm3, %v914_v39, %v915_v0  ;;  %v924_v13 = vrot.slane %v3922_v38, 2  ;;  %v925_v14 = vrot.slane %v3934_v51, 2  ;;  %v221_v38 = vld [vmem:[%s3562_s25 + $0x188] sm:$0xff] }
  0x4d   : > { %3096 = vmatprep.mubr.msk.bf16.mxu0 %vm422_vm2, %v4007_v16  ;;  %v918_v10 = vsel %vm848_vm3, %v915_v0, %v917_v48  ;;  %v4082_v42 = vpack.c.bf16 %v913_v62, %v911_v47  ;;  %v927_v1 = vrot.slane %v3937_v19, 2  ;;  %v921_v17 = vsel %vm848_vm3, %v919_v36, %v920_v9  ;;  %v2738_v47 = vld [vmem:[%s4463_s1 + $0x10] sm:$0x3] }
  0x4e   : > { %v4086_v59 = vpack.c.bf16 %v918_v10, %v916_v23  ;;  %v1637_v7 = vrot.slane %v220_v3, 2  ;;  %v1638_v5 = vrot.slane %v221_v38, 2  ;;  %v1640_v53 = vrot.slane %v222_v6, 2  ;;  %v4508_v62 = vld [vmem:[#allocation12_spill] sm:$0xff]  ;;  %v223_v23 = vld [vmem:[%s3562_s25 + $0x198] sm:$0xff]  ;;  %v224_v10 = vld [vmem:[%s3562_s25 + $0x1a0] sm:$0xff] }
  0x4f   : > { %v928_v24 = vsel %vm848_vm3, %v925_v14, %v927_v1  ;;  %v1428_v54 = vrot.slane %v220_v3, 1  ;;  %v1429_v61 = vrot.slane %v221_v38, 1  ;;  %v1431_v11 = vrot.slane %v222_v6, 1  ;;  %v4516_v6 = vld [vmem:[#allocation7_spill] sm:$0xff] }
  0x50   : > { %v1641_v37 = vsel %vm848_vm3, %v1638_v5, %v1640_v53  ;;  %v2065_v48 = vsel %vm471_vm0, %v3885_v21, 0  ;;  %v1230_v21 = vsel %vm471_vm0, %v4058_v35, 0  ;;  %v2260_v36 = vrot.slane %v223_v23, 2  ;;  %v4519_v53 = vld [vmem:[#allocation10_spill] sm:$0xff] }
  0x51   : > { %v1430_v63 = vsel %vm291_vm1, %v1428_v54, %v1429_v61  ;;  %v1432_v29 = vsel %vm291_vm1, %v1429_v61, %v1431_v11  ;;  %v4520_v54 = vld [vmem:[#allocation11_spill] sm:$0xff]  ;;  %v4521_v61 = vld [vmem:[#allocation13_spill] sm:$0xff] }
  0x52   : > { %v4123_v39 = vpack.c.bf16 %v1432_v29, %v1430_v63  ;;  %v4522_v11 = vld [vmem:[#allocation3_spill] sm:$0xff] }
  0x53   : > { %2943 = vmatmul.mubr.msk.bf16.gmra.mrb[28].mxu1 %vm422_vm2, %v4022_v30 }
  0x54   : > { %2948 = vmatprep.mubr.msk.bf16.mxu1 %vm422_vm2, %v226_v26  ;;  %3097 = vmatmul.mubr.msk.bf16.gmra.mrb[12].mxu0 %vm422_vm2, %v4030_v49  ;;  %v922_v26 = vrot.slane %v3872_v18, 2  ;;  %v926_v18 = vsel %vm848_vm3, %v924_v13, %v925_v14  ;;  %v1846_v14 = vpack.c.bf16 %v224_v10, %v223_v23 }
  0x55   : > { %3100 = vmatprep.mubr.msk.bf16.mxu0 %vm422_vm2, %v4034_v27  ;;  %v4111_v19 = vpack.c.bf16 %v928_v24, %v926_v18  ;;  %v4513_v18 = vld [vmem:[#allocation4_spill] sm:$0xff]  ;;  %v2274_v24 = vsel %vm471_vm0, %v2738_v47, 0 }
  0x56   : > { %v923_v22 = vsel %vm848_vm3, %v920_v9, %v922_v26  ;;  %v2261_v9 = vrot.slane %v224_v10, 2  ;;  %v225_v26 = vld [vmem:[%s3562_s25 + $0x1a8] sm:$0x3] }
  0x57   : > { %v4107_v51 = vpack.c.bf16 %v923_v22, %v921_v17  ;;  %v2263_v13 = vrot.slane %v225_v26, 2 }
  0x58   : > { %v4211_v1 = vsel %vm848_vm3, %v2260_v36, %v2261_v9 }
  0x59   : > { %v4214_v17 = vsel %vm848_vm3, %v2261_v9, %v2263_v13 }
  0x5a   : > { %v2267_v22 = vpack.c.bf16 %v4214_v17, %v4211_v1 }
  0x5b   : > { %2949 = vmatmul.mubr.msk.bf16.vlgmr.msra.gmra.mrb[0].mxu1 %vm422_vm2, %v3587_v15 }
  0x5c   : > { %2981 = vmatpush3.bf16.msra.mxu1 %v1028_v28  ;;  %2952 = vmatprep.mubr.msk.bf16.mxu1 %vm422_vm2, %v3852_v60  ;;  %v1639_v28 = vsel %vm848_vm3, %v1637_v7, %v1638_v5  ;;  %v4517_v7 = vld [vmem:[#allocation8_spill] sm:$0xff]  ;;  %v4518_v5 = vld [vmem:[#allocation9_spill] sm:$0xff] }
  0x5d   : > { %3479 = vmatprep.subr.msk.bf16.mxu1 %vm471_vm0, %v4058_v35  ;;  %3101 = vmatmul.mubr.msk.bf16.gmra.mrb[16].mxu0 %vm422_vm2, %v4053_v31  ;;  %v4125_v0 = vpack.c.bf16 %v1641_v37, %v1639_v28  ;;  %v4197_v35 = vpack.c.bf16 %v221_v38, %v220_v3  ;;  %v4514_v3 = vld [vmem:[#allocation5_spill] sm:$0xff]  ;;  %v4515_v38 = vld [vmem:[#allocation6_spill] sm:$0xff]  ;;  %v4523_v28 = vld [vmem:[#allocation15_spill] sm:$0xff] }
  0x5e   : > { %3104 = vmatprep.mubr.msk.bf16.mxu0 %vm422_vm2, %v4062_v12  ;;  %v4524_v37 = vld [vmem:[#allocation16_spill] sm:$0xff] }
  0x63   : > { %2953 = vmatmul.mubr.msk.bf16.gmra.mrb[4].mxu1 %vm422_vm2, %v3880_v45 }
  0x64   : > { %2956 = vmatprep.mubr.msk.bf16.mxu1 %vm422_vm2, %v3895_v41 }
  0x65   : > { %3105 = vmatmul.mubr.msk.bf16.gmra.mrb[20].mxu0 %vm422_vm2, %v4082_v42 }
  0x66   : > { %3108 = vmatprep.mubr.msk.bf16.mxu0 %vm422_vm2, %v4086_v59 }
  0x6b   : > { %2957 = vmatmul.mubr.msk.bf16.gmra.mrb[8].mxu1 %vm422_vm2, %v3908_v34 }
  0x6c   : > { %2960 = vmatprep.mubr.msk.bf16.mxu1 %vm422_vm2, %v3926_v44 }
  0x6d   : > { %3109 = vmatmul.mubr.msk.bf16.gmra.mrb[24].mxu0 %vm422_vm2, %v4107_v51 }
  0x6e   : > { %3112 = vmatprep.mubr.msk.bf16.mxu0 %vm422_vm2, %v4111_v19 }
  0x73   : > { %2961 = vmatmul.mubr.msk.bf16.gmra.mrb[12].mxu1 %vm422_vm2, %v3941_v57 }
  0x74   : > { %2964 = vmatprep.mubr.msk.bf16.mxu1 %vm422_vm2, %v3955_v4 }
  0x75   : > { %3113 = vmatmul.mubr.msk.bf16.gmra.mrb[28].mxu0 %vm422_vm2, %v4125_v0 }
  0x76   : > { %3118 = vmatprep.mubr.msk.bf16.mxu0 %vm422_vm2, %v3852_v60 }
  0x7b   : > { %2965 = vmatmul.mubr.msk.bf16.gmra.mrb[16].mxu1 %vm422_vm2, %v3965_v46 }
  0x7c   : > { %2968 = vmatprep.mubr.msk.bf16.mxu1 %vm422_vm2, %v3972_v33 }
  0x7d   : > { %3119 = vmatmul.mubr.msk.bf16.vlgmr.msra.gmra.mrb[0].mxu0 %vm422_vm2, %v3880_v45 }
  0x7e   : > { %3151 = vmatpush3.bf16.msra.mxu0 %v2065_v48  ;;  %3122 = vmatprep.mubr.msk.bf16.mxu0 %vm422_vm2, %v3895_v41 }
  0x7f   : > { %3485 = vmatprep.subr.msk.bf16.mxu0 %vm471_vm0, %v2738_v47 }
  0x83   : > { %2969 = vmatmul.mubr.msk.bf16.gmra.mrb[20].mxu1 %vm422_vm2, %v3976_v32 }
  0x84   : > { %2972 = vmatprep.mubr.msk.bf16.mxu1 %vm422_vm2, %v3980_v56 }
  0x85   : > { %3123 = vmatmul.mubr.msk.bf16.gmra.mrb[4].mxu0 %vm422_vm2, %v3908_v34 }
  0x86   : > { %3126 = vmatprep.mubr.msk.bf16.mxu0 %vm422_vm2, %v3926_v44 }
  0x8b   : > { %2973 = vmatmul.mubr.msk.bf16.gmra.mrb[24].mxu1 %vm422_vm2, %v3984_v52 }
  0x8c   : > { %2976 = vmatprep.mubr.msk.bf16.mxu1 %vm422_vm2, %v3988_v58 }
  0x8d   : > { %3127 = vmatmul.mubr.msk.bf16.gmra.mrb[8].mxu0 %vm422_vm2, %v3941_v57 }
  0x8e   : > { %3130 = vmatprep.mubr.msk.bf16.mxu0 %vm422_vm2, %v3955_v4 }
  0x93   : > { %2977 = vmatmul.mubr.msk.bf16.gmra.mrb[28].mxu1 %vm422_vm2, %v3992_v55 }
  0x94   : > { %2982 = vmatprep.mubr.msk.bf16.mxu1 %vm422_vm2, %v961_v50  ;;  %v4510_v50 = vld [vmem:[#allocation14_spill] sm:$0xff] }
  0x95   : > { %3131 = vmatmul.mubr.msk.bf16.gmra.mrb[12].mxu0 %vm422_vm2, %v3965_v46 }
  0x96   : > { %3134 = vmatprep.mubr.msk.bf16.mxu0 %vm422_vm2, %v3972_v33 }
  0x9b   : > { %2983 = vmatmul.mubr.msk.bf16.vlgmr.msra.gmra.mrb[0].mxu1 %vm422_vm2, %v3781_v25  ;;  %v4512_v25 = vld [vmem:[#allocation18_spill] sm:$0xff] }
  0x9c   : > { %3015 = vmatpush3.bf16.msra.mxu1 %v1230_v21  ;;  %2986 = vmatprep.mubr.msk.bf16.mxu1 %vm422_vm2, %v4508_v62 }
  0x9d   : > { %3481 = vmatprep.subr.msk.bf16.mxu1 %vm471_vm0, %v4509_v2  ;;  %3135 = vmatmul.mubr.msk.bf16.gmra.mrb[16].mxu0 %vm422_vm2, %v3976_v32 }
  0x9e   : > { %3138 = vmatprep.mubr.msk.bf16.mxu0 %vm422_vm2, %v3980_v56 }
  0xa3   : > { %2987 = vmatmul.mubr.msk.bf16.gmra.mrb[4].mxu1 %vm422_vm2, %v4510_v50 }
  0xa4   : > { %2990 = vmatprep.mubr.msk.bf16.mxu1 %vm422_vm2, %v4511_v20 }
  0xa5   : > { %3139 = vmatmul.mubr.msk.bf16.gmra.mrb[20].mxu0 %vm422_vm2, %v3984_v52 }
  0xa6   : > { %3142 = vmatprep.mubr.msk.bf16.mxu0 %vm422_vm2, %v3988_v58 }
  0xab   : > { %2991 = vmatmul.mubr.msk.bf16.gmra.mrb[8].mxu1 %vm422_vm2, %v4512_v25 }
  0xac   : > { %2994 = vmatprep.mubr.msk.bf16.mxu1 %vm422_vm2, %v4000_v43 }
  0xad   : > { %3143 = vmatmul.mubr.msk.bf16.gmra.mrb[24].mxu0 %vm422_vm2, %v3992_v55 }
  0xae   : > { %3146 = vmatprep.mubr.msk.bf16.mxu0 %vm422_vm2, %v4197_v35 }
  0xb3   : > { %2995 = vmatmul.mubr.msk.bf16.gmra.mrb[12].mxu1 %vm422_vm2, %v4007_v16 }
  0xb4   : > { %2998 = vmatprep.mubr.msk.bf16.mxu1 %vm422_vm2, %v4030_v49 }
  0xb5   : > { %3147 = vmatmul.mubr.msk.bf16.gmra.mrb[28].mxu0 %vm422_vm2, %v1846_v14 }
  0xb6   : > { %3152 = vmatprep.mubr.msk.bf16.mxu0 %vm422_vm2, %v4513_v18 }
  0xbb   : > { %2999 = vmatmul.mubr.msk.bf16.gmra.mrb[16].mxu1 %vm422_vm2, %v4034_v27 }
  0xbc   : > { %3002 = vmatprep.mubr.msk.bf16.mxu1 %vm422_vm2, %v4053_v31 }
  0xbd   : > { %3153 = vmatmul.mubr.msk.bf16.vlgmr.msra.gmra.mrb[0].mxu0 %vm422_vm2, %v4514_v3 }
  0xbe   : > { %3185 = vmatpush3.bf16.msra.mxu0 %v2274_v24  ;;  %3156 = vmatprep.mubr.msk.bf16.mxu0 %vm422_vm2, %v4515_v38 }
  0xc3   : > { %3003 = vmatmul.mubr.msk.bf16.gmra.mrb[20].mxu1 %vm422_vm2, %v4062_v12 }
  0xc4   : > { %3006 = vmatprep.mubr.msk.bf16.mxu1 %vm422_vm2, %v4082_v42 }
  0xc5   : > { %3157 = vmatmul.mubr.msk.bf16.gmra.mrb[4].mxu0 %vm422_vm2, %v4516_v6 }
  0xc6   : > { %3160 = vmatprep.mubr.msk.bf16.mxu0 %vm422_vm2, %v4517_v7 }
  0xcb   : > { %3007 = vmatmul.mubr.msk.bf16.gmra.mrb[24].mxu1 %vm422_vm2, %v4086_v59 }
  0xcc   : > { %3010 = vmatprep.mubr.msk.bf16.mxu1 %vm422_vm2, %v4107_v51 }
  0xcd   : > { %3161 = vmatmul.mubr.msk.bf16.gmra.mrb[8].mxu0 %vm422_vm2, %v4518_v5 }
  0xce   : > { %3164 = vmatprep.mubr.msk.bf16.mxu0 %vm422_vm2, %v4519_v53 }
  0xd3   : > { %3011 = vmatmul.mubr.msk.bf16.gmra.mrb[28].mxu1 %vm422_vm2, %v4111_v19 }
  0xd4   : > { %3016 = vmatprep.mubr.msk.bf16.mxu1 %vm422_vm2, %v3587_v15  ;;  %v2051_v15 = vrot.slane %v223_v23, 1 }
  0xd5   : > { %3165 = vmatmul.mubr.msk.bf16.gmra.mrb[12].mxu0 %vm422_vm2, %v4520_v54 }
  0xd6   : > { %3168 = vmatprep.mubr.msk.bf16.mxu0 %vm422_vm2, %v4521_v61 }
  0xdb   : > { %3017 = vmatmul.mubr.msk.bf16.vlgmr.msra.gmra.mrb[0].mxu1 %vm422_vm2, %v3852_v60  ;;  %v2052_v60 = vrot.slane %v224_v10, 1 }
  0xdc   : > { %3219 = vmatpush3.bf16.msra.mxu1 %v4522_v11  ;;  %3020 = vmatprep.mubr.msk.bf16.mxu1 %vm422_vm2, %v3880_v45  ;;  %v2054_v45 = vrot.slane %v225_v26, 1 }
  0xdd   : > { %3169 = vmatmul.mubr.msk.bf16.gmra.mrb[16].mxu0 %vm422_vm2, %v4523_v28 }
  0xde   : > { %3172 = vmatprep.mubr.msk.bf16.mxu0 %vm422_vm2, %v4524_v37 }
  0xe3   : > { %3021 = vmatmul.mubr.msk.bf16.gmra.mrb[4].mxu1 %vm422_vm2, %v3895_v41  ;;  %v2053_v41 = vsel %vm291_vm1, %v2051_v15, %v2052_v60 }
  0xe4   : > { %3024 = vmatprep.mubr.msk.bf16.mxu1 %vm422_vm2, %v3908_v34  ;;  %v2055_v34 = vsel %vm291_vm1, %v2052_v60, %v2054_v45 }
  0xe5   : > { %3173 = vmatmul.mubr.msk.bf16.gmra.mrb[20].mxu0 %vm422_vm2, %v3947_v40  ;;  %v2058_v63 = vpack.c.bf16 %v2055_v34, %v2053_v41 }
  0xe6   : > { %3176 = vmatprep.mubr.msk.bf16.mxu0 %vm422_vm2, %v3959_v8 }
  0xeb   : > { %3025 = vmatmul.mubr.msk.bf16.gmra.mrb[8].mxu1 %vm422_vm2, %v3926_v44 }
  0xec   : > { %3028 = vmatprep.mubr.msk.bf16.mxu1 %vm422_vm2, %v3941_v57 }
  0xed   : > { %3177 = vmatmul.mubr.msk.bf16.gmra.mrb[24].mxu0 %vm422_vm2, %v4022_v30 }
  0xee   : > { %3180 = vmatprep.mubr.msk.bf16.mxu0 %vm422_vm2, %v4123_v39 }
  0xf3   : > { %3029 = vmatmul.mubr.msk.bf16.gmra.mrb[12].mxu1 %vm422_vm2, %v3955_v4 }
  0xf4   : > { %3032 = vmatprep.mubr.msk.bf16.mxu1 %vm422_vm2, %v3965_v46 }
  0xf5   : > { %3181 = vmatmul.mubr.msk.bf16.gmra.mrb[28].mxu0 %vm422_vm2, %v2058_v63 }
  0xf6   : > { %3186 = vmatprep.mubr.msk.bf16.mxu0 %vm422_vm2, %v4508_v62 }
  0xfb   : > { %3033 = vmatmul.mubr.msk.bf16.gmra.mrb[16].mxu1 %vm422_vm2, %v3972_v33 }
  0xfc   : > { %3036 = vmatprep.mubr.msk.bf16.mxu1 %vm422_vm2, %v3976_v32 }
  0xfd   : > { %3187 = vmatmul.mubr.msk.bf16.vlgmr.msra.gmra.mrb[0].mxu0 %vm422_vm2, %v4510_v50 }
  0xfe   : > { %3190 = vmatprep.mubr.msk.bf16.mxu0 %vm422_vm2, %v4511_v20 }
 0x103   : > { %3037 = vmatmul.mubr.msk.bf16.gmra.mrb[20].mxu1 %vm422_vm2, %v3980_v56 }
 0x104   : > { %3040 = vmatprep.mubr.msk.bf16.mxu1 %vm422_vm2, %v3984_v52 }
 0x105   : > { %3191 = vmatmul.mubr.msk.bf16.gmra.mrb[4].mxu0 %vm422_vm2, %v4512_v25 }
 0x106   : > { %3194 = vmatprep.mubr.msk.bf16.mxu0 %vm422_vm2, %v4000_v43 }
 0x10b   : > { %3041 = vmatmul.mubr.msk.bf16.gmra.mrb[24].mxu1 %vm422_vm2, %v3988_v58 }
 0x10c   : > { %3044 = vmatprep.mubr.msk.bf16.mxu1 %vm422_vm2, %v3992_v55 }
 0x10d   : > { %3195 = vmatmul.mubr.msk.bf16.gmra.mrb[8].mxu0 %vm422_vm2, %v4007_v16 }
 0x10e   : > { %3198 = vmatprep.mubr.msk.bf16.mxu0 %vm422_vm2, %v4030_v49 }
 0x113   : > { %3045 = vmatmul.mubr.msk.bf16.gmra.mrb[28].mxu1 %vm422_vm2, %v4197_v35 }
 0x114   : > { %3066 = vmatprep.mubr.msk.bf16.mxu1 %vm422_vm2, %v4520_v54 }
 0x115   : > { %3199 = vmatmul.mubr.msk.bf16.gmra.mrb[12].mxu0 %vm422_vm2, %v4034_v27 }
 0x116   : > { %3202 = vmatprep.mubr.msk.bf16.mxu0 %vm422_vm2, %v4053_v31  ;;  %v4356_v31 = vld [vmem:[%s4464_s2] ss:$0 sm:$0xff] }
 0x11b   : > { %3067 = vmatmul.mubr.msk.bf16.vlgmr.msra.gmra.mrb[16].mxu1 %vm422_vm2, %v4521_v61 }
 0x11c   : > { %3070 = vmatprep.mubr.msk.bf16.mxu1 %vm422_vm2, %v4523_v28 }
 0x11d   : > { %3203 = vmatmul.mubr.msk.bf16.gmra.mrb[16].mxu0 %vm422_vm2, %v4062_v12 }
 0x11e   : > { %3206 = vmatprep.mubr.msk.bf16.mxu0 %vm422_vm2, %v4082_v42 }
 0x123   : > { %3071 = vmatmul.mubr.msk.bf16.gmra.mrb[20].mxu1 %vm422_vm2, %v4524_v37 }
 0x124   : > { %3074 = vmatprep.mubr.msk.bf16.mxu1 %vm422_vm2, %v3947_v40 }
 0x125   : > { %3207 = vmatmul.mubr.msk.bf16.gmra.mrb[20].mxu0 %vm422_vm2, %v4086_v59 }
 0x126   : > { %3210 = vmatprep.mubr.msk.bf16.mxu0 %vm422_vm2, %v4107_v51 }
 0x12b   : > { %3075 = vmatmul.mubr.msk.bf16.gmra.mrb[24].mxu1 %vm422_vm2, %v3959_v8 }
 0x12c   : > { %3078 = vmatprep.mubr.msk.bf16.mxu1 %vm422_vm2, %v4022_v30 }
 0x12d   : > { %3211 = vmatmul.mubr.msk.bf16.gmra.mrb[24].mxu0 %vm422_vm2, %v4111_v19 }
 0x12e   : > { %3214 = vmatprep.mubr.msk.bf16.mxu0 %vm422_vm2, %v4125_v0 }
 0x133   : > { %3079 = vmatmul.mubr.msk.bf16.gmra.mrb[28].mxu1 %vm422_vm2, %v4123_v39 }
 0x135   : > { %3215 = vmatmul.mubr.msk.bf16.gmra.mrb[28].mxu0 %vm422_vm2, %v2267_v22 }
 0x1ae   : > { %v3018_v43 = vpop.f32.mrb[0].mxu1 }
 0x1af   : > { %v1266_v16 = vpop.f32.mrb[1].mxu1 }
 0x1b0   : > { %v3019_v44 = vpop.f32.mrb[2].mxu1 }
 0x1b1   : > { %v1269_v57 = vpop.f32.mrb[3].mxu1 }
 0x1b6   : > { %v3022_v40 = vpop.f32.mrb[4].mxu1 }
 0x1b7   : > { %v1282_v4 = vpop.f32.mrb[5].mxu1 }
 0x1b8   : > { %v3023_v8 = vpop.f32.mrb[6].mxu1 }
 0x1b9   : > { %v1285_v46 = vpop.f32.mrb[7].mxu1 }
 0x1be   : > { %v3026_v33 = vpop.f32.mrb[8].mxu1 }
 0x1bf   : > { %v1298_v32 = vpop.f32.mrb[9].mxu1 }
 0x1c0   : > { %v3027_v56 = vpop.f32.mrb[10].mxu1 }
 0x1c1   : > { %v1301_v52 = vpop.f32.mrb[11].mxu1 }
 0x1c6   : > { %v3030_v58 = vpop.f32.mrb[12].mxu1 }
 0x1c7   : > { %v1314_v55 = vpop.f32.mrb[13].mxu1 }
 0x1c8   : > { %v3031_v30 = vpop.f32.mrb[14].mxu1 }
 0x1c9   : > { %v1317_v49 = vpop.f32.mrb[15].mxu1 }
 0x1d0   : > { %v3188_v27 = vpop.f32.mrb[0].mxu0 }
 0x1d1   : > { %v3220_v12 = vadd.f32 %v3188_v27, %v3018_v43  ;;  %v2310_v42 = vpop.f32.mrb[1].mxu0 }
 0x1d2   : > { %v3221_v59 = vadd.f32 %v2310_v42, %v1266_v16  ;;  %v3189_v51 = vpop.f32.mrb[2].mxu0 }
 0x1d3   : > { %v2478_v19 = vadd.f32 %v3220_v12, %v4356_v31  ;;  %v3222_v29 = vadd.f32 %v3189_v51, %v3019_v44  ;;  %v2313_v39 = vpop.f32.mrb[3].mxu0 }
 0x1d4   : > { %v2476_v0 = vadd.f32 %v3221_v59, %v4356_v31  ;;  %v3223_v48 = vadd.f32 %v2313_v39, %v1269_v57 }
 0x1d5   : > { %2510 = vst.msk [vmem:[%s4361_s16 + $0x10] sm:$0xff] %vm422_vm2, %v2478_v19  ;;  %v2479_v47 = vadd.f32 %v3222_v29, %v4356_v31 }
 0x1d6   : > { %2508 = vst.msk [vmem:[%s4361_s16] sm:$0xff] %vm422_vm2, %v2476_v0  ;;  %v2477_v21 = vadd.f32 %v3223_v48, %v4356_v31 }
 0x1d7   : > { %2511 = vst.msk [vmem:[%s4361_s16 + $0x18] sm:$0xff] %vm422_vm2, %v2479_v47 }
 0x1d8   : > { %2509 = vst.msk [vmem:[%s4361_s16 + $0x8] sm:$0xff] %vm422_vm2, %v2477_v21  ;;  %v3192_v62 = vpop.f32.mrb[4].mxu0 }
 0x1d9   : > { %v3224_v2 = vadd.f32 %v3192_v62, %v3022_v40  ;;  %v2326_v50 = vpop.f32.mrb[5].mxu0 }
 0x1da   : > { %v3225_v20 = vadd.f32 %v2326_v50, %v1282_v4  ;;  %v3193_v25 = vpop.f32.mrb[6].mxu0 }
 0x1db   : > { %v2482_v35 = vadd.f32 %v3224_v2, %v4356_v31  ;;  %v3226_v23 = vadd.f32 %v3193_v25, %v3023_v8  ;;  %v2329_v10 = vpop.f32.mrb[7].mxu0 }
 0x1dc   : > { %v2480_v36 = vadd.f32 %v3225_v20, %v4356_v31  ;;  %v3227_v9 = vadd.f32 %v2329_v10, %v1285_v46 }
 0x1dd   : > { %2514 = vst.msk [vmem:[%s4361_s16 + $0x30] sm:$0xff] %vm422_vm2, %v2482_v35  ;;  %v2483_v26 = vadd.f32 %v3226_v23, %v4356_v31 }
 0x1de   : > { %2512 = vst.msk [vmem:[%s4361_s16 + $0x20] sm:$0xff] %vm422_vm2, %v2480_v36  ;;  %v2481_v13 = vadd.f32 %v3227_v9, %v4356_v31 }
 0x1df   : > { %2515 = vst.msk [vmem:[%s4361_s16 + $0x38] sm:$0xff] %vm422_vm2, %v2483_v26 }
 0x1e0   : > { %2513 = vst.msk [vmem:[%s4361_s16 + $0x28] sm:$0xff] %vm422_vm2, %v2481_v13  ;;  %v3196_v14 = vpop.f32.mrb[8].mxu0 }
 0x1e1   : > { %v3228_v1 = vadd.f32 %v3196_v14, %v3026_v33  ;;  %v2342_v17 = vpop.f32.mrb[9].mxu0 }
 0x1e2   : > { %v3229_v22 = vadd.f32 %v2342_v17, %v1298_v32  ;;  %v3197_v18 = vpop.f32.mrb[10].mxu0 }
 0x1e3   : > { %v2486_v24 = vadd.f32 %v3228_v1, %v4356_v31  ;;  %v3230_v3 = vadd.f32 %v3197_v18, %v3027_v56  ;;  %v2345_v38 = vpop.f32.mrb[11].mxu0 }
 0x1e4   : > { %v2484_v6 = vadd.f32 %v3229_v22, %v4356_v31  ;;  %v3231_v7 = vadd.f32 %v2345_v38, %v1301_v52 }
 0x1e5   : > { %2518 = vst.msk [vmem:[%s4361_s16 + $0x50] sm:$0xff] %vm422_vm2, %v2486_v24  ;;  %v2487_v5 = vadd.f32 %v3230_v3, %v4356_v31 }
 0x1e6   : > { %2516 = vst.msk [vmem:[%s4361_s16 + $0x40] sm:$0xff] %vm422_vm2, %v2484_v6  ;;  %v2485_v53 = vadd.f32 %v3231_v7, %v4356_v31 }
 0x1e7   : > { %2519 = vst.msk [vmem:[%s4361_s16 + $0x58] sm:$0xff] %vm422_vm2, %v2487_v5 }
 0x1e8   : > { %2517 = vst.msk [vmem:[%s4361_s16 + $0x48] sm:$0xff] %vm422_vm2, %v2485_v53  ;;  %v3200_v54 = vpop.f32.mrb[12].mxu0 }
 0x1e9   : > { %v3232_v61 = vadd.f32 %v3200_v54, %v3030_v58  ;;  %v2358_v11 = vpop.f32.mrb[13].mxu0 }
 0x1ea   : > { %v3233_v28 = vadd.f32 %v2358_v11, %v1314_v55  ;;  %v3201_v37 = vpop.f32.mrb[14].mxu0 }
 0x1eb   : > { %v2490_v15 = vadd.f32 %v3232_v61, %v4356_v31  ;;  %v3234_v60 = vadd.f32 %v3201_v37, %v3031_v30  ;;  %v2361_v45 = vpop.f32.mrb[15].mxu0 }
 0x1ec   : > { %v2488_v41 = vadd.f32 %v3233_v28, %v4356_v31  ;;  %v3235_v34 = vadd.f32 %v2361_v45, %v1317_v49 }
 0x1ed   : > { %2522 = vst.msk [vmem:[%s4361_s16 + $0x70] sm:$0xff] %vm422_vm2, %v2490_v15  ;;  %v2491_v63 = vadd.f32 %v3234_v60, %v4356_v31 }
 0x1ee   : > { %v3068_v43 = vpop.f32.mrb[16].mxu1  ;;  %2520 = vst.msk [vmem:[%s4361_s16 + $0x60] sm:$0xff] %vm422_vm2, %v2488_v41  ;;  %v2489_v16 = vadd.f32 %v3235_v34, %v4356_v31 }
 0x1ef   : > { %v1542_v44 = vpop.f32.mrb[17].mxu1  ;;  %2523 = vst.msk [vmem:[%s4361_s16 + $0x78] sm:$0xff] %vm422_vm2, %v2491_v63 }
 0x1f0   : > { %v3069_v57 = vpop.f32.mrb[18].mxu1  ;;  %2521 = vst.msk [vmem:[%s4361_s16 + $0x68] sm:$0xff] %vm422_vm2, %v2489_v16  ;;  %v3204_v40 = vpop.f32.mrb[16].mxu0 }
 0x1f1   : > { %v1545_v4 = vpop.f32.mrb[19].mxu1  ;;  %v3236_v8 = vadd.f32 %v3204_v40, %v3068_v43  ;;  %v2374_v46 = vpop.f32.mrb[17].mxu0 }
 0x1f2   : > { %v3237_v33 = vadd.f32 %v2374_v46, %v1542_v44  ;;  %v3205_v32 = vpop.f32.mrb[18].mxu0 }
 0x1f3   : > { %v2494_v56 = vadd.f32 %v3236_v8, %v4356_v31  ;;  %v3238_v52 = vadd.f32 %v3205_v32, %v3069_v57  ;;  %v2377_v58 = vpop.f32.mrb[19].mxu0 }
 0x1f4   : > { %v2492_v55 = vadd.f32 %v3237_v33, %v4356_v31  ;;  %v3239_v30 = vadd.f32 %v2377_v58, %v1545_v4 }
 0x1f5   : > { %2526 = vst.msk [vmem:[%s4361_s16 + $0x90] sm:$0xff] %vm422_vm2, %v2494_v56  ;;  %v2495_v49 = vadd.f32 %v3238_v52, %v4356_v31 }
 0x1f6   : > { %v3072_v27 = vpop.f32.mrb[20].mxu1  ;;  %2524 = vst.msk [vmem:[%s4361_s16 + $0x80] sm:$0xff] %vm422_vm2, %v2492_v55  ;;  %v2493_v12 = vadd.f32 %v3239_v30, %v4356_v31 }
 0x1f7   : > { %v1558_v42 = vpop.f32.mrb[21].mxu1  ;;  %2527 = vst.msk [vmem:[%s4361_s16 + $0x98] sm:$0xff] %vm422_vm2, %v2495_v49 }
 0x1f8   : > { %v3073_v59 = vpop.f32.mrb[22].mxu1  ;;  %2525 = vst.msk [vmem:[%s4361_s16 + $0x88] sm:$0xff] %vm422_vm2, %v2493_v12  ;;  %v3208_v51 = vpop.f32.mrb[20].mxu0 }
 0x1f9   : > { %v1561_v19 = vpop.f32.mrb[23].mxu1  ;;  %v3240_v29 = vadd.f32 %v3208_v51, %v3072_v27  ;;  %v2390_v39 = vpop.f32.mrb[21].mxu0 }
 0x1fa   : > { %v3241_v0 = vadd.f32 %v2390_v39, %v1558_v42  ;;  %v3209_v48 = vpop.f32.mrb[22].mxu0 }
 0x1fb   : > { %v2498_v47 = vadd.f32 %v3240_v29, %v4356_v31  ;;  %v3242_v21 = vadd.f32 %v3209_v48, %v3073_v59  ;;  %v2393_v62 = vpop.f32.mrb[23].mxu0 }
 0x1fc   : > { %v2496_v2 = vadd.f32 %v3241_v0, %v4356_v31  ;;  %v3243_v50 = vadd.f32 %v2393_v62, %v1561_v19 }
 0x1fd   : > { %2530 = vst.msk [vmem:[%s4361_s16 + $0xb0] sm:$0xff] %vm422_vm2, %v2498_v47  ;;  %v2499_v20 = vadd.f32 %v3242_v21, %v4356_v31 }
 0x1fe   : > { %v3076_v25 = vpop.f32.mrb[24].mxu1  ;;  %2528 = vst.msk [vmem:[%s4361_s16 + $0xa0] sm:$0xff] %vm422_vm2, %v2496_v2  ;;  %v2497_v35 = vadd.f32 %v3243_v50, %v4356_v31 }
 0x1ff   : > { %v1574_v23 = vpop.f32.mrb[25].mxu1  ;;  %2531 = vst.msk [vmem:[%s4361_s16 + $0xb8] sm:$0xff] %vm422_vm2, %v2499_v20 }
 0x200   : > { %v3077_v10 = vpop.f32.mrb[26].mxu1  ;;  %2529 = vst.msk [vmem:[%s4361_s16 + $0xa8] sm:$0xff] %vm422_vm2, %v2497_v35  ;;  %v3212_v36 = vpop.f32.mrb[24].mxu0 }
 0x201   : > { %v1577_v9 = vpop.f32.mrb[27].mxu1  ;;  %v3244_v26 = vadd.f32 %v3212_v36, %v3076_v25  ;;  %v2406_v13 = vpop.f32.mrb[25].mxu0 }
 0x202   : > { %v3245_v14 = vadd.f32 %v2406_v13, %v1574_v23  ;;  %v3213_v1 = vpop.f32.mrb[26].mxu0 }
 0x203   : > { %v2502_v17 = vadd.f32 %v3244_v26, %v4356_v31  ;;  %v3246_v22 = vadd.f32 %v3213_v1, %v3077_v10  ;;  %v2409_v18 = vpop.f32.mrb[27].mxu0 }
 0x204   : > { %v2500_v24 = vadd.f32 %v3245_v14, %v4356_v31  ;;  %v3247_v3 = vadd.f32 %v2409_v18, %v1577_v9 }
 0x205   : > { %2534 = vst.msk [vmem:[%s4361_s16 + $0xd0] sm:$0xff] %vm422_vm2, %v2502_v17  ;;  %v2503_v38 = vadd.f32 %v3246_v22, %v4356_v31 }
 0x206   : > { %v3080_v6 = vpop.f32.mrb[28].mxu1  ;;  %2532 = vst.msk [vmem:[%s4361_s16 + $0xc0] sm:$0xff] %vm422_vm2, %v2500_v24  ;;  %v2501_v7 = vadd.f32 %v3247_v3, %v4356_v31 }
 0x207   : > { %v1590_v5 = vpop.f32.mrb[29].mxu1  ;;  %2535 = vst.msk [vmem:[%s4361_s16 + $0xd8] sm:$0xff] %vm422_vm2, %v2503_v38 }
 0x208   : > { %v3081_v53 = vpop.f32.mrb[30].mxu1  ;;  %2533 = vst.msk [vmem:[%s4361_s16 + $0xc8] sm:$0xff] %vm422_vm2, %v2501_v7  ;;  %v3216_v54 = vpop.f32.mrb[28].mxu0 }
 0x209   : > { %v1593_v61 = vpop.f32.mrb[31].mxu1  ;;  %v3248_v11 = vadd.f32 %v3216_v54, %v3080_v6  ;;  %v2422_v28 = vpop.f32.mrb[29].mxu0 }
 0x20a   : > { %v3249_v37 = vadd.f32 %v2422_v28, %v1590_v5  ;;  %v3217_v15 = vpop.f32.mrb[30].mxu0 }
 0x20b   : > { %v2506_v60 = vadd.f32 %v3248_v11, %v4356_v31  ;;  %v3250_v45 = vadd.f32 %v3217_v15, %v3081_v53  ;;  %v2425_v41 = vpop.f32.mrb[31].mxu0 }
 0x20c   : > { %v2504_v34 = vadd.f32 %v3249_v37, %v4356_v31  ;;  %v3251_v63 = vadd.f32 %v2425_v41, %v1593_v61 }
 0x20d   : > { %2538 = vst.msk [vmem:[%s4361_s16 + $0xf0] sm:$0xff] %vm422_vm2, %v2506_v60  ;;  %v2507_v43 = vadd.f32 %v3250_v45, %v4356_v31 }
 0x20e   : > { %2536 = vst.msk [vmem:[%s4361_s16 + $0xe0] sm:$0xff] %vm422_vm2, %v2504_v34  ;;  %v2505_v16 = vadd.f32 %v3251_v63, %v4356_v31 }
 0x20f   : > { %2539 = vst.msk [vmem:[%s4361_s16 + $0xf8] sm:$0xff] %vm422_vm2, %v2507_v43 }
 0x210   : > { %2537 = vst.msk [vmem:[%s4361_s16 + $0xe8] sm:$0xff] %vm422_vm2, %v2505_v16 }
 0x211 PF: > { %s13_s12 = sadd.s32 1, %s3501_s12  }
 0x212   : > { %p10_p4 = scmp.ge.s32.totalorder %s13_s12, 4  }
 0x214   :  { %12 = sbr.rel (!%p10_p4) target bundleno = 1 (0x1), region = 70 }

// kernel: pab_forward.2
= control target key start
LH: loop header
LB: loop body
LE: loop exit
PB: predicated region body
PF: predicated region fallthrough
CT: control target
= control target key end

     0   :  { %s6071_s18 = smov 0   ;;  %s8121_s0 = inlined_call_operand.vmem [shape: f32[2,18,18,4], index: 0, kind: input, shape index: {}]   ;;  %s8122_s1 = inlined_call_operand.vmem [shape: f32[4,16], index: 1, kind: input, shape index: {}]   ;;  %s8123_s2 = inlined_call_operand.vmem [shape: f32[1,16], index: 2, kind: input, shape index: {}]   ;;  %s8124_s3 = inlined_call_operand.vmem [shape: bf16[9,4,4], index: 3, kind: input, shape index: {}]   ;;  %s8125_s4 = inlined_call_operand.vmem [shape: f32[1,4], index: 4, kind: input, shape index: {}]   ;;  %s8126_s5 = inlined_call_operand.vmem [shape: f32[2,256,4], index: 5, kind: output, shape index: {}]  }
   0x1 LB: > { %s4087_s19 = sadd.s32 4294967295, %s5898_s18   ;;  %p4091_p0 = scmp.ge.s32.totalorder %s5898_s18, 1  ;;  %s5898_s18 = sphi %s6071_s18, %s15_s18  }
   0x2   : > { %p187_p1 = scmp.lt.s32.totalorder %s5898_s18, 3 }
   0x4   : > { %p188_p2 = pnand %p4091_p0, %p187_p1 }
   0x6   : > { %191 = sbr.rel (%p188_p2) target bundleno = 1485 (0x5cd), region = 40 }
   0xd   : > { %vm869_vm0 = vcmask 1041408   ;;  %v4196_v0 = vld [vmem:[%s8124_s3 + $0x8] sm:$0x3]  ;;  %v441_v1 = vld [vmem:[%s8122_s1] sm:$0xf]  ;;  %vm514_vm1 = vcmask 1043456  }
   0xe   : > { %5385 = vmatprep.subr.msk.bf16.mxu1 %vm869_vm0, %v4196_v0  ;;  %4593 = vmatprep.subr.msk.mxu0 %vm514_vm1, %v441_v1  ;;  %v1830_v2 = vsel %vm869_vm0, %v4196_v0, 0  ;;  %p215_p3 = scmp.lt.s32.totalorder %s4087_s19, 1  ;;  %v4129_v3 = vld [vmem:[%s8124_s3 + $0x2] sm:$0x3]  ;;  %v4213_v4 = vld [vmem:[%s8124_s3 + $0xa] sm:$0x3] }
   0xf   : > { %4780 = vmatpush3.bf16.msra.mxu1 %v1830_v2  ;;  %4594 = vmatpush3.msk.msra.mxu0 %vm514_vm1, %v441_v1  ;;  %vm328_vm2 = vcmask 1046528   ;;  %vm449_vm3 = vcmask 31744   ;;  %v871_v18 = vsel %vm869_vm0, %v4129_v3, 0  ;;  %v6144_v22 = vld [vmem:[%s8124_s3] sm:$0x3]  ;;  %v2039_v36 = vsel %vm869_vm0, %v4213_v4, 0 }
  0x10   : > { %s8476_s19 = smov (!%p215_p3, %s4087_s19), 1  ;;  %5381 = vmatprep.subr.msk.bf16.mxu0 %vm869_vm0, %v4129_v3  ;;  %5386 = vmatprep.subr.msk.bf16.mxu1 %vm869_vm0, %v4213_v4  ;;  %8211 = vst [vmem:[#allocation10_spill] sm:$0xff] %v6144_v22  ;;  %v6200_v46 = vld [vmem:[%s8124_s3 + $0xc] sm:$0x3]  ;;  %vm1246_vm4 = vcmask 1045504   ;;  %vm743_vm5 = vcmask 64512  }
  0x11   : > { %s5390_s28 = smul.u32 432, %s8476_s19  ;;  %s4334_s29 = sshll.u32 %s8476_s19, 8  ;;  %8216 = vst [vmem:[#allocation15_spill] sm:$0xff] %v6200_v46 }
  0x12   : > { %s6098_s7 = scalar_lea.vmem %s8126_s5, %s4334_s29 }
  0x13   : > { %s6103_s10 = scalar_lea.vmem %s8121_s0, %s5390_s28  ;;  %s7344_s28 = smov 0  }
  0x14   : > { %v6106_v5 = vld [vmem:[%s6103_s10 + $0x18] sm:$0xff]  ;;  %v6109_v6 = vld [vmem:[%s6103_s10 + $0x20] sm:$0xff]  ;;  %v6112_v7 = vld [vmem:[%s6103_s10 + $0x28] sm:$0x3] }
  0x15   : > { %8205 = vst [vmem:[#allocation4_spill] sm:$0xff] %v6106_v5  ;;  %8206 = vst [vmem:[#allocation5_spill] sm:$0xff] %v6109_v6  ;;  %v329_v8 = vrot.slane %v6106_v5, 1  ;;  %v330_v9 = vrot.slane %v6109_v6, 1  ;;  %v6118_v10 = vpack.c.bf16 %v6109_v6, %v6106_v5  ;;  %v6121_v11 = vld [vmem:[%s6103_s10 + $0x30] sm:$0xff]  ;;  %v6124_v12 = vld [vmem:[%s6103_s10 + $0x38] sm:$0xff] }
  0x16   : > { %8207 = vst [vmem:[#allocation6_spill] sm:$0xff] %v6112_v7  ;;  %v6127_v13 = vld [vmem:[%s6103_s10 + $0x48] sm:$0xff]  ;;  %v332_v14 = vrot.slane %v6112_v7, 1  ;;  %v6131_v15 = vld [vmem:[%s6103_s10 + $0x40] sm:$0x3]  ;;  %v334_v16 = vrot.slane %v6121_v11, 1 }
  0x17   : > { %8208 = vst [vmem:[#allocation7_spill] sm:$0xff] %v6118_v10  ;;  %8209 = vst [vmem:[#allocation8_spill] sm:$0xff] %v6127_v13  ;;  %v331_v17 = vsel %vm328_vm2, %v329_v8, %v330_v9  ;;  %v335_v19 = vrot.slane %v6124_v12, 1  ;;  %v337_v20 = vrot.slane %v6131_v15, 1  ;;  %v6139_v21 = vld [vmem:[%s6103_s10 + $0x50] sm:$0xff]  ;;  %v339_v24 = vrot.slane %v6127_v13, 1 }
  0x18   : > { %8210 = vst [vmem:[#allocation9_spill] sm:$0xff] %v6139_v21  ;;  %4595 = vmatprep.mubr.msk.f32.mxu0 %vm449_vm3, %v331_v17  ;;  %v333_v23 = vsel %vm328_vm2, %v330_v9, %v332_v14  ;;  %v6150_v25 = vld [vmem:[%s6103_s10 + $0x58] sm:$0x3]  ;;  %v6153_v26 = vld [vmem:[%s6103_s10 + $0x60] sm:$0xff]  ;;  %v6156_v27 = vld [vmem:[%s6103_s10 + $0x68] sm:$0xff]  ;;  %v340_v31 = vrot.slane %v6139_v21, 1  ;;  %v6179_v37 = vpack.c.bf16 %v6139_v21, %v6127_v13 }
  0x19   : > { %8212 = vst [vmem:[#allocation11_spill] sm:$0xff] %v6150_v25  ;;  %4596 = vmatmul.mubr.msk.f32.vlgmr.msra.gmra.mrb[0].mxu0 %vm449_vm3, %v333_v23  ;;  %v6159_v28 = vpack.c.bf16 %v333_v23, %v331_v17  ;;  %v336_v29 = vsel %vm328_vm2, %v334_v16, %v335_v19  ;;  %v338_v30 = vsel %vm328_vm2, %v335_v19, %v337_v20  ;;  %v6165_v32 = vld [vmem:[%s6103_s10 + $0x70] sm:$0x3]  ;;  %v6168_v33 = vld [vmem:[%s6103_s10 + $0x78] sm:$0xff]  ;;  %v6171_v34 = vld [vmem:[%s6103_s10 + $0x80] sm:$0xff]  ;;  %v342_v40 = vrot.slane %v6150_v25, 1 }
  0x1a   : > { %4644 = vmatpush3.bf16.msra.mxu0 %v871_v18  ;;  %v6173_v35 = vpack.c.bf16 %v338_v30, %v336_v29  ;;  %4598 = vmatprep.mubr.msk.f32.mxu0 %vm449_vm3, %v336_v29  ;;  %8215 = vst [vmem:[#allocation14_spill] sm:$0xff] %v6179_v37  ;;  %v6182_v38 = vld [vmem:[%s6103_s10 + $0x88] sm:$0x3]  ;;  %v341_v39 = vsel %vm328_vm2, %v339_v24, %v340_v31  ;;  %v344_v41 = vrot.slane %v6153_v26, 1  ;;  %v345_v42 = vrot.slane %v6156_v27, 1  ;;  %v6212_v53 = vld [vmem:[%s6103_s10 + $0x90] sm:$0xff] }
  0x1b   : > { %8213 = vst [vmem:[#allocation12_spill] sm:$0xff] %v6159_v28  ;;  %4781 = vmatprep.mubr.msk.bf16.mxu1 %vm449_vm3, %v6159_v28  ;;  %5382 = vmatprep.subr.msk.bf16.mxu0 %vm869_vm0, %v6144_v22  ;;  %v347_v43 = vrot.slane %v6165_v32, 1  ;;  %v349_v44 = vrot.slane %v6168_v33, 1  ;;  %v350_v45 = vrot.slane %v6171_v34, 1  ;;  %v343_v47 = vsel %vm328_vm2, %v340_v31, %v342_v40  ;;  %v6215_v54 = vld [vmem:[%s6103_s10 + $0x98] sm:$0xff]  ;;  %v6222_v57 = vld [vmem:[%s6103_s10 + $0xa8] sm:$0xff] }
  0x1c   : > { %8214 = vst [vmem:[#allocation13_spill] sm:$0xff] %v6173_v35  ;;  %4782 = vmatmul.mubr.msk.bf16.vlgmr.msra.gmra.mrb[0].mxu1 %vm449_vm3, %v6173_v35  ;;  %v352_v48 = vrot.slane %v6182_v38, 1  ;;  %v6206_v49 = vpack.c.bf16 %v343_v47, %v341_v39  ;;  %v346_v50 = vsel %vm328_vm2, %v344_v41, %v345_v42  ;;  %v6218_v55 = vld [vmem:[%s6103_s10 + $0xa0] sm:$0x3]  ;;  %v6225_v58 = vld [vmem:[%s6103_s10 + $0xb0] sm:$0xff]  ;;  %v354_v62 = vrot.slane %v6212_v53, 1 }
  0x1d   : > { %4814 = vmatpush3.bf16.msra.mxu1 %v2039_v36  ;;  %4599 = vmatmul.mubr.msk.f32.gmra.mrb[2].mxu0 %vm449_vm3, %v338_v30  ;;  %v348_v51 = vsel %vm328_vm2, %v345_v42, %v347_v43  ;;  %v351_v52 = vsel %vm328_vm2, %v349_v44, %v350_v45  ;;  %v6228_v59 = vld [vmem:[%s6103_s10 + $0xb8] sm:$0x3]  ;;  %v355_v63 = vrot.slane %v6215_v54, 1  ;;  %v357_v0 = vrot.slane %v6218_v55, 1  ;;  %v6249_v9 = vld [vmem:[%s6103_s10 + $0xc0] sm:$0xff]  ;;  %v6252_v14 = vld [vmem:[%s6103_s10 + $0xc8] sm:$0xff] }
  0x1e   : > { %4601 = vmatprep.mubr.msk.f32.mxu0 %vm449_vm3, %v341_v39  ;;  %8217 = vst [vmem:[#allocation16_spill] sm:$0xff] %v6206_v49  ;;  %v353_v56 = vsel %vm328_vm2, %v350_v45, %v352_v48  ;;  %5387 = vmatprep.subr.msk.bf16.mxu1 %vm869_vm0, %v6200_v46  ;;  %v6234_v60 = vpack.c.bf16 %v348_v51, %v346_v50  ;;  %v359_v1 = vrot.slane %v6222_v57, 1  ;;  %v360_v2 = vrot.slane %v6225_v58, 1  ;;  %v6261_v20 = vld [vmem:[%s6103_s10 + $0xd0] sm:$0x3]  ;;  %v6271_v31 = vld [vmem:[%s6103_s10 + $0xd8] sm:$0xff] }
  0x1f   : > { %4785 = vmatprep.mubr.msk.bf16.mxu1 %vm449_vm3, %v6206_v49  ;;  %v6237_v61 = vpack.c.bf16 %v353_v56, %v351_v52  ;;  %v362_v3 = vrot.slane %v6228_v59, 1  ;;  %v356_v29 = vsel %vm328_vm2, %v354_v62, %v355_v63  ;;  %v358_v30 = vsel %vm328_vm2, %v355_v63, %v357_v0  ;;  %v6274_v36 = vld [vmem:[%s6103_s10 + $0xe0] sm:$0xff]  ;;  %v6277_v39 = vld [vmem:[%s6103_s10 + $0xe8] sm:$0x3]  ;;  %v6287_v44 = vld [vmem:[%s6103_s10 + $0xf0] sm:$0xff] }
  0x20   : > { %8218 = vst [vmem:[#allocation17_spill] sm:$0xff] %v6234_v60  ;;  %v361_v40 = vsel %vm328_vm2, %v359_v1, %v360_v2  ;;  %v364_v42 = vrot.slane %v6249_v9, 1  ;;  %v365_v43 = vrot.slane %v6252_v14, 1  ;;  %v6290_v45 = vld [vmem:[%s6103_s10 + $0xf8] sm:$0xff]  ;;  %v6299_v62 = vpack.c.bf16 %v358_v30, %v356_v29  ;;  %v6328_v4 = vld [vmem:[%s6103_s10 + $0x128] sm:$0xff] }
  0x21   : > { %4602 = vmatmul.mubr.msk.f32.gmra.mrb[4].mxu0 %vm449_vm3, %v343_v47  ;;  %8219 = vst [vmem:[#allocation18_spill] sm:$0xff] %v6237_v61  ;;  %v6282_v41 = vsel %vm328_vm2, %v360_v2, %v362_v3  ;;  %v369_v63 = vrot.slane %v6271_v31, 1  ;;  %v370_v0 = vrot.slane %v6274_v36, 1  ;;  %v372_v1 = vrot.slane %v6277_v39, 1  ;;  %v6305_v2 = vld [vmem:[%s6103_s10 + $0x108] sm:$0xff]  ;;  %v6308_v3 = vld [vmem:[%s6103_s10 + $0x110] sm:$0xff] }
  0x22   : > { %4604 = vmatprep.mubr.msk.f32.mxu0 %vm449_vm3, %v346_v50  ;;  %8220 = vst [vmem:[#allocation19_spill] sm:$0xff] %v6299_v62  ;;  %v6312_v16 = vpack.c.bf16 %v6282_v41, %v361_v40  ;;  %v374_v8 = vrot.slane %v6287_v44, 1  ;;  %v375_v48 = vrot.slane %v6290_v45, 1  ;;  %v6318_v50 = vld [vmem:[%s6103_s10 + $0x118] sm:$0x3]  ;;  %v6321_v47 = vld [vmem:[%s6103_s10 + $0x120] sm:$0xff]  ;;  %v366_v23 = vsel %vm328_vm2, %v364_v42, %v365_v43 }
  0x23   : > { %v6331_v19 = vld [vmem:[%s6103_s10 + $0x130] sm:$0x3]  ;;  %v6334_v17 = vld [vmem:[%s6103_s10 + $0x138] sm:$0xff]  ;;  %v379_v10 = vrot.slane %v6305_v2, 1  ;;  %v6341_v42 = vld [vmem:[%s6103_s10 + $0x140] sm:$0xff]  ;;  %v382_v37 = vrot.slane %v6318_v50, 1 }
  0x24   : > { %4786 = vmatmul.mubr.msk.bf16.gmra.mrb[4].mxu1 %vm449_vm3, %v6234_v60  ;;  %8221 = vst [vmem:[#allocation20_spill] sm:$0xff] %v6312_v16  ;;  %v6355_v60 = vld [vmem:[%s6103_s10 + $0x150] sm:$0xff]  ;;  %v6361_v49 = vsel %vm328_vm2, %v374_v8, %v375_v48  ;;  %v390_v8 = vrot.slane %v6341_v42, 1  ;;  %v6389_v25 = vld [vmem:[%s6103_s10 + $0x168] sm:$0xff] }
  0x25   : > { %4605 = vmatmul.mubr.msk.f32.gmra.mrb[6].mxu0 %vm449_vm3, %v348_v51  ;;  %4789 = vmatprep.mubr.msk.bf16.mxu1 %vm449_vm3, %v6237_v61  ;;  %v367_v51 = vrot.slane %v6261_v20, 1  ;;  %v371_v61 = vsel %vm328_vm2, %v369_v63, %v370_v0  ;;  %8222 = vst [vmem:[#allocation21_spill] sm:$0xff] %v6355_v60  ;;  %v384_v63 = vrot.slane %v6321_v47, 1  ;;  %v394_v21 = vrot.slane %v6355_v60, 1  ;;  %v6443_v60 = vld [vmem:[%s6103_s10 + $0x180] sm:$0xff] }
  0x26   : > { %4607 = vmatprep.mubr.msk.f32.mxu0 %vm449_vm3, %v351_v52  ;;  %v6297_v52 = vld [vmem:[%s6103_s10 + $0x100] sm:$0x3] }
  0x27   : > { %v377_v24 = vrot.slane %v6297_v52, 1  ;;  %v368_v18 = vsel %vm328_vm2, %v365_v43, %v367_v51  ;;  %v6350_v43 = vsel %vm328_vm2, %v370_v0, %v372_v1  ;;  %v385_v0 = vrot.slane %v6328_v4, 1  ;;  %v6367_v51 = vld [vmem:[%s6103_s10 + $0x158] sm:$0xff] }
  0x28   : > { %v387_v1 = vrot.slane %v6331_v19, 1  ;;  %8223 = vst [vmem:[#allocation22_spill] sm:$0xff] %v6367_v51  ;;  %v6379_v46 = vpack.c.bf16 %v368_v18, %v366_v23  ;;  %v6382_v28 = vpack.c.bf16 %v6350_v43, %v371_v61  ;;  %v395_v13 = vrot.slane %v6367_v51, 1 }
  0x29   : > { %4608 = vmatmul.mubr.msk.f32.gmra.mrb[8].mxu0 %vm449_vm3, %v353_v56  ;;  %v6344_v56 = vld [vmem:[%s6103_s10 + $0x148] sm:$0x3]  ;;  %v6408_v5 = vsel %vm328_vm2, %v384_v63, %v385_v0 }
  0x2a   : > { %4610 = vmatprep.mubr.msk.f32.mxu0 %vm449_vm3, %v356_v29  ;;  %v380_v29 = vrot.slane %v6308_v3, 1  ;;  %v392_v35 = vrot.slane %v6344_v56, 1  ;;  %8225 = vst [vmem:[#allocation24_spill] sm:$0xff] %v6379_v46  ;;  %8226 = vst [vmem:[#allocation25_spill] sm:$0xff] %v6382_v28 }
  0x2c   : > { %4790 = vmatmul.mubr.msk.bf16.gmra.mrb[8].mxu1 %vm449_vm3, %v6299_v62  ;;  %v6370_v62 = vld [vmem:[%s6103_s10 + $0x160] sm:$0x3]  ;;  %v6385_v22 = vsel %vm328_vm2, %v379_v10, %v380_v29 }
  0x2d   : > { %4611 = vmatmul.mubr.msk.f32.gmra.mrb[10].mxu0 %vm449_vm3, %v358_v30  ;;  %4793 = vmatprep.mubr.msk.bf16.mxu1 %vm449_vm3, %v6312_v16  ;;  %8224 = vst [vmem:[#allocation23_spill] sm:$0xff] %v6370_v62  ;;  %v6374_v30 = vsel %vm328_vm2, %v375_v48, %v377_v24  ;;  %v389_v16 = vrot.slane %v6334_v17, 1  ;;  %v6392_v24 = vld [vmem:[%s6103_s10 + $0x170] sm:$0xff]  ;;  %v6395_v48 = vsel %vm328_vm2, %v380_v29, %v382_v37  ;;  %v397_v7 = vrot.slane %v6370_v62, 1  ;;  %v6414_v29 = vld [vmem:[%s6103_s10 + $0x178] sm:$0x3] }
  0x2e   : > { %4613 = vmatprep.mubr.msk.f32.mxu0 %vm449_vm3, %v361_v40  ;;  %v6404_v10 = vpack.c.bf16 %v6374_v30, %v6361_v49  ;;  %v6411_v37 = vsel %vm328_vm2, %v385_v0, %v387_v1  ;;  %v399_v62 = vrot.slane %v6389_v25, 1  ;;  %v400_v40 = vrot.slane %v6392_v24, 1 }
  0x2f   : > { %v6418_v6 = vsel %vm328_vm2, %v389_v16, %v390_v8  ;;  %v6427_v63 = vpack.c.bf16 %v6395_v48, %v6385_v22  ;;  %v1305_v0 = vrot.slane %v6318_v50, 2  ;;  %v6436_v16 = vsel %vm328_vm2, %v394_v21, %v395_v13 }
  0x30   : > { %v402_v51 = vrot.slane %v6414_v29, 1  ;;  %v6450_v50 = vpack.c.bf16 %v6411_v37, %v6408_v5  ;;  %v8231_v1 = vrot.slane %v6121_v11, 2 }
  0x31   : > { %4614 = vmatmul.mubr.msk.f32.gmra.mrb[12].mxu0 %vm449_vm3, %v6282_v41  ;;  %v6421_v41 = vsel %vm328_vm2, %v390_v8, %v392_v35  ;;  %v6439_v8 = vsel %vm328_vm2, %v395_v13, %v397_v7  ;;  %v6460_v35 = vsel %vm328_vm2, %v399_v62, %v400_v40  ;;  %v1267_v7 = vrot.slane %v6153_v26, 2 }
  0x32   : > { %4616 = vmatprep.mubr.msk.f32.mxu0 %vm449_vm3, %v366_v23  ;;  %8227 = vst [vmem:[#allocation26_spill] sm:$0xff] %v6421_v41  ;;  %8228 = vst [vmem:[#allocation27_spill] sm:$0xff] %v6439_v8  ;;  %v6454_v21 = vpack.c.bf16 %v6421_v41, %v6418_v6  ;;  %v8237_v13 = vrot.slane %v6182_v38, 2  ;;  %v8239_v38 = vrot.slane %v6225_v58, 2  ;;  %v8240_v62 = vrot.slane %v6222_v57, 2 }
  0x33   : > { %8229 = vst [vmem:[#allocation28_spill] sm:$0xff] %v6460_v35 }
  0x34   : > { %4794 = vmatmul.mubr.msk.bf16.gmra.mrb[12].mxu1 %vm449_vm3, %v6379_v46 }
  0x35   : > { %4617 = vmatmul.mubr.msk.f32.gmra.mrb[14].mxu0 %vm449_vm3, %v368_v18  ;;  %4797 = vmatprep.mubr.msk.bf16.mxu1 %vm449_vm3, %v6382_v28  ;;  %v8230_v18 = vrot.slane %v6124_v12, 2  ;;  %v8232_v28 = vrot.slane %v6131_v15, 2  ;;  %v1268_v15 = vrot.slane %v6156_v27, 2 }
  0x36   : > { %4619 = vmatprep.mubr.msk.f32.mxu0 %vm449_vm3, %v371_v61  ;;  %v6475_v61 = vpack.c.bf16 %v6439_v8, %v6436_v16 }
  0x37   : > { %v1259_v23 = vsel %vm1246_vm4, %v8231_v1, %v8230_v18  ;;  %v8233_v46 = vmov %v8230_v18  ;;  %v6482_v1 = vsel %vm328_vm2, %v400_v40, %v402_v51  ;;  %v1270_v18 = vrot.slane %v6165_v32, 2 }
  0x38   : > { %v1261_v41 = vsel %vm1246_vm4, %v8233_v46, %v8232_v28  ;;  %v8235_v28 = vrot.slane %v6171_v34, 2  ;;  %v8236_v46 = vrot.slane %v6168_v33, 2  ;;  %v1277_v40 = vrot.slane %v6212_v53, 2 }
  0x39   : > { %v6479_v35 = vpack.c.bf16 %v1261_v41, %v1259_v23  ;;  %4620 = vmatmul.mubr.msk.f32.gmra.mrb[16].mxu0 %vm449_vm3, %v6350_v43  ;;  %v1278_v23 = vrot.slane %v6215_v54, 2  ;;  %v1280_v32 = vrot.slane %v6218_v55, 2 }
  0x3a   : > { %v1274_v8 = vsel %vm1246_vm4, %v8236_v46, %v8235_v28  ;;  %v8238_v41 = vmov %v8235_v28  ;;  %4622 = vmatprep.mubr.msk.f32.mxu0 %vm449_vm3, %v6361_v49  ;;  %v1269_v28 = vsel %vm1246_vm4, %v1267_v7, %v1268_v15  ;;  %v1271_v46 = vsel %vm1246_vm4, %v1268_v15, %v1270_v18 }
  0x3b   : > { %8234 = vst [vmem:[#allocation29_spill] sm:$0xff] %v6479_v35  ;;  %v1276_v51 = vsel %vm1246_vm4, %v8238_v41, %v8237_v13  ;;  %v1284_v13 = vsel %vm1246_vm4, %v8240_v62, %v8239_v38  ;;  %v6512_v41 = vpack.c.bf16 %v1271_v46, %v1269_v28  ;;  %v1279_v35 = vsel %vm1246_vm4, %v1277_v40, %v1278_v23 }
  0x3c   : > { %v6505_v43 = vpack.c.bf16 %v1276_v51, %v1274_v8  ;;  %v1281_v55 = vsel %vm1246_vm4, %v1278_v23, %v1280_v32  ;;  %v8241_v49 = vrot.slane %v6228_v59, 2  ;;  %v8242_v7 = vmov %v8239_v38  ;;  %4798 = vmatmul.mubr.msk.bf16.gmra.mrb[16].mxu1 %vm449_vm3, %v6404_v10 }
  0x3d   : > { %v6523_v8 = vpack.c.bf16 %v1281_v55, %v1279_v35  ;;  %v1287_v62 = vrot.slane %v6249_v9, 2  ;;  %v1288_v51 = vrot.slane %v6252_v14, 2  ;;  %4623 = vmatmul.mubr.msk.f32.gmra.mrb[18].mxu0 %vm449_vm3, %v6374_v30  ;;  %4801 = vmatprep.mubr.msk.bf16.mxu1 %vm449_vm3, %v6427_v63  ;;  %v1290_v59 = vrot.slane %v6261_v20, 2 }
  0x3e   : > { %v1286_v15 = vsel %vm1246_vm4, %v8242_v7, %v8241_v49  ;;  %v8243_v40 = vrot.slane %v6274_v36, 2  ;;  %v8244_v23 = vrot.slane %v6271_v31, 2  ;;  %v8245_v32 = vrot.slane %v6277_v39, 2  ;;  %4625 = vmatprep.mubr.msk.f32.mxu0 %vm449_vm3, %v6385_v22 }
  0x3f   : > { %v6525_v18 = vpack.c.bf16 %v1286_v15, %v1284_v13  ;;  %v1297_v38 = vrot.slane %v6287_v44, 2  ;;  %v1289_v30 = vsel %vm1246_vm4, %v1287_v62, %v1288_v51  ;;  %v1298_v13 = vrot.slane %v6290_v45, 2 }
  0x40   : > { %v1294_v35 = vsel %vm1246_vm4, %v8244_v23, %v8243_v40  ;;  %v8246_v28 = vmov %v8243_v40  ;;  %v1300_v55 = vrot.slane %v6297_v52, 2  ;;  %v1291_v49 = vsel %vm1246_vm4, %v1288_v51, %v1290_v59 }
  0x41   : > { %v1296_v46 = vsel %vm1246_vm4, %v8246_v28, %v8245_v32  ;;  %v8247_v39 = vrot.slane %v6308_v3, 2  ;;  %v8248_v7 = vrot.slane %v6305_v2, 2  ;;  %v1307_v62 = vrot.slane %v6321_v47, 2  ;;  %4626 = vmatmul.mubr.msk.f32.gmra.mrb[20].mxu0 %vm449_vm3, %v6395_v48 }
  0x42   : > { %v6548_v20 = vpack.c.bf16 %v1296_v46, %v1294_v35  ;;  %v6562_v23 = vpack.c.bf16 %v1291_v49, %v1289_v30  ;;  %v1299_v52 = vsel %vm1246_vm4, %v1297_v38, %v1298_v13  ;;  %v1301_v51 = vsel %vm1246_vm4, %v1298_v13, %v1300_v55  ;;  %4628 = vmatprep.mubr.msk.f32.mxu0 %vm449_vm3, %v6408_v5  ;;  %v8254_v55 = vld [vmem:[#allocation21_spill] sm:$0xff] }
  0x43   : > { %v1304_v15 = vsel %vm1246_vm4, %v8248_v7, %v8247_v39  ;;  %v8249_v40 = vmov %v8247_v39  ;;  %v6570_v35 = vpack.c.bf16 %v1301_v51, %v1299_v52  ;;  %v1308_v32 = vrot.slane %v6328_v4, 2  ;;  %v8255_v39 = vld [vmem:[#allocation22_spill] sm:$0xff] }
  0x44   : > { %v1306_v22 = vsel %vm1246_vm4, %v8249_v40, %v1305_v0  ;;  %v1310_v0 = vrot.slane %v6331_v19, 2  ;;  %v8250_v28 = vrot.slane %v6341_v42, 2  ;;  %v8251_v46 = vrot.slane %v6334_v17, 2  ;;  %v8256_v19 = vld [vmem:[#allocation23_spill] sm:$0xff]  ;;  %v275_v40 = vld [vmem:[%s6103_s10 + $0x188] sm:$0xff]  ;;  %4802 = vmatmul.mubr.msk.bf16.gmra.mrb[20].mxu1 %vm449_vm3, %v6450_v50 }
  0x45   : > { %v6566_v59 = vpack.c.bf16 %v1306_v22, %v1304_v15  ;;  %v8252_v38 = vrot.slane %v6344_v56, 2  ;;  %v1317_v49 = vrot.slane %v8254_v55, 2  ;;  %v1318_v7 = vrot.slane %v8255_v39, 2  ;;  %v276_v22 = vld [vmem:[%s6103_s10 + $0x190] sm:$0x3]  ;;  %4629 = vmatmul.mubr.msk.f32.gmra.mrb[22].mxu0 %vm449_vm3, %v6411_v37  ;;  %4805 = vmatprep.mubr.msk.bf16.mxu1 %vm449_vm3, %v6454_v21 }
  0x46   : > { %v1314_v30 = vsel %vm1246_vm4, %v8251_v46, %v8250_v28  ;;  %v8253_v13 = vmov %v8250_v28  ;;  %v1320_v15 = vrot.slane %v8256_v19, 2  ;;  %v1309_v52 = vsel %vm1246_vm4, %v1307_v62, %v1308_v32  ;;  %4631 = vmatprep.mubr.msk.f32.mxu0 %vm449_vm3, %v6418_v6 }
  0x47   : > { %v1316_v48 = vsel %vm1246_vm4, %v8253_v13, %v8252_v38  ;;  %v1311_v51 = vsel %vm1246_vm4, %v1308_v32, %v1310_v0  ;;  %v8257_v5 = vrot.slane %v6392_v24, 2  ;;  %v8258_v56 = vrot.slane %v6389_v25, 2 }
  0x48   : > { %v6593_v28 = vpack.c.bf16 %v1316_v48, %v1314_v30  ;;  %v6602_v38 = vpack.c.bf16 %v1311_v51, %v1309_v52  ;;  %v1319_v13 = vsel %vm1246_vm4, %v1317_v49, %v1318_v7  ;;  %v1321_v19 = vsel %vm1246_vm4, %v1318_v7, %v1320_v15  ;;  %v8261_v51 = vld [vmem:[#allocation28_spill] sm:$0xff] }
  0x49   : > { %v1324_v46 = vsel %vm1246_vm4, %v8258_v56, %v8257_v5  ;;  %v8259_v62 = vrot.slane %v6414_v29, 2  ;;  %v8260_v32 = vmov %v8257_v5  ;;  %v6615_v30 = vpack.c.bf16 %v1321_v19, %v1319_v13  ;;  %v6640_v13 = vld [vmem:[%s6103_s10] sm:$0xff] }
  0x4a   : > { %v2025_v49 = vrot.slane %v6443_v60, 2  ;;  %v2026_v29 = vrot.slane %v275_v40, 2  ;;  %v405_v7 = vrot.slane %v275_v40, 1  ;;  %v407_v15 = vrot.slane %v276_v22, 1 }
  0x4b   : > { %v1326_v0 = vsel %vm1246_vm4, %v8260_v32, %v8259_v62  ;;  %v2028_v52 = vrot.slane %v276_v22, 2  ;;  %v6624_v37 = vpack.c.bf16 %v6124_v12, %v6121_v11  ;;  %v6628_v5 = vpack.c.bf16 %v6482_v1, %v8261_v51  ;;  %v6643_v22 = vld [vmem:[%s6103_s10 + $0x8] sm:$0xff]  ;;  %v228_v11 = vld [vmem:[%s6103_s10 + $0x10] sm:$0x3] }
  0x4c   : > { %v6617_v48 = vpack.c.bf16 %v1326_v0, %v1324_v46  ;;  %v2027_v56 = vsel %vm1246_vm4, %v2025_v49, %v2026_v29  ;;  %v6633_v46 = vpack.c.bf16 %v6156_v27, %v6153_v26  ;;  %v6637_v6 = vpack.c.bf16 %v6171_v34, %v6168_v33  ;;  %v8262_v27 = vld [vmem:[#allocation26_spill] sm:$0xff]  ;;  %4806 = vmatmul.mubr.msk.bf16.gmra.mrb[24].mxu1 %vm449_vm3, %v6475_v61 }
  0x4d   : > { %v2029_v12 = vsel %vm1246_vm4, %v2026_v29, %v2028_v52  ;;  %v6649_v19 = vpack.c.bf16 %v6215_v54, %v6212_v53  ;;  %v6653_v62 = vpack.c.bf16 %v6225_v58, %v6222_v57  ;;  %v6657_v26 = vpack.c.bf16 %v6252_v14, %v6249_v9  ;;  %4632 = vmatmul.mubr.msk.f32.gmra.mrb[24].mxu0 %vm449_vm3, %v8262_v27  ;;  %v8272_v52 = vld [vmem:[#allocation8_spill] sm:$0xff]  ;;  %v8274_v27 = vld [vmem:[#allocation11_spill] sm:$0xff] }
  0x4e   : > { %v6661_v33 = vpack.c.bf16 %v2029_v12, %v2027_v56  ;;  %v6665_v34 = vpack.c.bf16 %v6274_v36, %v6271_v31  ;;  %v6669_v53 = vpack.c.bf16 %v6290_v45, %v6287_v44  ;;  %v6673_v54 = vpack.c.bf16 %v6308_v3, %v6305_v2  ;;  %4634 = vmatprep.mubr.msk.f32.mxu0 %vm449_vm3, %v6436_v16  ;;  %v8267_v3 = vld [vmem:[#allocation4_spill] sm:$0xff]  ;;  %v8269_v16 = vld [vmem:[#allocation6_spill] sm:$0xff]  ;;  %v8273_v56 = vld [vmem:[#allocation9_spill] sm:$0xff] }
  0x4f   : > { %v6679_v57 = vpack.c.bf16 %v6328_v4, %v6321_v47  ;;  %v6683_v58 = vpack.c.bf16 %v6341_v42, %v6334_v17  ;;  %v6687_v9 = vpack.c.bf16 %v8255_v39, %v8254_v55  ;;  %v6691_v14 = vpack.c.bf16 %v6392_v24, %v6389_v25  ;;  %v8263_v4 = vld [vmem:[#allocation27_spill] sm:$0xff]  ;;  %4809 = vmatprep.mubr.msk.bf16.mxu1 %vm449_vm3, %v6628_v5  ;;  %v8265_v47 = vld [vmem:[#allocation5_spill] sm:$0xff] }
  0x50   : > { %v796_v31 = vrot.slane %v6640_v13, 1  ;;  %v797_v36 = vrot.slane %v6643_v22, 1  ;;  %v799_v44 = vrot.slane %v228_v11, 1  ;;  %v8264_v17 = vrot.slane %v6443_v60, 1 }
  0x51   : > { %4635 = vmatmul.mubr.msk.f32.gmra.mrb[26].mxu0 %vm449_vm3, %v8263_v4  ;;  %v408_v25 = vsel %vm328_vm2, %v405_v7, %v407_v15  ;;  %v8266_v2 = vrot.slane %v8265_v47, 2  ;;  %v8268_v42 = vrot.slane %v8267_v3, 2  ;;  %v8270_v55 = vrot.slane %v8269_v16, 2  ;;  %v8276_v3 = vld [vmem:[#allocation12_spill] sm:$0xff] }
  0x52   : > { %v406_v45 = vsel %vm328_vm2, %v8264_v17, %v405_v7  ;;  %4637 = vmatprep.mubr.msk.f32.mxu0 %vm449_vm3, %v8261_v51  ;;  %v798_v0 = vsel %vm328_vm2, %v796_v31, %v797_v36  ;;  %v800_v49 = vsel %vm328_vm2, %v797_v36, %v799_v44  ;;  %v6726_v15 = vpack.c.bf16 %v275_v40, %v6443_v60  ;;  %v8275_v17 = vld [vmem:[#allocation10_spill] sm:$0xff] }
  0x53   : > { %v1254_v24 = vsel %vm1246_vm4, %v8268_v42, %v8266_v2  ;;  %v8271_v39 = vmov %v8266_v2  ;;  %v6719_v29 = vpack.c.bf16 %v408_v25, %v406_v45  ;;  %v1262_v51 = vrot.slane %v8272_v52, 2  ;;  %v4162_v2 = vld [vmem:[%s8124_s3 + $0x4] sm:$0x3]  ;;  %v8282_v52 = vld [vmem:[#allocation18_spill] sm:$0xff] }
  0x54   : > { %v1256_v32 = vsel %vm1246_vm4, %v8271_v39, %v8270_v55  ;;  %v1263_v12 = vrot.slane %v8273_v56, 2  ;;  %v1265_v4 = vrot.slane %v8274_v27, 2  ;;  %v803_v31 = vpack.c.bf16 %v800_v49, %v798_v0  ;;  %v8278_v55 = vld [vmem:[#allocation13_spill] sm:$0xff]  ;;  %v8280_v0 = vld [vmem:[#allocation16_spill] sm:$0xff] }
  0x55   : > { %4638 = vmatmul.mubr.msk.f32.gmra.mrb[28].mxu0 %vm449_vm3, %v6482_v1  ;;  %v6723_v7 = vpack.c.bf16 %v1256_v32, %v1254_v24  ;;  %4810 = vmatmul.mubr.msk.bf16.gmra.mrb[28].mxu1 %vm449_vm3, %v6719_v29  ;;  %v1247_v60 = vrot.slane %v6640_v13, 2  ;;  %v1248_v1 = vrot.slane %v6643_v22, 2  ;;  %v1250_v40 = vrot.slane %v228_v11, 2  ;;  %v8277_v24 = vld [vmem:[#allocation15_spill] sm:$0xff]  ;;  %v4247_v39 = vld [vmem:[%s8124_s3 + $0xe] sm:$0x3] }
  0x56   : > { %4640 = vmatprep.mubr.msk.f32.mxu0 %vm449_vm3, %v406_v45  ;;  %v1264_v36 = vsel %vm1246_vm4, %v1262_v51, %v1263_v12  ;;  %v1266_v44 = vsel %vm1246_vm4, %v1263_v12, %v1265_v4  ;;  %v1083_v45 = vsel %vm869_vm0, %v8275_v17, 0  ;;  %v2241_v16 = vsel %vm869_vm0, %v8277_v24, 0  ;;  %v8279_v32 = vld [vmem:[#allocation29_spill] sm:$0xff]  ;;  %v8283_v51 = vld [vmem:[#allocation19_spill] sm:$0xff]  ;;  %v8284_v56 = vld [vmem:[#allocation20_spill] sm:$0xff] }
  0x57   : > { %4815 = vmatprep.mubr.msk.bf16.mxu1 %vm449_vm3, %v6723_v7  ;;  %v6745_v47 = vsel %vm1246_vm4, %v1247_v60, %v1248_v1  ;;  %v6757_v42 = vpack.c.bf16 %v1266_v44, %v1264_v36  ;;  %v8281_v49 = vld [vmem:[#allocation17_spill] sm:$0xff]  ;;  %v8285_v12 = vld [vmem:[#allocation24_spill] sm:$0xff]  ;;  %v776_v4 = vpack.c.bf16 %v6643_v22, %v6640_v13  ;;  %v2453_v13 = vsel %vm869_vm0, %v4247_v39, 0  ;;  %v4264_v22 = vld [vmem:[%s8124_s3 + $0x10] sm:$0x3] }
  0x58   : > { %v8286_v27 = vld [vmem:[#allocation25_spill] sm:$0xff]  ;;  %v4179_v60 = vld [vmem:[%s8124_s3 + $0x6] sm:$0x3]  ;;  %v6894_v36 = vld [vmem:[%s6103_s10 + $0x198] sm:$0xff] }
  0x59   : > { %4641 = vmatmul.mubr.msk.f32.gmra.mrb[30].mxu0 %vm449_vm3, %v408_v25  ;;  %v6748_v25 = vsel %vm1246_vm4, %v1248_v1, %v1250_v40  ;;  %v8287_v1 = vld [vmem:[#allocation7_spill] sm:$0xff]  ;;  %v8288_v40 = vld [vmem:[#allocation14_spill] sm:$0xff]  ;;  %v6897_v44 = vld [vmem:[%s6103_s10 + $0x1a0] sm:$0xff]  ;;  %v2648_v17 = vrot.slane %v6894_v36, 2 }
  0x5a   : > { %4645 = vmatprep.mubr.msk.bf16.mxu0 %vm449_vm3, %v803_v31  ;;  %v1359_v11 = vpack.c.bf16 %v6748_v25, %v6745_v47  ;;  %v1426_v31 = vsel %vm869_vm0, %v4162_v2, 0  ;;  %v2234_v24 = vpack.c.bf16 %v6897_v44, %v6894_v36 }
  0x5d   : > { %4646 = vmatmul.mubr.msk.bf16.vlgmr.msra.gmra.mrb[32].mxu0 %vm449_vm3, %v8276_v3  ;;  %4816 = vmatmul.mubr.msk.bf16.vlgmr.msra.gmra.mrb[0].mxu1 %vm449_vm3, %v8279_v32 }
  0x5e   : > { %4678 = vmatpush3.bf16.msra.mxu0 %v1083_v45  ;;  %4649 = vmatprep.mubr.msk.bf16.mxu0 %vm449_vm3, %v8278_v55  ;;  %v2649_v45 = vrot.slane %v6897_v44, 2 }
  0x5f   : > { %5383 = vmatprep.subr.msk.bf16.mxu0 %vm869_vm0, %v4162_v2  ;;  %4848 = vmatpush3.bf16.msra.mxu1 %v2241_v16  ;;  %v6904_v2 = vld [vmem:[%s6103_s10 + $0x1a8] sm:$0x3] }
  0x60   : > { %4819 = vmatprep.mubr.msk.bf16.mxu1 %vm449_vm3, %v6757_v42  ;;  %5388 = vmatprep.subr.msk.bf16.mxu1 %vm869_vm0, %v4247_v39  ;;  %v2651_v3 = vrot.slane %v6904_v2, 2  ;;  %v6912_v16 = vsel %vm1246_vm4, %v2648_v17, %v2649_v45 }
  0x62   : > { %v6915_v39 = vsel %vm1246_vm4, %v2649_v45, %v2651_v3 }
  0x65   : > { %4650 = vmatmul.mubr.msk.bf16.gmra.mrb[36].mxu0 %vm449_vm3, %v8280_v0  ;;  %4820 = vmatmul.mubr.msk.bf16.gmra.mrb[4].mxu1 %vm449_vm3, %v6512_v41 }
  0x66   : > { %4653 = vmatprep.mubr.msk.bf16.mxu0 %vm449_vm3, %v8281_v49  ;;  %4823 = vmatprep.mubr.msk.bf16.mxu1 %vm449_vm3, %v6505_v43 }
  0x6d   : > { %4654 = vmatmul.mubr.msk.bf16.gmra.mrb[40].mxu0 %vm449_vm3, %v8282_v52  ;;  %4824 = vmatmul.mubr.msk.bf16.gmra.mrb[8].mxu1 %vm449_vm3, %v6523_v8 }
  0x6e   : > { %4657 = vmatprep.mubr.msk.bf16.mxu0 %vm449_vm3, %v8283_v51  ;;  %4827 = vmatprep.mubr.msk.bf16.mxu1 %vm449_vm3, %v6525_v18 }
  0x75   : > { %4658 = vmatmul.mubr.msk.bf16.gmra.mrb[44].mxu0 %vm449_vm3, %v8284_v56  ;;  %4828 = vmatmul.mubr.msk.bf16.gmra.mrb[12].mxu1 %vm449_vm3, %v6562_v23 }
  0x76   : > { %4661 = vmatprep.mubr.msk.bf16.mxu0 %vm449_vm3, %v8285_v12  ;;  %4831 = vmatprep.mubr.msk.bf16.mxu1 %vm449_vm3, %v6548_v20 }
  0x7d   : > { %4662 = vmatmul.mubr.msk.bf16.gmra.mrb[48].mxu0 %vm449_vm3, %v8286_v27  ;;  %4832 = vmatmul.mubr.msk.bf16.gmra.mrb[16].mxu1 %vm449_vm3, %v6570_v35 }
  0x7e   : > { %4665 = vmatprep.mubr.msk.bf16.mxu0 %vm449_vm3, %v6404_v10  ;;  %4835 = vmatprep.mubr.msk.bf16.mxu1 %vm449_vm3, %v6566_v59 }
  0x85   : > { %4666 = vmatmul.mubr.msk.bf16.gmra.mrb[52].mxu0 %vm449_vm3, %v6427_v63  ;;  %4836 = vmatmul.mubr.msk.bf16.gmra.mrb[20].mxu1 %vm449_vm3, %v6602_v38 }
  0x86   : > { %4669 = vmatprep.mubr.msk.bf16.mxu0 %vm449_vm3, %v6450_v50  ;;  %4839 = vmatprep.mubr.msk.bf16.mxu1 %vm449_vm3, %v6593_v28 }
  0x8d   : > { %4670 = vmatmul.mubr.msk.bf16.gmra.mrb[56].mxu0 %vm449_vm3, %v6454_v21  ;;  %4840 = vmatmul.mubr.msk.bf16.gmra.mrb[24].mxu1 %vm449_vm3, %v6615_v30 }
  0x8e   : > { %4673 = vmatprep.mubr.msk.bf16.mxu0 %vm449_vm3, %v6475_v61  ;;  %4843 = vmatprep.mubr.msk.bf16.mxu1 %vm449_vm3, %v6617_v48 }
  0x95   : > { %4674 = vmatmul.mubr.msk.bf16.gmra.mrb[60].mxu0 %vm449_vm3, %v6628_v5  ;;  %4844 = vmatmul.mubr.msk.bf16.gmra.mrb[28].mxu1 %vm449_vm3, %v6661_v33 }
  0x96   : > { %4679 = vmatprep.mubr.msk.bf16.mxu0 %vm449_vm3, %v776_v4  ;;  %4849 = vmatprep.mubr.msk.bf16.mxu1 %vm449_vm3, %v6624_v37  ;;  %v2655_v4 = vpack.c.bf16 %v6915_v39, %v6912_v16 }
  0x9d   : > { %4680 = vmatmul.mubr.msk.bf16.vlgmr.msra.gmra.mrb[32].mxu0 %vm449_vm3, %v8287_v1  ;;  %4850 = vmatmul.mubr.msk.bf16.vlgmr.msra.gmra.mrb[0].mxu1 %vm449_vm3, %v8288_v40 }
  0x9e   : > { %4712 = vmatpush3.bf16.msra.mxu0 %v1426_v31  ;;  %4683 = vmatprep.mubr.msk.bf16.mxu0 %vm449_vm3, %v6624_v37  ;;  %v1628_v31 = vsel %vm869_vm0, %v4179_v60, 0 }
  0x9f   : > { %5384 = vmatprep.subr.msk.bf16.mxu0 %vm869_vm0, %v4179_v60  ;;  %4882 = vmatpush3.bf16.msra.mxu1 %v2453_v13  ;;  %v2662_v13 = vsel %vm869_vm0, %v4264_v22, 0 }
  0xa0   : > { %4853 = vmatprep.mubr.msk.bf16.mxu1 %vm449_vm3, %v6633_v46  ;;  %5389 = vmatprep.subr.msk.bf16.mxu1 %vm869_vm0, %v4264_v22 }
  0xa5   : > { %4684 = vmatmul.mubr.msk.bf16.gmra.mrb[36].mxu0 %vm449_vm3, %v8288_v40  ;;  %4854 = vmatmul.mubr.msk.bf16.gmra.mrb[4].mxu1 %vm449_vm3, %v6637_v6 }
  0xa6   : > { %4687 = vmatprep.mubr.msk.bf16.mxu0 %vm449_vm3, %v6633_v46  ;;  %4857 = vmatprep.mubr.msk.bf16.mxu1 %vm449_vm3, %v6649_v19 }
  0xad   : > { %4688 = vmatmul.mubr.msk.bf16.gmra.mrb[40].mxu0 %vm449_vm3, %v6637_v6  ;;  %4858 = vmatmul.mubr.msk.bf16.gmra.mrb[8].mxu1 %vm449_vm3, %v6653_v62 }
  0xae   : > { %4691 = vmatprep.mubr.msk.bf16.mxu0 %vm449_vm3, %v6649_v19  ;;  %4861 = vmatprep.mubr.msk.bf16.mxu1 %vm449_vm3, %v6657_v26 }
  0xb5   : > { %4692 = vmatmul.mubr.msk.bf16.gmra.mrb[44].mxu0 %vm449_vm3, %v6653_v62  ;;  %4862 = vmatmul.mubr.msk.bf16.gmra.mrb[12].mxu1 %vm449_vm3, %v6665_v34 }
  0xb6   : > { %4695 = vmatprep.mubr.msk.bf16.mxu0 %vm449_vm3, %v6657_v26  ;;  %4865 = vmatprep.mubr.msk.bf16.mxu1 %vm449_vm3, %v6669_v53 }
  0xbd   : > { %4696 = vmatmul.mubr.msk.bf16.gmra.mrb[48].mxu0 %vm449_vm3, %v6665_v34  ;;  %4866 = vmatmul.mubr.msk.bf16.gmra.mrb[16].mxu1 %vm449_vm3, %v6673_v54 }
  0xbe   : > { %4699 = vmatprep.mubr.msk.bf16.mxu0 %vm449_vm3, %v6669_v53  ;;  %4869 = vmatprep.mubr.msk.bf16.mxu1 %vm449_vm3, %v6679_v57 }
  0xc5   : > { %4700 = vmatmul.mubr.msk.bf16.gmra.mrb[52].mxu0 %vm449_vm3, %v6673_v54  ;;  %4870 = vmatmul.mubr.msk.bf16.gmra.mrb[20].mxu1 %vm449_vm3, %v6683_v58 }
  0xc6   : > { %4703 = vmatprep.mubr.msk.bf16.mxu0 %vm449_vm3, %v6679_v57  ;;  %4873 = vmatprep.mubr.msk.bf16.mxu1 %vm449_vm3, %v6687_v9 }
  0xcd   : > { %4704 = vmatmul.mubr.msk.bf16.gmra.mrb[56].mxu0 %vm449_vm3, %v6683_v58  ;;  %4874 = vmatmul.mubr.msk.bf16.gmra.mrb[24].mxu1 %vm449_vm3, %v6691_v14 }
  0xce   : > { %4707 = vmatprep.mubr.msk.bf16.mxu0 %vm449_vm3, %v6687_v9  ;;  %4877 = vmatprep.mubr.msk.bf16.mxu1 %vm449_vm3, %v6726_v15 }
  0xd5   : > { %4708 = vmatmul.mubr.msk.bf16.gmra.mrb[60].mxu0 %vm449_vm3, %v6691_v14  ;;  %4878 = vmatmul.mubr.msk.bf16.gmra.mrb[28].mxu1 %vm449_vm3, %v2234_v24 }
  0xd6   : > { %4713 = vmatprep.mubr.msk.bf16.mxu0 %vm449_vm3, %v1359_v11  ;;  %4883 = vmatprep.mubr.msk.bf16.mxu1 %vm449_vm3, %v8278_v55 }
  0xdd   : > { %4714 = vmatmul.mubr.msk.bf16.vlgmr.msra.gmra.mrb[32].mxu0 %vm449_vm3, %v6723_v7  ;;  %4884 = vmatmul.mubr.msk.bf16.vlgmr.msra.gmra.mrb[0].mxu1 %vm449_vm3, %v8280_v0  ;;  %v6949_v7 = vld [vmem:[%s8123_s2] ss:$0 sm:$0xff] }
  0xde   : > { %4746 = vmatpush3.bf16.msra.mxu0 %v1628_v31  ;;  %4717 = vmatprep.mubr.msk.bf16.mxu0 %vm449_vm3, %v8279_v32 }
  0xdf   : > { %4916 = vmatpush3.bf16.msra.mxu1 %v2662_v13  ;;  %4887 = vmatprep.mubr.msk.bf16.mxu1 %vm449_vm3, %v8281_v49 }
  0xe5   : > { %4718 = vmatmul.mubr.msk.bf16.gmra.mrb[36].mxu0 %vm449_vm3, %v6757_v42  ;;  %4888 = vmatmul.mubr.msk.bf16.gmra.mrb[4].mxu1 %vm449_vm3, %v8282_v52 }
  0xe6   : > { %4721 = vmatprep.mubr.msk.bf16.mxu0 %vm449_vm3, %v6512_v41  ;;  %4891 = vmatprep.mubr.msk.bf16.mxu1 %vm449_vm3, %v8283_v51 }
  0xec   : > { %v4597_v47 = vpop.f32.mrb[0].mxu0 }
  0xed   : > { %4722 = vmatmul.mubr.msk.bf16.gmra.mrb[40].mxu0 %vm449_vm3, %v6505_v43  ;;  %4892 = vmatmul.mubr.msk.bf16.gmra.mrb[8].mxu1 %vm449_vm3, %v8284_v56  ;;  %v6956_v25 = vadd.f32 %v4597_v47, %v6949_v7  ;;  %v584_v11 = vpop.f32.mrb[1].mxu0 }
  0xee   : > { %4725 = vmatprep.mubr.msk.bf16.mxu0 %vm449_vm3, %v6523_v8  ;;  %4895 = vmatprep.mubr.msk.bf16.mxu1 %vm449_vm3, %v8285_v12  ;;  %v6961_v55 = vadd.f32 %v6949_v7, %v584_v11 }
  0xef   : > { %8289 = vst [vmem:[#allocation21_spill] sm:$0xff] %v6956_v25  ;;  %745 = vst.msk [vmem:[#allocation2 + $0x8] sm:$0xff] %vm743_vm5, %v6956_v25 }
  0xf0   : > { %8290 = vst [vmem:[#allocation22_spill] sm:$0xff] %v6961_v55  ;;  %744 = vst.msk [vmem:[#allocation2] sm:$0xff] %vm743_vm5, %v6961_v55  ;;  %v4600_v0 = vpop.f32.mrb[2].mxu0 }
  0xf1   : > { %v6968_v49 = vadd.f32 %v4600_v0, %v6949_v7  ;;  %v594_v52 = vpop.f32.mrb[3].mxu0 }
  0xf2   : > { %v6973_v51 = vadd.f32 %v6949_v7, %v594_v52 }
  0xf3   : > { %8291 = vst [vmem:[#allocation23_spill] sm:$0xff] %v6968_v49  ;;  %747 = vst.msk [vmem:[#allocation2 + $0x18] sm:$0xff] %vm743_vm5, %v6968_v49 }
  0xf4   : > { %8292 = vst [vmem:[#allocation28_spill] sm:$0xff] %v6973_v51  ;;  %746 = vst.msk [vmem:[#allocation2 + $0x10] sm:$0xff] %vm743_vm5, %v6973_v51  ;;  %v4603_v56 = vpop.f32.mrb[4].mxu0 }
  0xf5   : > { %4726 = vmatmul.mubr.msk.bf16.gmra.mrb[44].mxu0 %vm449_vm3, %v6525_v18  ;;  %4896 = vmatmul.mubr.msk.bf16.gmra.mrb[12].mxu1 %vm449_vm3, %v8286_v27  ;;  %v6984_v12 = vadd.f32 %v4603_v56, %v6949_v7  ;;  %v604_v60 = vpop.f32.mrb[5].mxu0 }
  0xf6   : > { %4729 = vmatprep.mubr.msk.bf16.mxu0 %vm449_vm3, %v6562_v23  ;;  %4899 = vmatprep.mubr.msk.bf16.mxu1 %vm449_vm3, %v6404_v10  ;;  %v6989_v22 = vadd.f32 %v6949_v7, %v604_v60 }
  0xf7   : > { %8293 = vst [vmem:[#allocation26_spill] sm:$0xff] %v6984_v12  ;;  %749 = vst.msk [vmem:[#allocation2 + $0x28] sm:$0xff] %vm743_vm5, %v6984_v12 }
  0xf8   : > { %8294 = vst [vmem:[#allocation27_spill] sm:$0xff] %v6989_v22  ;;  %748 = vst.msk [vmem:[#allocation2 + $0x20] sm:$0xff] %vm743_vm5, %v6989_v22  ;;  %v4606_v17 = vpop.f32.mrb[6].mxu0 }
  0xf9   : > { %v6996_v27 = vadd.f32 %v4606_v17, %v6949_v7  ;;  %v614_v45 = vpop.f32.mrb[7].mxu0 }
  0xfa   : > { %v7001_v3 = vadd.f32 %v6949_v7, %v614_v45  ;;  %v2440_v45 = vrot.slane %v6897_v44, 1 }
  0xfb   : > { %8295 = vst [vmem:[#allocation5_spill] sm:$0xff] %v6996_v27  ;;  %751 = vst.msk [vmem:[#allocation2 + $0x38] sm:$0xff] %vm743_vm5, %v6996_v27 }
  0xfc   : > { %8296 = vst [vmem:[#allocation4_spill] sm:$0xff] %v7001_v3  ;;  %750 = vst.msk [vmem:[#allocation2 + $0x30] sm:$0xff] %vm743_vm5, %v7001_v3  ;;  %v4609_v10 = vpop.f32.mrb[8].mxu0 }
  0xfd   : > { %4730 = vmatmul.mubr.msk.bf16.gmra.mrb[48].mxu0 %vm449_vm3, %v6548_v20  ;;  %4900 = vmatmul.mubr.msk.bf16.gmra.mrb[16].mxu1 %vm449_vm3, %v6427_v63  ;;  %v7012_v24 = vadd.f32 %v4609_v10, %v6949_v7  ;;  %v624_v31 = vpop.f32.mrb[9].mxu0 }
  0xfe   : > { %4733 = vmatprep.mubr.msk.bf16.mxu0 %vm449_vm3, %v6570_v35  ;;  %4903 = vmatprep.mubr.msk.bf16.mxu1 %vm449_vm3, %v6450_v50  ;;  %v7017_v13 = vadd.f32 %v6949_v7, %v624_v31  ;;  %v2442_v31 = vrot.slane %v6904_v2, 1 }
  0xff   : > { %8297 = vst [vmem:[#allocation6_spill] sm:$0xff] %v7012_v24  ;;  %753 = vst.msk [vmem:[#allocation2 + $0x48] sm:$0xff] %vm743_vm5, %v7012_v24 }
 0x100   : > { %8298 = vst [vmem:[#allocation8_spill] sm:$0xff] %v7017_v13  ;;  %752 = vst.msk [vmem:[#allocation2 + $0x40] sm:$0xff] %vm743_vm5, %v7017_v13  ;;  %v4612_v47 = vpop.f32.mrb[10].mxu0 }
 0x101   : > { %v7024_v63 = vadd.f32 %v4612_v47, %v6949_v7  ;;  %v634_v11 = vpop.f32.mrb[11].mxu0 }
 0x102   : > { %v7029_v0 = vadd.f32 %v6949_v7, %v634_v11 }
 0x103   : > { %8299 = vst [vmem:[#allocation9_spill] sm:$0xff] %v7024_v63  ;;  %755 = vst.msk [vmem:[#allocation2 + $0x58] sm:$0xff] %vm743_vm5, %v7024_v63 }
 0x104   : > { %8300 = vst [vmem:[#allocation11_spill] sm:$0xff] %v7029_v0  ;;  %754 = vst.msk [vmem:[#allocation2 + $0x50] sm:$0xff] %vm743_vm5, %v7029_v0  ;;  %v4615_v50 = vpop.f32.mrb[12].mxu0 }
 0x105   : > { %4734 = vmatmul.mubr.msk.bf16.gmra.mrb[52].mxu0 %vm449_vm3, %v6566_v59  ;;  %4904 = vmatmul.mubr.msk.bf16.gmra.mrb[20].mxu1 %vm449_vm3, %v6454_v21  ;;  %v7040_v52 = vadd.f32 %v4615_v50, %v6949_v7  ;;  %v644_v56 = vpop.f32.mrb[13].mxu0  ;;  %v2439_v21 = vrot.slane %v6894_v36, 1  ;;  %v2443_v50 = vsel %vm328_vm2, %v2440_v45, %v2442_v31 }
 0x106   : > { %4737 = vmatprep.mubr.msk.bf16.mxu0 %vm449_vm3, %v6602_v38  ;;  %4907 = vmatprep.mubr.msk.bf16.mxu1 %vm449_vm3, %v6475_v61  ;;  %v7045_v60 = vadd.f32 %v6949_v7, %v644_v56 }
 0x107   : > { %8301 = vst [vmem:[#allocation10_spill] sm:$0xff] %v7040_v52  ;;  %757 = vst.msk [vmem:[#allocation2 + $0x68] sm:$0xff] %vm743_vm5, %v7040_v52  ;;  %v2441_v11 = vsel %vm328_vm2, %v2439_v21, %v2440_v45 }
 0x108   : > { %8302 = vst [vmem:[#allocation12_spill] sm:$0xff] %v7045_v60  ;;  %756 = vst.msk [vmem:[#allocation2 + $0x60] sm:$0xff] %vm743_vm5, %v7045_v60  ;;  %v4618_v17 = vpop.f32.mrb[14].mxu0 }
 0x109   : > { %v7054_v10 = vadd.f32 %v4618_v17, %v6949_v7  ;;  %v654_v61 = vpop.f32.mrb[15].mxu0  ;;  %v2446_v17 = vpack.c.bf16 %v2443_v50, %v2441_v11 }
 0x10a   : > { %v7060_v47 = vadd.f32 %v6949_v7, %v654_v61 }
 0x10b   : > { %8303 = vst [vmem:[#allocation15_spill] sm:$0xff] %v7054_v10  ;;  %759 = vst.msk [vmem:[#allocation2 + $0x78] sm:$0xff] %vm743_vm5, %v7054_v10 }
 0x10c   : > { %8304 = vst [vmem:[#allocation13_spill] sm:$0xff] %v7060_v47  ;;  %758 = vst.msk [vmem:[#allocation2 + $0x70] sm:$0xff] %vm743_vm5, %v7060_v47  ;;  %v4621_v36 = vpop.f32.mrb[16].mxu0 }
 0x10d   : > { %4738 = vmatmul.mubr.msk.bf16.gmra.mrb[56].mxu0 %vm449_vm3, %v6593_v28  ;;  %4908 = vmatmul.mubr.msk.bf16.gmra.mrb[24].mxu1 %vm449_vm3, %v6628_v5  ;;  %v7071_v44 = vadd.f32 %v4621_v36, %v6949_v7  ;;  %v664_v2 = vpop.f32.mrb[17].mxu0 }
 0x10e   : > { %4741 = vmatprep.mubr.msk.bf16.mxu0 %vm449_vm3, %v6615_v30  ;;  %4911 = vmatprep.mubr.msk.bf16.mxu1 %vm449_vm3, %v6719_v29  ;;  %v7078_v56 = vadd.f32 %v6949_v7, %v664_v2 }
 0x10f   : > { %8305 = vst [vmem:[#allocation29_spill] sm:$0xff] %v7071_v44  ;;  %761 = vst.msk [vmem:[#allocation2 + $0x88] sm:$0xff] %vm743_vm5, %v7071_v44 }
 0x110   : > { %8306 = vst [vmem:[#allocation16_spill] sm:$0xff] %v7078_v56  ;;  %760 = vst.msk [vmem:[#allocation2 + $0x80] sm:$0xff] %vm743_vm5, %v7078_v56  ;;  %v4624_v5 = vpop.f32.mrb[18].mxu0 }
 0x111   : > { %v7085_v61 = vadd.f32 %v4624_v5, %v6949_v7  ;;  %v674_v29 = vpop.f32.mrb[19].mxu0 }
 0x112   : > { %v7090_v21 = vadd.f32 %v6949_v7, %v674_v29 }
 0x113   : > { %8307 = vst [vmem:[#allocation17_spill] sm:$0xff] %v7085_v61  ;;  %763 = vst.msk [vmem:[#allocation2 + $0x98] sm:$0xff] %vm743_vm5, %v7085_v61 }
 0x114   : > { %8308 = vst [vmem:[#allocation18_spill] sm:$0xff] %v7090_v21  ;;  %762 = vst.msk [vmem:[#allocation2 + $0x90] sm:$0xff] %vm743_vm5, %v7090_v21  ;;  %v4627_v45 = vpop.f32.mrb[20].mxu0 }
 0x115   : > { %4742 = vmatmul.mubr.msk.bf16.gmra.mrb[60].mxu0 %vm449_vm3, %v6617_v48  ;;  %4912 = vmatmul.mubr.msk.bf16.gmra.mrb[28].mxu1 %vm449_vm3, %v2446_v17  ;;  %v7100_v31 = vadd.f32 %v4627_v45, %v6949_v7  ;;  %v684_v36 = vpop.f32.mrb[21].mxu0 }
 0x116   : > { %4747 = vmatprep.mubr.msk.bf16.mxu0 %vm449_vm3, %v8287_v1  ;;  %4917 = vmatprep.mubr.msk.bf16.mxu1 %vm449_vm3, %v8279_v32  ;;  %v7105_v2 = vadd.f32 %v6949_v7, %v684_v36 }
 0x117   : > { %8309 = vst [vmem:[#allocation19_spill] sm:$0xff] %v7100_v31  ;;  %765 = vst.msk [vmem:[#allocation2 + $0xa8] sm:$0xff] %vm743_vm5, %v7100_v31 }
 0x118   : > { %8310 = vst [vmem:[#allocation20_spill] sm:$0xff] %v7105_v2  ;;  %764 = vst.msk [vmem:[#allocation2 + $0xa0] sm:$0xff] %vm743_vm5, %v7105_v2  ;;  %v4630_v1 = vpop.f32.mrb[22].mxu0 }
 0x119   : > { %v7112_v11 = vadd.f32 %v4630_v1, %v6949_v7  ;;  %v694_v50 = vpop.f32.mrb[23].mxu0 }
 0x11a   : > { %v7117_v5 = vadd.f32 %v6949_v7, %v694_v50 }
 0x11b   : > { %8311 = vst [vmem:[#allocation24_spill] sm:$0xff] %v7112_v11  ;;  %767 = vst.msk [vmem:[#allocation2 + $0xb8] sm:$0xff] %vm743_vm5, %v7112_v11 }
 0x11c   : > { %8312 = vst [vmem:[#allocation25_spill] sm:$0xff] %v7117_v5  ;;  %766 = vst.msk [vmem:[#allocation2 + $0xb0] sm:$0xff] %vm743_vm5, %v7117_v5 }
 0x11d   : > { %4748 = vmatmul.mubr.msk.bf16.vlgmr.msra.gmra.mrb[32].mxu0 %vm449_vm3, %v6624_v37  ;;  %4918 = vmatmul.mubr.msk.bf16.vlgmr.msra.gmra.mrb[0].mxu1 %vm449_vm3, %v6757_v42 }
 0x11e   : > { %4751 = vmatprep.mubr.msk.bf16.mxu0 %vm449_vm3, %v8288_v40  ;;  %4921 = vmatprep.mubr.msk.bf16.mxu1 %vm449_vm3, %v6512_v41 }
 0x120   : > { %v4633_v32 = vpop.f32.mrb[24].mxu0 }
 0x121   : > { %v7128_v17 = vadd.f32 %v4633_v32, %v6949_v7  ;;  %v704_v37 = vpop.f32.mrb[25].mxu0 }
 0x122   : > { %v7133_v29 = vadd.f32 %v6949_v7, %v704_v37 }
 0x123   : > { %8313 = vst [vmem:[#allocation7_spill] sm:$0xff] %v7128_v17  ;;  %769 = vst.msk [vmem:[#allocation2 + $0xc8] sm:$0xff] %vm743_vm5, %v7128_v17 }
 0x124   : > { %8314 = vst [vmem:[#allocation14_spill] sm:$0xff] %v7133_v29  ;;  %768 = vst.msk [vmem:[#allocation2 + $0xc0] sm:$0xff] %vm743_vm5, %v7133_v29  ;;  %v4636_v40 = vpop.f32.mrb[26].mxu0 }
 0x125   : > { %v7140_v42 = vadd.f32 %v4636_v40, %v6949_v7  ;;  %4752 = vmatmul.mubr.msk.bf16.gmra.mrb[36].mxu0 %vm449_vm3, %v6633_v46  ;;  %v714_v45 = vpop.f32.mrb[27].mxu0  ;;  %4922 = vmatmul.mubr.msk.bf16.gmra.mrb[4].mxu1 %vm449_vm3, %v6505_v43 }
 0x126   : > { %v7145_v36 = vadd.f32 %v6949_v7, %v714_v45  ;;  %4755 = vmatprep.mubr.msk.bf16.mxu0 %vm449_vm3, %v6637_v6  ;;  %4925 = vmatprep.mubr.msk.bf16.mxu1 %vm449_vm3, %v6523_v8 }
 0x127   : > { %8315 = vst [vmem:[#allocation30_spill] sm:$0xff] %v7140_v42  ;;  %771 = vst.msk [vmem:[#allocation2 + $0xd8] sm:$0xff] %vm743_vm5, %v7140_v42 }
 0x128   : > { %8316 = vst [vmem:[#allocation31_spill] sm:$0xff] %v7145_v36  ;;  %770 = vst.msk [vmem:[#allocation2 + $0xd0] sm:$0xff] %vm743_vm5, %v7145_v36  ;;  %v4639_v41 = vpop.f32.mrb[28].mxu0 }
 0x129   : > { %v7156_v1 = vadd.f32 %v4639_v41, %v6949_v7  ;;  %v724_v46 = vpop.f32.mrb[29].mxu0 }
 0x12a   : > { %v7161_v50 = vadd.f32 %v6949_v7, %v724_v46 }
 0x12b   : > { %8317 = vst [vmem:[#allocation32_spill] sm:$0xff] %v7156_v1  ;;  %773 = vst.msk [vmem:[#allocation2 + $0xe8] sm:$0xff] %vm743_vm5, %v7156_v1 }
 0x12c   : > { %8318 = vst [vmem:[#allocation33_spill] sm:$0xff] %v7161_v50  ;;  %772 = vst.msk [vmem:[#allocation2 + $0xe0] sm:$0xff] %vm743_vm5, %v7161_v50  ;;  %v4642_v6 = vpop.f32.mrb[30].mxu0 }
 0x12d   : > { %v7168_v43 = vadd.f32 %v4642_v6, %v6949_v7  ;;  %4756 = vmatmul.mubr.msk.bf16.gmra.mrb[40].mxu0 %vm449_vm3, %v6649_v19  ;;  %v734_v32 = vpop.f32.mrb[31].mxu0  ;;  %4926 = vmatmul.mubr.msk.bf16.gmra.mrb[8].mxu1 %vm449_vm3, %v6525_v18 }
 0x12e   : > { %v7173_v37 = vadd.f32 %v6949_v7, %v734_v32  ;;  %4759 = vmatprep.mubr.msk.bf16.mxu0 %vm449_vm3, %v6653_v62  ;;  %4929 = vmatprep.mubr.msk.bf16.mxu1 %vm449_vm3, %v6562_v23 }
 0x12f   : > { %8319 = vst [vmem:[#allocation34_spill] sm:$0xff] %v7168_v43  ;;  %775 = vst.msk [vmem:[#allocation2 + $0xf8] sm:$0xff] %vm743_vm5, %v7168_v43  ;;  %v7340_v43 = vmov 0.0  }
 0x130   : > { %8320 = vst [vmem:[#allocation35_spill] sm:$0xff] %v7173_v37  ;;  %774 = vst.msk [vmem:[#allocation2 + $0xf0] sm:$0xff] %vm743_vm5, %v7173_v37  ;;  %v7342_v37 = vmov -1e+30  }
 0x135   : > { %4760 = vmatmul.mubr.msk.bf16.gmra.mrb[44].mxu0 %vm449_vm3, %v6657_v26  ;;  %4930 = vmatmul.mubr.msk.bf16.gmra.mrb[12].mxu1 %vm449_vm3, %v6548_v20 }
 0x136   : > { %4763 = vmatprep.mubr.msk.bf16.mxu0 %vm449_vm3, %v6665_v34  ;;  %4933 = vmatprep.mubr.msk.bf16.mxu1 %vm449_vm3, %v6570_v35 }
 0x13d   : > { %4764 = vmatmul.mubr.msk.bf16.gmra.mrb[48].mxu0 %vm449_vm3, %v6669_v53  ;;  %4934 = vmatmul.mubr.msk.bf16.gmra.mrb[16].mxu1 %vm449_vm3, %v6566_v59 }
 0x13e   : > { %4767 = vmatprep.mubr.msk.bf16.mxu0 %vm449_vm3, %v6673_v54  ;;  %4937 = vmatprep.mubr.msk.bf16.mxu1 %vm449_vm3, %v6602_v38  ;;  %v7226_v38 = vld [vmem:[%s8125_s4] ss:$0 sm:$0xff] }
 0x145   : > { %4768 = vmatmul.mubr.msk.bf16.gmra.mrb[52].mxu0 %vm449_vm3, %v6679_v57  ;;  %4938 = vmatmul.mubr.msk.bf16.gmra.mrb[20].mxu1 %vm449_vm3, %v6593_v28 }
 0x146   : > { %4771 = vmatprep.mubr.msk.bf16.mxu0 %vm449_vm3, %v6683_v58  ;;  %4941 = vmatprep.mubr.msk.bf16.mxu1 %vm449_vm3, %v6615_v30 }
 0x14d   : > { %4772 = vmatmul.mubr.msk.bf16.gmra.mrb[56].mxu0 %vm449_vm3, %v6687_v9  ;;  %4942 = vmatmul.mubr.msk.bf16.gmra.mrb[24].mxu1 %vm449_vm3, %v6617_v48 }
 0x14e   : > { %4775 = vmatprep.mubr.msk.bf16.mxu0 %vm449_vm3, %v6691_v14  ;;  %4945 = vmatprep.mubr.msk.bf16.mxu1 %vm449_vm3, %v6661_v33 }
 0x155   : > { %4776 = vmatmul.mubr.msk.bf16.gmra.mrb[60].mxu0 %vm449_vm3, %v6726_v15  ;;  %4946 = vmatmul.mubr.msk.bf16.gmra.mrb[28].mxu1 %vm449_vm3, %v2655_v4 }
 0x1f0   : > { %v4749_v8 = vpop.f32.mrb[32].mxu0  ;;  %v4919_v23 = vpop.f32.mrb[0].mxu1 }
 0x1f1   : > { %v1664_v18 = vpop.f32.mrb[33].mxu0  ;;  %v5125_v35 = vadd.f32 %v4919_v23, %v4749_v8  ;;  %v2698_v28 = vpop.f32.mrb[1].mxu1 }
 0x1f2   : > { %v4750_v20 = vpop.f32.mrb[34].mxu0  ;;  %v5126_v30 = vadd.f32 %v2698_v28, %v1664_v18  ;;  %v4920_v48 = vpop.f32.mrb[2].mxu1 }
 0x1f3   : > { %v1667_v59 = vpop.f32.mrb[35].mxu0  ;;  %v5127_v19 = vadd.f32 %v4920_v48, %v4750_v20  ;;  %v2701_v62 = vpop.f32.mrb[3].mxu1  ;;  %v2866_v33 = vadd.f32 %v5125_v35, %v7226_v38 }
 0x1f4   : > { %v5128_v26 = vadd.f32 %v2701_v62, %v1667_v59  ;;  %v2864_v54 = vadd.f32 %v5126_v30, %v7226_v38 }
 0x1f5   : > { %v2867_v34 = vadd.f32 %v5127_v19, %v7226_v38 }
 0x1f6   : > { %v2865_v57 = vadd.f32 %v5128_v26, %v7226_v38 }
 0x1f7   : > { %v2897_v9 = vpack.c.bf16 %v2867_v34, %v2866_v33 }
 0x1f8   : > { %v4753_v53 = vpop.f32.mrb[36].mxu0  ;;  %v2896_v15 = vpack.c.bf16 %v2865_v57, %v2864_v54  ;;  %v4923_v16 = vpop.f32.mrb[4].mxu1 }
 0x1f9   : > { %v1680_v58 = vpop.f32.mrb[37].mxu0  ;;  %2913 = vst.msk [vmem:[#allocation3 + $0x8] sm:$0xff] %vm449_vm3, %v2897_v9  ;;  %v5129_v4 = vadd.f32 %v4923_v16, %v4753_v53  ;;  %v2714_v7 = vpop.f32.mrb[5].mxu1 }
 0x1fa   : > { %v4754_v14 = vpop.f32.mrb[38].mxu0  ;;  %2912 = vst.msk [vmem:[#allocation3] sm:$0xff] %vm449_vm3, %v2896_v15  ;;  %v5130_v40 = vadd.f32 %v2714_v7, %v1680_v58  ;;  %v4924_v45 = vpop.f32.mrb[6].mxu1 }
 0x1fb   : > { %v1683_v39 = vpop.f32.mrb[39].mxu0  ;;  %v5131_v41 = vadd.f32 %v4924_v45, %v4754_v14  ;;  %v2717_v46 = vpop.f32.mrb[7].mxu1  ;;  %v2870_v32 = vadd.f32 %v5129_v4, %v7226_v38 }
 0x1fc   : > { %v5132_v6 = vadd.f32 %v2717_v46, %v1683_v39  ;;  %v2868_v20 = vadd.f32 %v5130_v40, %v7226_v38 }
 0x1fd   : > { %v2871_v8 = vadd.f32 %v5131_v41, %v7226_v38 }
 0x1fe   : > { %v2869_v23 = vadd.f32 %v5132_v6, %v7226_v38 }
 0x1ff   : > { %v2899_v35 = vpack.c.bf16 %v2871_v8, %v2870_v32 }
 0x200   : > { %v4757_v18 = vpop.f32.mrb[40].mxu0  ;;  %v2898_v30 = vpack.c.bf16 %v2869_v23, %v2868_v20  ;;  %v4927_v48 = vpop.f32.mrb[8].mxu1 }
 0x201   : > { %v1696_v59 = vpop.f32.mrb[41].mxu0  ;;  %2915 = vst.msk [vmem:[#allocation3 + $0x18] sm:$0xff] %vm449_vm3, %v2899_v35  ;;  %v5133_v62 = vadd.f32 %v4927_v48, %v4757_v18  ;;  %v2730_v26 = vpop.f32.mrb[9].mxu1 }
 0x202   : > { %v4758_v28 = vpop.f32.mrb[42].mxu0  ;;  %2914 = vst.msk [vmem:[#allocation3 + $0x10] sm:$0xff] %vm449_vm3, %v2898_v30  ;;  %v5134_v33 = vadd.f32 %v2730_v26, %v1696_v59  ;;  %v4928_v34 = vpop.f32.mrb[10].mxu1 }
 0x203   : > { %v1699_v19 = vpop.f32.mrb[43].mxu0  ;;  %v5135_v53 = vadd.f32 %v4928_v34, %v4758_v28  ;;  %v2733_v54 = vpop.f32.mrb[11].mxu1  ;;  %v2874_v58 = vadd.f32 %v5133_v62, %v7226_v38 }
 0x204   : > { %v5136_v57 = vadd.f32 %v2733_v54, %v1699_v19  ;;  %v2872_v15 = vadd.f32 %v5134_v33, %v7226_v38 }
 0x205   : > { %v2875_v9 = vadd.f32 %v5135_v53, %v7226_v38 }
 0x206   : > { %v2873_v16 = vadd.f32 %v5136_v57, %v7226_v38 }
 0x207   : > { %v2901_v4 = vpack.c.bf16 %v2875_v9, %v2874_v58 }
 0x208   : > { %v4761_v14 = vpop.f32.mrb[44].mxu0  ;;  %v2900_v40 = vpack.c.bf16 %v2873_v16, %v2872_v15  ;;  %v4931_v45 = vpop.f32.mrb[12].mxu1 }
 0x209   : > { %v1712_v39 = vpop.f32.mrb[45].mxu0  ;;  %2917 = vst.msk [vmem:[#allocation3 + $0x28] sm:$0xff] %vm449_vm3, %v2901_v4  ;;  %v5137_v46 = vadd.f32 %v4931_v45, %v4761_v14  ;;  %v2746_v6 = vpop.f32.mrb[13].mxu1 }
 0x20a   : > { %v4762_v7 = vpop.f32.mrb[46].mxu0  ;;  %2916 = vst.msk [vmem:[#allocation3 + $0x20] sm:$0xff] %vm449_vm3, %v2900_v40  ;;  %v5138_v32 = vadd.f32 %v2746_v6, %v1712_v39  ;;  %v4932_v8 = vpop.f32.mrb[14].mxu1 }
 0x20b   : > { %v1715_v41 = vpop.f32.mrb[47].mxu0  ;;  %v5139_v18 = vadd.f32 %v4932_v8, %v4762_v7  ;;  %v2749_v20 = vpop.f32.mrb[15].mxu1  ;;  %v2878_v59 = vadd.f32 %v5137_v46, %v7226_v38 }
 0x20c   : > { %v5140_v23 = vadd.f32 %v2749_v20, %v1715_v41  ;;  %v2876_v30 = vadd.f32 %v5138_v32, %v7226_v38 }
 0x20d   : > { %v2879_v35 = vadd.f32 %v5139_v18, %v7226_v38 }
 0x20e   : > { %v2877_v48 = vadd.f32 %v5140_v23, %v7226_v38 }
 0x20f   : > { %v2903_v62 = vpack.c.bf16 %v2879_v35, %v2878_v59 }
 0x210   : > { %v4765_v28 = vpop.f32.mrb[48].mxu0  ;;  %v2902_v33 = vpack.c.bf16 %v2877_v48, %v2876_v30  ;;  %v4935_v34 = vpop.f32.mrb[16].mxu1 }
 0x211   : > { %v1728_v19 = vpop.f32.mrb[49].mxu0  ;;  %2919 = vst.msk [vmem:[#allocation3 + $0x38] sm:$0xff] %vm449_vm3, %v2903_v62  ;;  %v5141_v54 = vadd.f32 %v4935_v34, %v4765_v28  ;;  %v2762_v57 = vpop.f32.mrb[17].mxu1 }
 0x212   : > { %v4766_v26 = vpop.f32.mrb[50].mxu0  ;;  %2918 = vst.msk [vmem:[#allocation3 + $0x30] sm:$0xff] %vm449_vm3, %v2902_v33  ;;  %v5142_v58 = vadd.f32 %v2762_v57, %v1728_v19  ;;  %v4936_v9 = vpop.f32.mrb[18].mxu1 }
 0x213   : > { %v1731_v53 = vpop.f32.mrb[51].mxu0  ;;  %v5143_v14 = vadd.f32 %v4936_v9, %v4766_v26  ;;  %v2765_v15 = vpop.f32.mrb[19].mxu1  ;;  %v2882_v39 = vadd.f32 %v5141_v54, %v7226_v38 }
 0x214   : > { %v5144_v16 = vadd.f32 %v2765_v15, %v1731_v53  ;;  %v2880_v40 = vadd.f32 %v5142_v58, %v7226_v38 }
 0x215   : > { %v2883_v4 = vadd.f32 %v5143_v14, %v7226_v38 }
 0x216   : > { %v2881_v45 = vadd.f32 %v5144_v16, %v7226_v38 }
 0x217   : > { %v2905_v46 = vpack.c.bf16 %v2883_v4, %v2882_v39 }
 0x218   : > { %v4769_v7 = vpop.f32.mrb[52].mxu0  ;;  %v2904_v32 = vpack.c.bf16 %v2881_v45, %v2880_v40  ;;  %v4939_v8 = vpop.f32.mrb[20].mxu1 }
 0x219   : > { %v1744_v41 = vpop.f32.mrb[53].mxu0  ;;  %2921 = vst.msk [vmem:[#allocation3 + $0x48] sm:$0xff] %vm449_vm3, %v2905_v46  ;;  %v5145_v20 = vadd.f32 %v4939_v8, %v4769_v7  ;;  %v2778_v23 = vpop.f32.mrb[21].mxu1 }
 0x21a   : > { %v4770_v6 = vpop.f32.mrb[54].mxu0  ;;  %2920 = vst.msk [vmem:[#allocation3 + $0x40] sm:$0xff] %vm449_vm3, %v2904_v32  ;;  %v5146_v59 = vadd.f32 %v2778_v23, %v1744_v41  ;;  %v4940_v35 = vpop.f32.mrb[22].mxu1 }
 0x21b   : > { %v1747_v18 = vpop.f32.mrb[55].mxu0  ;;  %v5147_v28 = vadd.f32 %v4940_v35, %v4770_v6  ;;  %v2781_v30 = vpop.f32.mrb[23].mxu1  ;;  %v2886_v19 = vadd.f32 %v5145_v20, %v7226_v38 }
 0x21c   : > { %v5148_v48 = vadd.f32 %v2781_v30, %v1747_v18  ;;  %v2884_v33 = vadd.f32 %v5146_v59, %v7226_v38 }
 0x21d   : > { %v2887_v62 = vadd.f32 %v5147_v28, %v7226_v38 }
 0x21e   : > { %v2885_v34 = vadd.f32 %v5148_v48, %v7226_v38 }
 0x21f   : > { %v2907_v54 = vpack.c.bf16 %v2887_v62, %v2886_v19 }
 0x220   : > { %v4773_v26 = vpop.f32.mrb[56].mxu0  ;;  %v2906_v58 = vpack.c.bf16 %v2885_v34, %v2884_v33  ;;  %v4943_v9 = vpop.f32.mrb[24].mxu1 }
 0x221   : > { %v1760_v53 = vpop.f32.mrb[57].mxu0  ;;  %2923 = vst.msk [vmem:[#allocation3 + $0x58] sm:$0xff] %vm449_vm3, %v2907_v54  ;;  %v5149_v15 = vadd.f32 %v4943_v9, %v4773_v26  ;;  %v2794_v16 = vpop.f32.mrb[25].mxu1 }
 0x222   : > { %v4774_v57 = vpop.f32.mrb[58].mxu0  ;;  %2922 = vst.msk [vmem:[#allocation3 + $0x50] sm:$0xff] %vm449_vm3, %v2906_v58  ;;  %v5150_v39 = vadd.f32 %v2794_v16, %v1760_v53  ;;  %v4944_v4 = vpop.f32.mrb[26].mxu1  ;;  %v7278_v16 = vmov 0.0  }
 0x223   : > { %v1763_v14 = vpop.f32.mrb[59].mxu0  ;;  %v5151_v7 = vadd.f32 %v4944_v4, %v4774_v57  ;;  %v2797_v40 = vpop.f32.mrb[27].mxu1  ;;  %v2890_v41 = vadd.f32 %v5149_v15, %v7226_v38  ;;  %v7276_v15 = vmov 0.0   ;;  %v7282_v4 = vmov 0.0  }
 0x224   : > { %v5152_v45 = vadd.f32 %v2797_v40, %v1763_v14  ;;  %v2888_v32 = vadd.f32 %v5150_v39, %v7226_v38  ;;  %v7280_v39 = vmov 0.0   ;;  %v7286_v40 = vmov 0.0  }
 0x225   : > { %v2891_v46 = vadd.f32 %v5151_v7, %v7226_v38  ;;  %v7284_v7 = vmov 0.0  }
 0x226   : > { %v2889_v8 = vadd.f32 %v5152_v45, %v7226_v38  ;;  %v7288_v45 = vmov 0.0  }
 0x227   : > { %v2909_v20 = vpack.c.bf16 %v2891_v46, %v2890_v41  ;;  %v7292_v41 = vmov 0.0   ;;  %v7294_v46 = vmov 0.0  }
 0x228   : > { %v4777_v6 = vpop.f32.mrb[60].mxu0  ;;  %v2908_v59 = vpack.c.bf16 %v2889_v8, %v2888_v32  ;;  %v4947_v35 = vpop.f32.mrb[28].mxu1  ;;  %v7298_v32 = vmov 0.0   ;;  %v7300_v8 = vmov 0.0  }
 0x229   : > { %v1776_v18 = vpop.f32.mrb[61].mxu0  ;;  %2925 = vst.msk [vmem:[#allocation3 + $0x68] sm:$0xff] %vm449_vm3, %v2909_v20  ;;  %v5153_v30 = vadd.f32 %v4947_v35, %v4777_v6  ;;  %v2810_v48 = vpop.f32.mrb[29].mxu1  ;;  %v7296_v6 = vmov 0.0   ;;  %v7304_v20 = vmov 0.0   ;;  %v7310_v35 = vmov 0.0  }
 0x22a   : > { %v4778_v23 = vpop.f32.mrb[62].mxu0  ;;  %2924 = vst.msk [vmem:[#allocation3 + $0x60] sm:$0xff] %vm449_vm3, %v2908_v59  ;;  %v5154_v19 = vadd.f32 %v2810_v48, %v1776_v18  ;;  %v4948_v62 = vpop.f32.mrb[30].mxu1  ;;  %v7302_v18 = vmov 0.0   ;;  %v7308_v59 = vmov 0.0   ;;  %v7316_v48 = vmov 0.0  }
 0x22b   : > { %v1779_v28 = vpop.f32.mrb[63].mxu0  ;;  %v5155_v26 = vadd.f32 %v4948_v62, %v4778_v23  ;;  %v2813_v33 = vpop.f32.mrb[31].mxu1  ;;  %v2894_v53 = vadd.f32 %v5153_v30, %v7226_v38  ;;  %v7306_v23 = vmov 0.0   ;;  %v7314_v30 = vmov 0.0  }
 0x22c   : > { %v5156_v34 = vadd.f32 %v2813_v33, %v1779_v28  ;;  %v2892_v57 = vadd.f32 %v5154_v19, %v7226_v38  ;;  %v7312_v28 = vmov 0.0   ;;  %v7318_v19 = vmov 0.0  }
 0x22d   : > { %v2895_v54 = vadd.f32 %v5155_v26, %v7226_v38  ;;  %v7320_v62 = vmov 0.0   ;;  %v7322_v26 = vmov 0.0   ;;  %v7324_v33 = vmov 0.0  }
 0x22e   : > { %v2893_v58 = vadd.f32 %v5156_v34, %v7226_v38  ;;  %v7290_v38 = vmov 0.0   ;;  %v7326_v34 = vmov 0.0  }
 0x22f   : > { %v2911_v9 = vpack.c.bf16 %v2895_v54, %v2894_v53  ;;  %v7328_v53 = vmov 0.0   ;;  %v7330_v54 = vmov 0.0  }
 0x230   : > { %v2910_v14 = vpack.c.bf16 %v2893_v58, %v2892_v57  ;;  %v7332_v57 = vmov 0.0   ;;  %v7334_v58 = vmov 0.0  }
 0x231   : > { %2927 = vst.msk [vmem:[#allocation3 + $0x78] sm:$0xff] %vm449_vm3, %v2911_v9  ;;  %v7336_v9 = vmov 0.0  }
 0x232   : > { %2926 = vst.msk [vmem:[#allocation3 + $0x70] sm:$0xff] %vm449_vm3, %v2910_v14  ;;  %v7338_v14 = vmov 0.0  }
 0x233 LB: >> { %8321 = vst [vmem:[#allocation36_spill] sm:$0xff] %v5902_v15  ;;  %8322 = vst [vmem:[#allocation37_spill] sm:$0xff] %v5906_v16  ;;  %s6040_s29 = smov 120   ;;  %v8335_v55 = vld [vmem:[#allocation22_spill] sm:$0xff]  ;;  %v8336_v51 = vld [vmem:[#allocation28_spill] sm:$0xff]  ;;  %s4282_s30 = sshll.u32 %s6038_s28, 7  ;;  %s6038_s28 = sphi %s7344_s28, %s8462_s28   ;;  %v6034_v37 = vphi %v7342_v37, %v8461_v37   ;;  %v6030_v43 = vphi %v7340_v43, %v8460_v43   ;;  %v6026_v14 = vphi %v7338_v14, %v8459_v14   ;;  %v6022_v9 = vphi %v7336_v9, %v8458_v9   ;;  %v6018_v58 = vphi %v7334_v58, %v8457_v58   ;;  %v6014_v57 = vphi %v7332_v57, %v8456_v57   ;;  %v6010_v54 = vphi %v7330_v54, %v8455_v54   ;;  %v6006_v53 = vphi %v7328_v53, %v8454_v53   ;;  %v6002_v34 = vphi %v7326_v34, %v8453_v34   ;;  %v5998_v33 = vphi %v7324_v33, %v8452_v33   ;;  %v5994_v26 = vphi %v7322_v26, %v8451_v26   ;;  %v5990_v62 = vphi %v7320_v62, %v8450_v62   ;;  %v5986_v19 = vphi %v7318_v19, %v8449_v19   ;;  %v5982_v48 = vphi %v7316_v48, %v8448_v48   ;;  %v5978_v30 = vphi %v7314_v30, %v8447_v30   ;;  %v5974_v28 = vphi %v7312_v28, %v8446_v28   ;;  %v5970_v35 = vphi %v7310_v35, %v8445_v35   ;;  %v5966_v59 = vphi %v7308_v59, %v8444_v59   ;;  %v5962_v23 = vphi %v7306_v23, %v8443_v23   ;;  %v5958_v20 = vphi %v7304_v20, %v8442_v20   ;;  %v5954_v18 = vphi %v7302_v18, %v8441_v18   ;;  %v5950_v8 = vphi %v7300_v8, %v8440_v8   ;;  %v5946_v32 = vphi %v7298_v32, %v8439_v32   ;;  %v5942_v6 = vphi %v7296_v6, %v8438_v6   ;;  %v5938_v46 = vphi %v7294_v46, %v8437_v46   ;;  %v5934_v41 = vphi %v7292_v41, %v8436_v41   ;;  %v5930_v38 = vphi %v7290_v38, %v8435_v38   ;;  %v5926_v45 = vphi %v7288_v45, %v8434_v45   ;;  %v5922_v40 = vphi %v7286_v40, %v8433_v40   ;;  %v5918_v7 = vphi %v7284_v7, %v8432_v7   ;;  %v5914_v4 = vphi %v7282_v4, %v8431_v4   ;;  %v5910_v39 = vphi %v7280_v39, %v8429_v39   ;;  %v5906_v16 = vphi %v7278_v16, %v8427_v16   ;;  %v5902_v15 = vphi %v7276_v15, %v8425_v15  }
 0x234   : >> { %8323 = vst [vmem:[#allocation38_spill] sm:$0xff] %v5910_v39  ;;  %8324 = vst [vmem:[#allocation39_spill] sm:$0xff] %v5914_v4  ;;  %3018 = vrot.lane.b32.xlu0 %v8335_v55, %s6040_s29  ;;  %3022 = vrot.lane.b32.xlu1 %v8336_v51, %s6040_s29  ;;  %s7464_s6 = scalar_lea.vmem [#allocation2], %s4282_s30  ;;  %v8339_v25 = vld [vmem:[#allocation21_spill] sm:$0xff]  ;;  %v8340_v49 = vld [vmem:[#allocation23_spill] sm:$0xff]  ;;  %s3619_s8 = sshra.s32 %s4282_s30, 4 }
 0x235   : >> { %8325 = vst [vmem:[#allocation40_spill] sm:$0xff] %v5918_v7  ;;  %8326 = vst [vmem:[#allocation41_spill] sm:$0xff] %v5922_v40  ;;  %v2970_v55 = vld [vmem:[%s7464_s6] sm:$0xff]  ;;  %v2971_v15 = vld [vmem:[%s7464_s6 + $0x8] sm:$0xff]  ;;  %s4331_s9 = sshll.u32 %s3619_s8, 3  ;;  %s2933_s13 = sadd.s32 1, %s6038_s28  }
 0x236   : >> { %8327 = vst [vmem:[#allocation42_spill] sm:$0xff] %v5926_v45  ;;  %8328 = vst [vmem:[#allocation43_spill] sm:$0xff] %v5930_v38  ;;  %v2972_v4 = vld [vmem:[%s7464_s6 + $0x10] sm:$0xff]  ;;  %v5077_v51 = vpack.c.bf16 %v2971_v15, %v2970_v55  ;;  %v2973_v16 = vld [vmem:[%s7464_s6 + $0x18] sm:$0xff]  ;;  %s3622_s10 = scalar_lea.vmem [#allocation3], %s4331_s9  ;;  %p7911_p4 = scmp.ge.s32.totalorder %s2933_s13, 2  }
 0x237   : >> { %8329 = vst [vmem:[#allocation44_spill] sm:$0xff] %v5934_v41  ;;  %8330 = vst [vmem:[#allocation45_spill] sm:$0xff] %v5938_v46  ;;  %v5083_v45 = vpack.c.bf16 %v2973_v16, %v2972_v4  ;;  %v8341_v22 = vld [vmem:[#allocation27_spill] sm:$0xff]  ;;  %v8342_v12 = vld [vmem:[#allocation26_spill] sm:$0xff]  ;;  %s8462_s28 = smov %s2933_s13 }
 0x238   : >> { %8331 = vst [vmem:[#allocation46_spill] sm:$0xff] %v5942_v6  ;;  %8332 = vst [vmem:[#allocation47_spill] sm:$0xff] %v5946_v32  ;;  %3020 = vrot.lane.b32.xlu0 %v8339_v25, %s6040_s29  ;;  %3024 = vrot.lane.b32.xlu1 %v8340_v49, %s6040_s29  ;;  %v2974_v55 = vld [vmem:[%s7464_s6 + $0x20] sm:$0xff]  ;;  %v2975_v15 = vld [vmem:[%s7464_s6 + $0x28] sm:$0xff] }
 0x239   : >> { %8333 = vst [vmem:[#allocation48_spill] sm:$0xff] %v5958_v20  ;;  %8334 = vst [vmem:[#allocation49_spill] sm:$0xff] %v6030_v43  ;;  %v8343_v3 = vld [vmem:[#allocation4_spill] sm:$0xff]  ;;  %v8344_v27 = vld [vmem:[#allocation5_spill] sm:$0xff] }
 0x23a   : >> { %vm7458_vm6 = vmpackc.low %vm743_vm5, %vm743_vm5  ;;  %v8345_v13 = vld [vmem:[#allocation8_spill] sm:$0xff]  ;;  %v8346_v24 = vld [vmem:[#allocation6_spill] sm:$0xff] }
 0x23b   : >> { %5079 = vmatprep.subr.msk.bf16.mxu0 %vm7458_vm6, %v5077_v51  ;;  %v2976_v16 = vld [vmem:[%s7464_s6 + $0x30] sm:$0xff]  ;;  %v2977_v4 = vld [vmem:[%s7464_s6 + $0x38] sm:$0xff]  ;;  %v8348_v63 = vld [vmem:[#allocation9_spill] sm:$0xff] }
 0x23c   : >> { %5082 = vmatpush3.bf16.xpose.msk.msra.mxu0 %vm7458_vm6, %v5077_v51  ;;  %3026 = vrot.lane.b32.xlu0 %v8341_v22, %s6040_s29  ;;  %v5089_v51 = vpack.c.bf16 %v2975_v15, %v2974_v55  ;;  %v8347_v0 = vld [vmem:[#allocation11_spill] sm:$0xff]  ;;  %v8349_v60 = vld [vmem:[#allocation12_spill] sm:$0xff]  ;;  %v8350_v52 = vld [vmem:[#allocation10_spill] sm:$0xff] }
 0x23d   : >> { %3028 = vrot.lane.b32.xlu1 %v8342_v12, %s6040_s29  ;;  %5085 = vmatprep.subr.msk.bf16.mxu0 %vm7458_vm6, %v5083_v45  ;;  %v2978_v55 = vld [vmem:[%s7464_s6 + $0x40] sm:$0xff]  ;;  %v2979_v15 = vld [vmem:[%s7464_s6 + $0x48] sm:$0xff]  ;;  %v8352_v10 = vld [vmem:[#allocation15_spill] sm:$0xff] }
 0x23e   : >> { %v8351_v47 = vld [vmem:[#allocation13_spill] sm:$0xff]  ;;  %v8353_v56 = vld [vmem:[#allocation16_spill] sm:$0xff]  ;;  %v8355_v21 = vld [vmem:[#allocation18_spill] sm:$0xff] }
 0x23f   : >> { %v8354_v44 = vld [vmem:[#allocation29_spill] sm:$0xff]  ;;  %v8357_v2 = vld [vmem:[#allocation20_spill] sm:$0xff]  ;;  %v8358_v31 = vld [vmem:[#allocation19_spill] sm:$0xff] }
 0x240   : >> { %3030 = vrot.lane.b32.xlu0 %v8343_v3, %s6040_s29  ;;  %v8356_v61 = vld [vmem:[#allocation17_spill] sm:$0xff]  ;;  %v8360_v11 = vld [vmem:[#allocation24_spill] sm:$0xff]  ;;  %v8361_v29 = vld [vmem:[#allocation14_spill] sm:$0xff] }
 0x241   : >> { %3032 = vrot.lane.b32.xlu1 %v8344_v27, %s6040_s29  ;;  %v8359_v5 = vld [vmem:[#allocation25_spill] sm:$0xff]  ;;  %v8362_v17 = vld [vmem:[#allocation7_spill] sm:$0xff]  ;;  %v8364_v42 = vld [vmem:[#allocation30_spill] sm:$0xff] }
 0x242   : >> { %v8363_v36 = vld [vmem:[#allocation31_spill] sm:$0xff]  ;;  %v8365_v50 = vld [vmem:[#allocation33_spill] sm:$0xff]  ;;  %v8366_v1 = vld [vmem:[#allocation32_spill] sm:$0xff] }
 0x244   : >> { %5088 = vmatpush3.bf16.xpose.msk.msra.mxu0 %vm7458_vm6, %v5083_v45  ;;  %3034 = vrot.lane.b32.xlu0 %v8345_v13, %s6040_s29  ;;  %v5095_v45 = vpack.c.bf16 %v2977_v4, %v2976_v16  ;;  %v2980_v16 = vld [vmem:[%s7464_s6 + $0x50] sm:$0xff]  ;;  %v2981_v4 = vld [vmem:[%s7464_s6 + $0x58] sm:$0xff] }
 0x245   : >> { %3036 = vrot.lane.b32.xlu1 %v8346_v24, %s6040_s29  ;;  %5091 = vmatprep.subr.msk.bf16.mxu0 %vm7458_vm6, %v5089_v51 }
 0x248   : >> { %3038 = vrot.lane.b32.xlu0 %v8347_v0, %s6040_s29 }
 0x249   : >> { %3040 = vrot.lane.b32.xlu1 %v8348_v63, %s6040_s29 }
 0x24c   : >> { %5094 = vmatpush3.bf16.xpose.msk.msra.mxu0 %vm7458_vm6, %v5089_v51  ;;  %3042 = vrot.lane.b32.xlu0 %v8349_v60, %s6040_s29  ;;  %v5101_v51 = vpack.c.bf16 %v2979_v15, %v2978_v55  ;;  %v2982_v55 = vld [vmem:[%s7464_s6 + $0x60] sm:$0xff]  ;;  %v2983_v15 = vld [vmem:[%s7464_s6 + $0x68] sm:$0xff] }
 0x24d   : >> { %3044 = vrot.lane.b32.xlu1 %v8350_v52, %s6040_s29  ;;  %5097 = vmatprep.subr.msk.bf16.mxu0 %vm7458_vm6, %v5095_v45 }
 0x250   : >> { %3046 = vrot.lane.b32.xlu0 %v8351_v47, %s6040_s29 }
 0x251   : >> { %3048 = vrot.lane.b32.xlu1 %v8352_v10, %s6040_s29 }
 0x254   : >> { %5100 = vmatpush3.bf16.xpose.msk.msra.mxu0 %vm7458_vm6, %v5095_v45  ;;  %3050 = vrot.lane.b32.xlu0 %v8353_v56, %s6040_s29  ;;  %v5107_v45 = vpack.c.bf16 %v2981_v4, %v2980_v16  ;;  %v5113_v16 = vpack.c.bf16 %v2983_v15, %v2982_v55  ;;  %v2985_v4 = vld [vmem:[%s7464_s6 + $0x78] sm:$0xff]  ;;  %v8368_v15 = vld [vmem:[#allocation34_spill] sm:$0xff] }
 0x255   : >> { %3052 = vrot.lane.b32.xlu1 %v8354_v44, %s6040_s29  ;;  %5103 = vmatprep.subr.msk.bf16.mxu0 %vm7458_vm6, %v5101_v51 }
 0x258   : >> { %3054 = vrot.lane.b32.xlu0 %v8355_v21, %s6040_s29 }
 0x259   : >> { %3056 = vrot.lane.b32.xlu1 %v8356_v61, %s6040_s29 }
 0x25c   : >> { %5106 = vmatpush3.bf16.xpose.msk.msra.mxu0 %vm7458_vm6, %v5101_v51  ;;  %3058 = vrot.lane.b32.xlu0 %v8357_v2, %s6040_s29  ;;  %v2984_v51 = vld [vmem:[%s7464_s6 + $0x70] sm:$0xff] }
 0x25d   : >> { %3060 = vrot.lane.b32.xlu1 %v8358_v31, %s6040_s29  ;;  %5109 = vmatprep.subr.msk.bf16.mxu0 %vm7458_vm6, %v5107_v45  ;;  %v5119_v55 = vpack.c.bf16 %v2985_v4, %v2984_v51 }
 0x260   : >> { %3062 = vrot.lane.b32.xlu0 %v8359_v5, %s6040_s29 }
 0x261   : >> { %3064 = vrot.lane.b32.xlu1 %v8360_v11, %s6040_s29 }
 0x264   : >> { %5112 = vmatpush3.bf16.xpose.msk.msra.mxu0 %vm7458_vm6, %v5107_v45  ;;  %3066 = vrot.lane.b32.xlu0 %v8361_v29, %s6040_s29  ;;  %v8367_v45 = vld [vmem:[#allocation35_spill] sm:$0xff] }
 0x265   : >> { %3068 = vrot.lane.b32.xlu1 %v8362_v17, %s6040_s29  ;;  %5115 = vmatprep.subr.msk.bf16.mxu0 %vm7458_vm6, %v5113_v16 }
 0x268   : >> { %3070 = vrot.lane.b32.xlu0 %v8363_v36, %s6040_s29 }
 0x269   : >> { %3072 = vrot.lane.b32.xlu1 %v8364_v42, %s6040_s29 }
 0x26c   : >> { %5118 = vmatpush3.bf16.xpose.msk.msra.mxu0 %vm7458_vm6, %v5113_v16  ;;  %3074 = vrot.lane.b32.xlu0 %v8365_v50, %s6040_s29 }
 0x26d   : >> { %3076 = vrot.lane.b32.xlu1 %v8366_v1, %s6040_s29  ;;  %5121 = vmatprep.subr.msk.bf16.mxu0 %vm7458_vm6, %v5119_v55 }
 0x270   : >> { %3078 = vrot.lane.b32.xlu0 %v8367_v45, %s6040_s29 }
 0x271   : >> { %3080 = vrot.lane.b32.xlu1 %v8368_v15, %s6040_s29 }
 0x274   : >> { %5124 = vmatpush3.bf16.xpose.msk.msra.mxu0 %vm7458_vm6, %v5119_v55 }
 0x2a6   : >> { %v3019_v51 = vpop.permute.xlu0 %3018  ;;  %v3023_v16 = vpop.permute.xlu1 %3022 }
 0x2a7   : >> { %4981 = vmatprep.mubr.msk.f32.mxu0 %vm743_vm5, %v3019_v51 }
 0x2aa   : >> { %v3021_v4 = vpop.permute.xlu0 %3020  ;;  %v3025_v0 = vpop.permute.xlu1 %3024 }
 0x2ab   : >> { %4982 = vmatmul.mubr.msk.f32.vlgmr.msra.gmra.mrb[0].mxu0 %vm743_vm5, %v3021_v4 }
 0x2ac   : >> { %4984 = vmatprep.mubr.msk.f32.mxu0 %vm743_vm5, %v3023_v16 }
 0x2ae   : >> { %v3027_v1 = vpop.permute.xlu0 %3026 }
 0x2af   : >> { %v3029_v2 = vpop.permute.xlu1 %3028  ;;  %4985 = vmatmul.mubr.msk.f32.gmra.mrb[2].mxu0 %vm743_vm5, %v3025_v0 }
 0x2b0   : >> { %4987 = vmatprep.mubr.msk.f32.mxu0 %vm743_vm5, %v3027_v1 }
 0x2b2   : >> { %v3031_v45 = vpop.permute.xlu0 %3030 }
 0x2b3   : >> { %v3033_v15 = vpop.permute.xlu1 %3032  ;;  %4988 = vmatmul.mubr.msk.f32.gmra.mrb[4].mxu0 %vm743_vm5, %v3029_v2 }
 0x2b4   : >> { %4990 = vmatprep.mubr.msk.f32.mxu0 %vm743_vm5, %v3031_v45 }
 0x2b6   : >> { %v3035_v39 = vpop.permute.xlu0 %3034 }
 0x2b7   : >> { %v3037_v55 = vpop.permute.xlu1 %3036  ;;  %4991 = vmatmul.mubr.msk.f32.gmra.mrb[6].mxu0 %vm743_vm5, %v3033_v15 }
 0x2b8   : >> { %4993 = vmatprep.mubr.msk.f32.mxu0 %vm743_vm5, %v3035_v39 }
 0x2ba   : >> { %v3039_v51 = vpop.permute.xlu0 %3038 }
 0x2bb   : >> { %v3041_v16 = vpop.permute.xlu1 %3040  ;;  %4994 = vmatmul.mubr.msk.f32.gmra.mrb[8].mxu0 %vm743_vm5, %v3037_v55 }
 0x2bc   : >> { %4996 = vmatprep.mubr.msk.f32.mxu0 %vm743_vm5, %v3039_v51 }
 0x2be   : >> { %v3043_v0 = vpop.permute.xlu0 %3042 }
 0x2bf   : >> { %v3045_v1 = vpop.permute.xlu1 %3044  ;;  %4997 = vmatmul.mubr.msk.f32.gmra.mrb[10].mxu0 %vm743_vm5, %v3041_v16 }
 0x2c0   : >> { %4999 = vmatprep.mubr.msk.f32.mxu0 %vm743_vm5, %v3043_v0 }
 0x2c2   : >> { %v3047_v2 = vpop.permute.xlu0 %3046 }
 0x2c3   : >> { %v3049_v4 = vpop.permute.xlu1 %3048  ;;  %5000 = vmatmul.mubr.msk.f32.gmra.mrb[12].mxu0 %vm743_vm5, %v3045_v1 }
 0x2c4   : >> { %5002 = vmatprep.mubr.msk.f32.mxu0 %vm743_vm5, %v3047_v2 }
 0x2c6   : >> { %v3051_v45 = vpop.permute.xlu0 %3050 }
 0x2c7   : >> { %v3053_v15 = vpop.permute.xlu1 %3052  ;;  %5003 = vmatmul.mubr.msk.f32.gmra.mrb[14].mxu0 %vm743_vm5, %v3049_v4 }
 0x2c8   : >> { %5005 = vmatprep.mubr.msk.f32.mxu0 %vm743_vm5, %v3051_v45 }
 0x2ca   : >> { %v3055_v39 = vpop.permute.xlu0 %3054 }
 0x2cb   : >> { %v3057_v55 = vpop.permute.xlu1 %3056  ;;  %5006 = vmatmul.mubr.msk.f32.gmra.mrb[16].mxu0 %vm743_vm5, %v3053_v15 }
 0x2cc   : >> { %5008 = vmatprep.mubr.msk.f32.mxu0 %vm743_vm5, %v3055_v39 }
 0x2ce   : >> { %v3059_v51 = vpop.permute.xlu0 %3058 }
 0x2cf   : >> { %v3061_v16 = vpop.permute.xlu1 %3060  ;;  %5009 = vmatmul.mubr.msk.f32.gmra.mrb[18].mxu0 %vm743_vm5, %v3057_v55 }
 0x2d0   : >> { %5011 = vmatprep.mubr.msk.f32.mxu0 %vm743_vm5, %v3059_v51 }
 0x2d2   : >> { %v3063_v0 = vpop.permute.xlu0 %3062 }
 0x2d3   : >> { %v3065_v1 = vpop.permute.xlu1 %3064  ;;  %5012 = vmatmul.mubr.msk.f32.gmra.mrb[20].mxu0 %vm743_vm5, %v3061_v16 }
 0x2d4   : >> { %5014 = vmatprep.mubr.msk.f32.mxu0 %vm743_vm5, %v3063_v0 }
 0x2d6   : >> { %v3067_v2 = vpop.permute.xlu0 %3066 }
 0x2d7   : >> { %v3069_v4 = vpop.permute.xlu1 %3068  ;;  %5015 = vmatmul.mubr.msk.f32.gmra.mrb[22].mxu0 %vm743_vm5, %v3065_v1 }
 0x2d8   : >> { %5017 = vmatprep.mubr.msk.f32.mxu0 %vm743_vm5, %v3067_v2 }
 0x2da   : >> { %v3071_v45 = vpop.permute.xlu0 %3070 }
 0x2db   : >> { %v3073_v15 = vpop.permute.xlu1 %3072  ;;  %5018 = vmatmul.mubr.msk.f32.gmra.mrb[24].mxu0 %vm743_vm5, %v3069_v4 }
 0x2dc   : >> { %5020 = vmatprep.mubr.msk.f32.mxu0 %vm743_vm5, %v3071_v45 }
 0x2de   : >> { %v3075_v39 = vpop.permute.xlu0 %3074 }
 0x2df   : >> { %v3077_v55 = vpop.permute.xlu1 %3076  ;;  %5021 = vmatmul.mubr.msk.f32.gmra.mrb[26].mxu0 %vm743_vm5, %v3073_v15 }
 0x2e0   : >> { %5023 = vmatprep.mubr.msk.f32.mxu0 %vm743_vm5, %v3075_v39 }
 0x2e2   : >> { %v3079_v51 = vpop.permute.xlu0 %3078 }
 0x2e3   : >> { %5024 = vmatmul.mubr.msk.f32.gmra.mrb[28].mxu0 %vm743_vm5, %v3077_v55  ;;  %v3081_v16 = vpop.permute.xlu1 %3080 }
 0x2e4   : >> { %5026 = vmatprep.mubr.msk.f32.mxu0 %vm743_vm5, %v3079_v51 }
 0x2e7   : >> { %5027 = vmatmul.mubr.msk.f32.gmra.mrb[30].mxu0 %vm743_vm5, %v3081_v16 }
 0x37e   : >> { %v7606_v0 = vpop.f32.mrb[0].mxu0 }
 0x37f   : >> { %v7608_v1 = vpop.f32.mrb[1].mxu0 }
 0x382   : >> { %v7610_v2 = vpop.f32.mrb[2].mxu0 }
 0x383   : >> { %v7612_v4 = vpop.f32.mrb[3].mxu0 }
 0x386   : >> { %v7614_v45 = vpop.f32.mrb[4].mxu0 }
 0x387   : >> { %v3420_v15 = vmax.f32 %v7606_v0, %v7614_v45  ;;  %v7618_v39 = vpop.f32.mrb[5].mxu0 }
 0x388   : >> { %v3419_v55 = vmax.f32 %v7608_v1, %v7618_v39 }
 0x38a   : >> { %v7622_v51 = vpop.f32.mrb[6].mxu0 }
 0x38b   : >> { %v3422_v16 = vmax.f32 %v7610_v2, %v7622_v51  ;;  %v7626_v3 = vpop.f32.mrb[7].mxu0 }
 0x38c   : >> { %v3421_v5 = vmax.f32 %v7612_v4, %v7626_v3 }
 0x38e   : >> { %v7630_v10 = vpop.f32.mrb[8].mxu0 }
 0x38f   : >> { %v3424_v11 = vmax.f32 %v3420_v15, %v7630_v10  ;;  %v7633_v12 = vpop.f32.mrb[9].mxu0 }
 0x390   : >> { %v3423_v13 = vmax.f32 %v3419_v55, %v7633_v12 }
 0x392   : >> { %v7636_v17 = vpop.f32.mrb[10].mxu0 }
 0x393   : >> { %v3426_v21 = vmax.f32 %v3422_v16, %v7636_v17  ;;  %v7639_v22 = vpop.f32.mrb[11].mxu0 }
 0x394   : >> { %v3425_v24 = vmax.f32 %v3421_v5, %v7639_v22 }
 0x396   : >> { %v7642_v25 = vpop.f32.mrb[12].mxu0 }
 0x397   : >> { %v3428_v27 = vmax.f32 %v3424_v11, %v7642_v25  ;;  %v7645_v29 = vpop.f32.mrb[13].mxu0 }
 0x398   : >> { %v3427_v15 = vmax.f32 %v3423_v13, %v7645_v29 }
 0x39a   : >> { %v7648_v31 = vpop.f32.mrb[14].mxu0 }
 0x39b   : >> { %v3430_v55 = vmax.f32 %v3426_v21, %v7648_v31  ;;  %v7651_v36 = vpop.f32.mrb[15].mxu0 }
 0x39c   : >> { %v3429_v16 = vmax.f32 %v3425_v24, %v7651_v36 }
 0x39e   : >> { %v7654_v42 = vpop.f32.mrb[16].mxu0 }
 0x39f   : >> { %v3432_v5 = vmax.f32 %v3428_v27, %v7654_v42  ;;  %v7657_v44 = vpop.f32.mrb[17].mxu0 }
 0x3a0   : >> { %v3431_v11 = vmax.f32 %v3427_v15, %v7657_v44 }
 0x3a2   : >> { %v7660_v47 = vpop.f32.mrb[18].mxu0 }
 0x3a3   : >> { %v3434_v13 = vmax.f32 %v3430_v55, %v7660_v47  ;;  %v7663_v49 = vpop.f32.mrb[19].mxu0 }
 0x3a4   : >> { %v3433_v21 = vmax.f32 %v3429_v16, %v7663_v49 }
 0x3a6   : >> { %v7666_v50 = vpop.f32.mrb[20].mxu0 }
 0x3a7   : >> { %v3436_v24 = vmax.f32 %v3432_v5, %v7666_v50  ;;  %v7669_v52 = vpop.f32.mrb[21].mxu0 }
 0x3a8   : >> { %v3435_v27 = vmax.f32 %v3431_v11, %v7669_v52 }
 0x3aa   : >> { %v7672_v56 = vpop.f32.mrb[22].mxu0 }
 0x3ab   : >> { %v3438_v15 = vmax.f32 %v3434_v13, %v7672_v56  ;;  %v7675_v60 = vpop.f32.mrb[23].mxu0 }
 0x3ac   : >> { %v3437_v55 = vmax.f32 %v3433_v21, %v7675_v60 }
 0x3ae   : >> { %v7678_v61 = vpop.f32.mrb[24].mxu0 }
 0x3af   : >> { %v3440_v16 = vmax.f32 %v3436_v24, %v7678_v61  ;;  %v7681_v63 = vpop.f32.mrb[25].mxu0 }
 0x3b0   : >> { %v3439_v5 = vmax.f32 %v3435_v27, %v7681_v63 }
 0x3b2   : >> { %v7684_v43 = vpop.f32.mrb[26].mxu0 }
 0x3b3   : >> { %v3442_v11 = vmax.f32 %v3438_v15, %v7684_v43  ;;  %v7687_v7 = vpop.f32.mrb[27].mxu0 }
 0x3b4   : >> { %v3441_v13 = vmax.f32 %v3437_v55, %v7687_v7  ;;  %v3623_v55 = vld [vmem:[%s3622_s10] sm:$0xff] }
 0x3b5   : >> { %5029 = vmatprep.subr.bf16.mxu1 %v3623_v55 }
 0x3b6   : >> { %v7690_v38 = vpop.f32.mrb[28].mxu0  ;;  %5030 = vmatpush3.bf16.msra.mxu1 %v3623_v55 }
 0x3b7   : >> { %v3444_v21 = vmax.f32 %v3440_v16, %v7690_v38  ;;  %v7693_v40 = vpop.f32.mrb[29].mxu0  ;;  %v3624_v16 = vld [vmem:[%s3622_s10 + $0x8] sm:$0xff] }
 0x3b8   : >> { %v3443_v24 = vmax.f32 %v3439_v5, %v7693_v40  ;;  %5031 = vmatprep.subr.bf16.mxu1 %v3624_v16  ;;  %v3625_v5 = vld [vmem:[%s3622_s10 + $0x10] sm:$0xff] }
 0x3ba   : >> { %v7696_v6 = vpop.f32.mrb[30].mxu0  ;;  %v3447_v27 = vmax.f32 %v3443_v24, %v3444_v21  ;;  %5032 = vmatpush3.bf16.msra.mxu1 %v3624_v16 }
 0x3bb   : >> { %v3446_v41 = vmax.f32 %v3442_v11, %v7696_v6  ;;  %v7699_v32 = vpop.f32.mrb[31].mxu0  ;;  %5033 = vmatprep.subr.bf16.mxu1 %v3625_v5  ;;  %v3626_v11 = vld [vmem:[%s3622_s10 + $0x18] sm:$0xff] }
 0x3bc   : >> { %v3445_v15 = vmax.f32 %v3441_v13, %v7699_v32  ;;  %v3627_v13 = vld [vmem:[%s3622_s10 + $0x20] sm:$0xff] }
 0x3be   : >> { %v3448_v46 = vmax.f32 %v3445_v15, %v3446_v41  ;;  %5034 = vmatpush3.bf16.msra.mxu1 %v3625_v5  ;;  %v3628_v41 = vld [vmem:[%s3622_s10 + $0x28] sm:$0xff] }
 0x3bf   : >> { %5035 = vmatprep.subr.bf16.mxu1 %v3626_v11 }
 0x3c0   : >> { %v3449_v20 = vmax.f32 %v3447_v27, %v3448_v46  ;;  %v3629_v46 = vld [vmem:[%s3622_s10 + $0x30] sm:$0xff] }
 0x3c2   : >> { %3450 = vmax.xlane.f32.xlu0 %v3449_v20  ;;  %5036 = vmatpush3.bf16.msra.mxu1 %v3626_v11  ;;  %v3630_v20 = vld [vmem:[%s3622_s10 + $0x38] sm:$0xff] }
 0x3c3   : >> { %5037 = vmatprep.subr.bf16.mxu1 %v3627_v13 }
 0x3c6   : >> { %5038 = vmatpush3.bf16.msra.mxu1 %v3627_v13 }
 0x3c7   : >> { %5039 = vmatprep.subr.bf16.mxu1 %v3628_v41 }
 0x3ca   : >> { %5040 = vmatpush3.bf16.msra.mxu1 %v3628_v41 }
 0x3cb   : >> { %5041 = vmatprep.subr.bf16.mxu1 %v3629_v46 }
 0x3ce   : >> { %5042 = vmatpush3.bf16.msra.mxu1 %v3629_v46 }
 0x3cf   : >> { %5043 = vmatprep.subr.bf16.mxu1 %v3630_v20 }
 0x3d2   : >> { %5044 = vmatpush3.bf16.msra.mxu1 %v3630_v20 }
 0x44f   : >> { %v3451_v21 = vpop.xlane.xlu0 %3450 }
 0x450   : >> { %v3452_v24 = vrot.slane %v3451_v21, 4 }
 0x452   : >> { %v3453_v27 = vmax.f32 %v3451_v21, %v3452_v24 }
 0x454   : >> { %v3454_v15 = vrot.slane %v3453_v27, 2 }
 0x456   : >> { %v3455_v55 = vmax.f32 %v3453_v27, %v3454_v15 }
 0x458   : >> { %v3456_v16 = vrot.slane %v3455_v55, 1 }
 0x45a   : >> { %v3457_v5 = vmax.f32 %v3455_v55, %v3456_v16 }
 0x45c   : >> { %5391 = vpush %v3457_v5 }
 0x48d   : >> { %s5392_s11 = spop %5391 }
 0x48e   : >> { %v3459_v11 = vstv %s5392_s11 }
 0x48f   : >> { %v7705_v13 = vmax.f32 %v6034_v37, %v3459_v11  }
 0x491   : >> { %8369 = vst [vmem:[#allocation50_spill] sm:$0xff] %v7705_v13  ;;  %v3464_v41 = vsub.f32 %v7608_v1, %v7705_v13  ;;  %v3465_v46 = vsub.f32 %v7606_v0, %v7705_v13  ;;  %v3466_v20 = vsub.f32 %v7612_v4, %v7705_v13  ;;  %v3467_v21 = vsub.f32 %v7610_v2, %v7705_v13 }
 0x492   : >> { %v3468_v24 = vsub.f32 %v7618_v39, %v7705_v13  ;;  %v3469_v27 = vsub.f32 %v7614_v45, %v7705_v13  ;;  %v3470_v15 = vsub.f32 %v7626_v3, %v7705_v13  ;;  %v3461_v0 = vsub.f32 %v6034_v37, %v7705_v13 }
 0x493   : >> { %v3496_v55 = vmul.f32 1.442695, %v3464_v41  ;;  %v3498_v1 = vmul.f32 1.442695, %v3465_v46  ;;  %v3500_v16 = vmul.f32 1.442695, %v3466_v20  ;;  %v3471_v4 = vsub.f32 %v7622_v51, %v7705_v13 }
 0x494   : >> { %v3502_v5 = vmul.f32 1.442695, %v3467_v21  ;;  %v3472_v2 = vsub.f32 %v7633_v12, %v7705_v13  ;;  %v3504_v39 = vmul.f32 1.442695, %v3468_v24  ;;  %v3473_v45 = vsub.f32 %v7630_v10, %v7705_v13 }
 0x495   : >> { %5684 = vpow2.f32 %v3496_v55  ;;  %v3506_v11 = vmul.f32 1.442695, %v3469_v27  ;;  %v3474_v3 = vsub.f32 %v7639_v22, %v7705_v13  ;;  %v3508_v41 = vmul.f32 1.442695, %v3470_v15 }
 0x496   : >> { %5686 = vpow2.f32 %v3498_v1  ;;  %v3475_v46 = vsub.f32 %v7636_v17, %v7705_v13  ;;  %v3510_v51 = vmul.f32 1.442695, %v3471_v4  ;;  %v3476_v12 = vsub.f32 %v7645_v29, %v7705_v13 }
 0x497   : >> { %5688 = vpow2.f32 %v3500_v16  ;;  %v3512_v20 = vmul.f32 1.442695, %v3472_v2  ;;  %v3477_v10 = vsub.f32 %v7642_v25, %v7705_v13  ;;  %v3514_v21 = vmul.f32 1.442695, %v3473_v45 }
 0x498   : >> { %5690 = vpow2.f32 %v3502_v5  ;;  %v3478_v22 = vsub.f32 %v7651_v36, %v7705_v13  ;;  %v3516_v24 = vmul.f32 1.442695, %v3474_v3  ;;  %v3479_v17 = vsub.f32 %v7648_v31, %v7705_v13 }
 0x499   : >> { %5692 = vpow2.f32 %v3504_v39  ;;  %v3518_v27 = vmul.f32 1.442695, %v3475_v46  ;;  %v3480_v29 = vsub.f32 %v7657_v44, %v7705_v13  ;;  %v3520_v15 = vmul.f32 1.442695, %v3476_v12 }
 0x49a   : >> { %5694 = vpow2.f32 %v3506_v11  ;;  %v3481_v25 = vsub.f32 %v7654_v42, %v7705_v13  ;;  %v3522_v55 = vmul.f32 1.442695, %v3477_v10  ;;  %v3482_v36 = vsub.f32 %v7663_v49, %v7705_v13 }
 0x49b   : >> { %5696 = vpow2.f32 %v3508_v41  ;;  %v3524_v16 = vmul.f32 1.442695, %v3478_v22  ;;  %v3483_v31 = vsub.f32 %v7660_v47, %v7705_v13  ;;  %v3484_v44 = vsub.f32 %v7669_v52, %v7705_v13 }
 0x49c   : >> { %5698 = vpow2.f32 %v3510_v51  ;;  %v3526_v5 = vmul.f32 1.442695, %v3479_v17  ;;  %v3528_v39 = vmul.f32 1.442695, %v3480_v29  ;;  %v3485_v49 = vsub.f32 %v7666_v50, %v7705_v13 }
 0x49d   : >> { %5700 = vpow2.f32 %v3512_v20  ;;  %v3486_v3 = vsub.f32 %v7675_v60, %v7705_v13  ;;  %v3530_v41 = vmul.f32 1.442695, %v3481_v25  ;;  %v3532_v46 = vmul.f32 1.442695, %v3482_v36 }
 0x49e   : >> { %5702 = vpow2.f32 %v3514_v21  ;;  %v3487_v20 = vsub.f32 %v7672_v56, %v7705_v13  ;;  %v3488_v10 = vsub.f32 %v7681_v63, %v7705_v13  ;;  %v3534_v21 = vmul.f32 1.442695, %v3483_v31 }
 0x49f   : >> { %v5685_v1 = vpop.eup %5684  ;;  %5704 = vpow2.f32 %v3516_v24  ;;  %v3536_v22 = vmul.f32 1.442695, %v3484_v44  ;;  %v3490_v29 = vsub.f32 %v7687_v7, %v7705_v13  ;;  %v3540_v25 = vmul.f32 1.442695, %v3486_v3 }
 0x4a0   : >> { %v5687_v4 = vpop.eup %5686  ;;  %5706 = vpow2.f32 %v3518_v27  ;;  %v3489_v27 = vsub.f32 %v7678_v61, %v7705_v13  ;;  %v3491_v36 = vsub.f32 %v7684_v43, %v7705_v13  ;;  %v3544_v31 = vmul.f32 1.442695, %v3488_v10 }
 0x4a1   : >> { %v5689_v2 = vpop.eup %5688  ;;  %5708 = vpow2.f32 %v3520_v15  ;;  %v3561_v42 = vadd.f32 %v5687_v4, %v5685_v1  ;;  %v3603_v45 = vpack.c.bf16 %v5687_v4, %v5685_v1  ;;  %v3538_v15 = vmul.f32 1.442695, %v3485_v49 }
 0x4a2   : >> { %v5691_v11 = vpop.eup %5690  ;;  %5710 = vpow2.f32 %v3522_v55  ;;  %v3542_v4 = vmul.f32 1.442695, %v3487_v20  ;;  %v3495_v3 = vsub.f32 %v7696_v6, %v7705_v13 }
 0x4a3   : >> { %v5693_v47 = vpop.eup %5692  ;;  %5712 = vpow2.f32 %v3524_v16  ;;  %v3562_v52 = vadd.f32 %v5689_v2, %v3561_v42  ;;  %5045 = vmatprep.mubr.bf16.mxu1 %v3603_v45  ;;  %v3604_v51 = vpack.c.bf16 %v5691_v11, %v5689_v2  ;;  %v3492_v16 = vsub.f32 %v7693_v40, %v7705_v13 }
 0x4a4   : >> { %v5695_v12 = vpop.eup %5694  ;;  %5714 = vpow2.f32 %v3526_v5  ;;  %v3493_v2 = vsub.f32 %v7690_v38, %v7705_v13  ;;  %v3546_v42 = vmul.f32 1.442695, %v3489_v27  ;;  %v3548_v45 = vmul.f32 1.442695, %v3490_v29 }
 0x4a5   : >> { %v5697_v50 = vpop.eup %5696  ;;  %5716 = vpow2.f32 %v3528_v39  ;;  %v3563_v60 = vadd.f32 %v5691_v11, %v3562_v52  ;;  %5046 = vmatmul.mubr.bf16.vlgmr.msra.gmra.mrb[0].mxu1 %v3604_v51  ;;  %v3605_v24 = vpack.c.bf16 %v5695_v12, %v5693_v47  ;;  %v3494_v39 = vsub.f32 %v7699_v32, %v7705_v13 }
 0x4a6   : >> { %v5699_v17 = vpop.eup %5698  ;;  %5718 = vpow2.f32 %v3530_v41  ;;  %v3550_v41 = vmul.f32 1.442695, %v3491_v36  ;;  %v3554_v51 = vmul.f32 1.442695, %v3493_v2 }
 0x4a7   : >> { %v5701_v56 = vpop.eup %5700  ;;  %5720 = vpow2.f32 %v3532_v46  ;;  %v3564_v63 = vadd.f32 %v5693_v47, %v3563_v60  ;;  %5049 = vmatprep.mubr.bf16.mxu1 %v3605_v24  ;;  %v3606_v55 = vpack.c.bf16 %v5699_v17, %v5697_v50  ;;  %v3552_v46 = vmul.f32 1.442695, %v3492_v16 }
 0x4a8   : >> { %v5703_v1 = vpop.eup %5702  ;;  %5722 = vpow2.f32 %v3534_v21  ;;  %v3556_v20 = vmul.f32 1.442695, %v3494_v39 }
 0x4a9   : >> { %v5705_v61 = vpop.eup %5704  ;;  %5724 = vpow2.f32 %v3536_v22  ;;  %v3565_v7 = vadd.f32 %v5695_v12, %v3564_v63  ;;  %v3607_v44 = vpack.c.bf16 %v5703_v1, %v5701_v56  ;;  %v3558_v22 = vmul.f32 1.442695, %v3495_v3 }
 0x4aa   : >> { %v5707_v5 = vpop.eup %5706  ;;  %5726 = vpow2.f32 %v3538_v15 }
 0x4ab   : >> { %v5709_v43 = vpop.eup %5708  ;;  %5728 = vpow2.f32 %v3540_v25  ;;  %v3566_v40 = vadd.f32 %v5697_v50, %v3565_v7  ;;  %v3608_v11 = vpack.c.bf16 %v5707_v5, %v5705_v61 }
 0x4ac   : >> { %v5711_v49 = vpop.eup %5710  ;;  %5730 = vpow2.f32 %v3542_v4 }
 0x4ad   : >> { %v5713_v47 = vpop.eup %5712  ;;  %5732 = vpow2.f32 %v3544_v31  ;;  %v3567_v38 = vadd.f32 %v5699_v17, %v3566_v40  ;;  %5050 = vmatmul.mubr.bf16.gmra.mrb[4].mxu1 %v3606_v55  ;;  %v3609_v52 = vpack.c.bf16 %v5711_v49, %v5709_v43 }
 0x4ae   : >> { %v5715_v32 = vpop.eup %5714  ;;  %5734 = vpow2.f32 %v3546_v42  ;;  %5053 = vmatprep.mubr.bf16.mxu1 %v3607_v44 }
 0x4af   : >> { %v5717_v12 = vpop.eup %5716  ;;  %5736 = vpow2.f32 %v3548_v45  ;;  %v3568_v10 = vadd.f32 %v5701_v56, %v3567_v38  ;;  %v3610_v21 = vpack.c.bf16 %v5715_v32, %v5713_v47 }
 0x4b0   : >> { %v5719_v50 = vpop.eup %5718  ;;  %5738 = vpow2.f32 %v3550_v41 }
 0x4b1   : >> { %v5721_v6 = vpop.eup %5720  ;;  %5740 = vpow2.f32 %v3552_v46  ;;  %v3569_v60 = vadd.f32 %v5703_v1, %v3568_v10  ;;  %v3611_v24 = vpack.c.bf16 %v5719_v50, %v5717_v12 }
 0x4b2   : >> { %v5723_v27 = vpop.eup %5722  ;;  %5742 = vpow2.f32 %v3554_v51 }
 0x4b3   : >> { %v5725_v17 = vpop.eup %5724  ;;  %5744 = vpow2.f32 %v3556_v20  ;;  %v3570_v29 = vadd.f32 %v5705_v61, %v3569_v60  ;;  %v3612_v15 = vpack.c.bf16 %v5723_v27, %v5721_v6 }
 0x4b4   : >> { %v5727_v25 = vpop.eup %5726  ;;  %5746 = vpow2.f32 %v3558_v22 }
 0x4b5   : >> { %v5729_v63 = vpop.eup %5728  ;;  %v3571_v55 = vadd.f32 %v5707_v5, %v3570_v29  ;;  %5054 = vmatmul.mubr.bf16.gmra.mrb[8].mxu1 %v3608_v11  ;;  %v3613_v56 = vpack.c.bf16 %v5727_v25, %v5725_v17 }
 0x4b6   : >> { %v5731_v36 = vpop.eup %5730  ;;  %5057 = vmatprep.mubr.bf16.mxu1 %v3609_v52 }
 0x4b7   : >> { %v5733_v16 = vpop.eup %5732  ;;  %v3572_v4 = vadd.f32 %v5709_v43, %v3571_v55  ;;  %v3614_v31 = vpack.c.bf16 %v5731_v36, %v5729_v63 }
 0x4b8   : >> { %v5735_v7 = vpop.eup %5734 }
 0x4b9   : >> { %v5737_v1 = vpop.eup %5736  ;;  %v3573_v44 = vadd.f32 %v5711_v49, %v3572_v4  ;;  %v3615_v2 = vpack.c.bf16 %v5735_v7, %v5733_v16 }
 0x4ba   : >> { %v5739_v39 = vpop.eup %5738 }
 0x4bb   : >> { %v5741_v42 = vpop.eup %5740  ;;  %v3574_v45 = vadd.f32 %v5713_v47, %v3573_v44  ;;  %v3616_v61 = vpack.c.bf16 %v5739_v39, %v5737_v1 }
 0x4bc   : >> { %v5743_v40 = vpop.eup %5742 }
 0x4bd   : >> { %v5745_v3 = vpop.eup %5744  ;;  %v3575_v41 = vadd.f32 %v5715_v32, %v3574_v45  ;;  %5058 = vmatmul.mubr.bf16.gmra.mrb[12].mxu1 %v3610_v21  ;;  %v3617_v5 = vpack.c.bf16 %v5743_v40, %v5741_v42 }
 0x4be   : >> { %v5747_v11 = vpop.eup %5746  ;;  %5061 = vmatprep.mubr.bf16.mxu1 %v3611_v24 }
 0x4bf   : >> { %v3576_v46 = vadd.f32 %v5717_v12, %v3575_v41  ;;  %v3618_v38 = vpack.c.bf16 %v5747_v11, %v5745_v3 }
 0x4c1   : >> { %v3577_v52 = vadd.f32 %v5719_v50, %v3576_v46 }
 0x4c3   : >> { %v3578_v43 = vadd.f32 %v5721_v6, %v3577_v52  ;;  %v3462_v6 = vmul.f32 1.442695, %v3461_v0 }
 0x4c5   : >> { %5062 = vmatmul.mubr.bf16.gmra.mrb[16].mxu1 %v3612_v15  ;;  %v3579_v51 = vadd.f32 %v5723_v27, %v3578_v43  ;;  %5748 = vpow2.f32 %v3462_v6 }
 0x4c6   : >> { %5065 = vmatprep.mubr.bf16.mxu1 %v3613_v56 }
 0x4c7   : >> { %v3580_v49 = vadd.f32 %v5725_v17, %v3579_v51 }
 0x4c9   : >> { %v3581_v20 = vadd.f32 %v5727_v25, %v3580_v49 }
 0x4cb   : >> { %v3582_v10 = vadd.f32 %v5729_v63, %v3581_v20 }
 0x4cd   : >> { %5066 = vmatmul.mubr.bf16.gmra.mrb[20].mxu1 %v3614_v31  ;;  %v3583_v47 = vadd.f32 %v5731_v36, %v3582_v10 }
 0x4ce   : >> { %5069 = vmatprep.mubr.bf16.mxu1 %v3615_v2 }
 0x4cf   : >> { %v3584_v22 = vadd.f32 %v5733_v16, %v3583_v47  ;;  %v7776_v55 = vpop.eup %5748 }
 0x4d0   : >> { %v3794_v36 = vmul.f32 %v6018_v58, %v7776_v55  ;;  %v3792_v31 = vmul.f32 %v6026_v14, %v7776_v55  ;;  %v3795_v0 = vmul.f32 %v6014_v57, %v7776_v55  ;;  %v3793_v2 = vmul.f32 %v6022_v9, %v7776_v55 }
 0x4d1   : >> { %v3585_v60 = vadd.f32 %v5735_v7, %v3584_v22  ;;  %v3798_v45 = vmul.f32 %v6002_v34, %v7776_v55  ;;  %v3802_v46 = vmul.f32 %v5986_v19, %v7776_v55  ;;  %v3810_v6 = vmul.f32 %v5954_v18, %v7776_v55 }
 0x4d3   : >> { %v3586_v32 = vadd.f32 %v5737_v1, %v3585_v60  ;;  %v3806_v60 = vmul.f32 %v5970_v35, %v7776_v55 }
 0x4d5   : >> { %5070 = vmatmul.mubr.bf16.gmra.mrb[24].mxu1 %v3616_v61  ;;  %v3587_v21 = vadd.f32 %v5739_v39, %v3586_v32 }
 0x4d6   : >> { %5073 = vmatprep.mubr.bf16.mxu1 %v3617_v5 }
 0x4d7   : >> { %v3588_v24 = vadd.f32 %v5741_v42, %v3587_v21 }
 0x4d9   : >> { %v3589_v12 = vadd.f32 %v5743_v40, %v3588_v24  ;;  %v3796_v40 = vmul.f32 %v6010_v54, %v7776_v55 }
 0x4db   : >> { %v3590_v29 = vadd.f32 %v5745_v3, %v3589_v12 }
 0x4dd   : >> { %5074 = vmatmul.mubr.bf16.gmra.mrb[28].mxu1 %v3618_v38  ;;  %v3591_v50 = vadd.f32 %v5747_v11, %v3590_v29 }
 0x4df   : >> { %3592 = vadd.xlane.f32.xlu1 %v3591_v50 }
 0x56c   : >> { %v3593_v27 = vpop.xlane.xlu1 %3592 }
 0x56d   : >> { %v3594_v17 = vrot.slane %v3593_v27, 4 }
 0x56f   : >> { %v3595_v15 = vadd.f32 %v3594_v17, %v3593_v27 }
 0x571   : >> { %v3596_v25 = vrot.slane %v3595_v15, 2 }
 0x573   : >> { %v3597_v63 = vadd.f32 %v3596_v25, %v3595_v15 }
 0x575   : >> { %v3598_v56 = vrot.slane %v3597_v63, 1 }
 0x577   : >> { %v3599_v16 = vadd.f32 %v3598_v56, %v3597_v63 }
 0x578   : >> { %v5047_v4 = vpop.f32.mrb[0].mxu1 }
 0x579   : >> { %v7782_v58 = vadd.f32 %v5047_v4, %v3794_v36   ;;  %v3665_v37 = vpop.f32.mrb[1].mxu1  ;;  %5393 = vpush %v3599_v16  ;;  %v8391_v16 = vld [vmem:[#allocation45_spill] sm:$0xff] }
 0x57a   : >> { %v7786_v14 = vadd.f32 %v3792_v31, %v3665_v37   ;;  %v5048_v7 = vpop.f32.mrb[2].mxu1  ;;  %v3814_v4 = vmul.f32 %v8391_v16, %v7776_v55 }
 0x57b   : >> { %8370 = vst [vmem:[#allocation51_spill] sm:$0xff] %v7782_v58  ;;  %v7790_v57 = vadd.f32 %v5048_v7, %v3795_v0   ;;  %v3668_v39 = vpop.f32.mrb[3].mxu1 }
 0x57c   : >> { %8371 = vst [vmem:[#allocation52_spill] sm:$0xff] %v7786_v14  ;;  %v7792_v9 = vadd.f32 %v3793_v2, %v3668_v39   ;;  %v3799_v14 = vmul.f32 %v5998_v33, %v7776_v55 }
 0x57d   : >> { %8372 = vst [vmem:[#allocation53_spill] sm:$0xff] %v7790_v57  ;;  %v3797_v57 = vmul.f32 %v6006_v53, %v7776_v55 }
 0x57e   : >> { %8373 = vst [vmem:[#allocation54_spill] sm:$0xff] %v7792_v9 }
 0x580   : >> { %v5051_v58 = vpop.f32.mrb[4].mxu1 }
 0x581   : >> { %v7798_v34 = vadd.f32 %v5051_v58, %v3798_v45   ;;  %v3681_v41 = vpop.f32.mrb[5].mxu1 }
 0x582   : >> { %v7802_v54 = vadd.f32 %v3796_v40, %v3681_v41   ;;  %v5052_v11 = vpop.f32.mrb[6].mxu1 }
 0x583   : >> { %v8374_v3 = vmov %v7798_v34  ;;  %v7806_v33 = vadd.f32 %v5052_v11, %v3799_v14   ;;  %v3684_v9 = vpop.f32.mrb[7].mxu1  ;;  %v3800_v34 = vmul.f32 %v5994_v26, %v7776_v55 }
 0x584   : >> { %v8375_v5 = vmov %v7802_v54  ;;  %v7808_v53 = vadd.f32 %v3797_v57, %v3684_v9   ;;  %v3803_v54 = vmul.f32 %v5982_v48, %v7776_v55  ;;  %v8399_v57 = vld [vmem:[#allocation41_spill] sm:$0xff] }
 0x585   : >> { %v8376_v52 = vmov %v7806_v33  ;;  %v3801_v33 = vmul.f32 %v5990_v62, %v7776_v55  ;;  %v3818_v9 = vmul.f32 %v8399_v57, %v7776_v55  ;;  %v8456_v57 = vld [vmem:[#allocation53_spill] sm:$0xff] }
 0x586   : >> { %v8377_v51 = vmov %v7808_v53 }
 0x588   : >> { %v5055_v38 = vpop.f32.mrb[8].mxu1 }
 0x589   : >> { %v7814_v19 = vadd.f32 %v5055_v38, %v3802_v46   ;;  %v3697_v43 = vpop.f32.mrb[9].mxu1 }
 0x58a   : >> { %v7818_v26 = vadd.f32 %v3800_v34, %v3697_v43   ;;  %v5056_v20 = vpop.f32.mrb[10].mxu1 }
 0x58b   : >> { %v8378_v49 = vmov %v7814_v19  ;;  %v7822_v48 = vadd.f32 %v5056_v20, %v3803_v54   ;;  %v3700_v53 = vpop.f32.mrb[11].mxu1  ;;  %v3804_v19 = vmul.f32 %v5978_v30, %v7776_v55  ;;  %v8403_v54 = vld [vmem:[#allocation40_spill] sm:$0xff] }
 0x58c   : >> { %v8379_v10 = vmov %v7818_v26  ;;  %v7824_v62 = vadd.f32 %v3801_v33, %v3700_v53   ;;  %v3807_v26 = vmul.f32 %v5966_v59, %v7776_v55 }
 0x58d   : >> { %v8380_v47 = vmov %v7822_v48  ;;  %v3805_v48 = vmul.f32 %v5974_v28, %v7776_v55 }
 0x58e   : >> { %v8381_v22 = vmov %v7824_v62 }
 0x590   : >> { %v5059_v32 = vpop.f32.mrb[12].mxu1 }
 0x591   : >> { %v7830_v35 = vadd.f32 %v5059_v32, %v3806_v60   ;;  %v3713_v24 = vpop.f32.mrb[13].mxu1 }
 0x592   : >> { %v7834_v30 = vadd.f32 %v3804_v19, %v3713_v24   ;;  %v5060_v29 = vpop.f32.mrb[14].mxu1 }
 0x593   : >> { %v8382_v21 = vmov %v7830_v35  ;;  %v7838_v59 = vadd.f32 %v5060_v29, %v3807_v26   ;;  %v3716_v62 = vpop.f32.mrb[15].mxu1  ;;  %v3808_v35 = vmul.f32 %v5962_v23, %v7776_v55 }
 0x594   : >> { %v8383_v12 = vmov %v7834_v30  ;;  %v7840_v28 = vadd.f32 %v3805_v48, %v3716_v62   ;;  %v3811_v30 = vmul.f32 %v5950_v8, %v7776_v55  ;;  %v8412_v62 = vld [vmem:[#allocation37_spill] sm:$0xff] }
 0x595   : >> { %v8384_v50 = vmov %v7838_v59  ;;  %v8388_v59 = vld [vmem:[#allocation48_spill] sm:$0xff] }
 0x596   : >> { %v8385_v27 = vmov %v7840_v28  ;;  %v3809_v36 = vmul.f32 %v8388_v59, %v7776_v55 }
 0x598   : >> { %v5063_v17 = vpop.f32.mrb[16].mxu1 }
 0x599   : >> { %v7846_v18 = vadd.f32 %v5063_v17, %v3810_v6   ;;  %v3729_v15 = vpop.f32.mrb[17].mxu1 }
 0x59a   : >> { %v7850_v23 = vadd.f32 %v3808_v35, %v3729_v15   ;;  %v5064_v56 = vpop.f32.mrb[18].mxu1  ;;  %v8413_v15 = vld [vmem:[#allocation39_spill] sm:$0xff] }
 0x59b   : >> { %v8386_v25 = vmov %v7846_v18  ;;  %v7854_v8 = vadd.f32 %v5064_v56, %v3811_v30   ;;  %v3732_v28 = vpop.f32.mrb[19].mxu1  ;;  %v8392_v18 = vld [vmem:[#allocation47_spill] sm:$0xff]  ;;  %v3820_v30 = vmul.f32 %v8413_v15, %v7776_v55 }
 0x59c   : >> { %v8387_v63 = vmov %v7850_v23  ;;  %v7856_v20 = vadd.f32 %v3809_v36, %v3732_v28   ;;  %v3812_v7 = vmul.f32 %v8392_v18, %v7776_v55  ;;  %v8394_v23 = vld [vmem:[#allocation44_spill] sm:$0xff] }
 0x59d   : >> { %v8389_v31 = vmov %v7854_v8  ;;  %v3815_v45 = vmul.f32 %v8394_v23, %v7776_v55  ;;  %v8396_v8 = vld [vmem:[#allocation46_spill] sm:$0xff]  ;;  %v8416_v28 = vld [vmem:[#allocation36_spill] sm:$0xff] }
 0x59e   : >> { %v8390_v0 = vmov %v7856_v20  ;;  %v3813_v40 = vmul.f32 %v8396_v8, %v7776_v55  ;;  %v3819_v20 = vmul.f32 %v8403_v54, %v7776_v55  ;;  %v8440_v8 = vmov %v8389_v31 }
 0x59f   : >> { %v8455_v54 = vmov %v8375_v5 }
 0x5a0   : >> { %v5067_v37 = vpop.f32.mrb[20].mxu1 }
 0x5a1   : >> { %v7862_v46 = vadd.f32 %v5067_v37, %v3814_v4   ;;  %v3745_v39 = vpop.f32.mrb[21].mxu1  ;;  %v3823_v4 = vmul.f32 %v8416_v28, %v7776_v55  ;;  %v8446_v28 = vmov %v8385_v27 }
 0x5a2   : >> { %v7866_v32 = vadd.f32 %v3812_v7, %v3745_v39   ;;  %v5068_v58 = vpop.f32.mrb[22].mxu1 }
 0x5a3   : >> { %v8393_v2 = vmov %v7862_v46  ;;  %v7870_v41 = vadd.f32 %v5068_v58, %v3815_v45   ;;  %v3748_v14 = vpop.f32.mrb[23].mxu1  ;;  %v8400_v46 = vld [vmem:[#allocation43_spill] sm:$0xff]  ;;  %v8457_v58 = vld [vmem:[#allocation51_spill] sm:$0xff] }
 0x5a4   : >> { %v8395_v11 = vmov %v7866_v32  ;;  %v7872_v6 = vadd.f32 %v3813_v40, %v3748_v14   ;;  %v3816_v34 = vmul.f32 %v8400_v46, %v7776_v55  ;;  %v8407_v32 = vld [vmem:[#allocation42_spill] sm:$0xff]  ;;  %v8437_v46 = vmov %v8393_v2  ;;  %v8459_v14 = vld [vmem:[#allocation52_spill] sm:$0xff] }
 0x5a5   : >> { %v8397_v60 = vmov %v7870_v41  ;;  %v8406_v41 = vld [vmem:[#allocation49_spill] sm:$0xff]  ;;  %v3817_v19 = vmul.f32 %v8407_v32, %v7776_v55  ;;  %v8439_v32 = vmov %v8395_v11 }
 0x5a6   : >> { %v8398_v24 = vmov %v7872_v6  ;;  %v3560_v53 = vmul.f32 %v8406_v41, %v7776_v55  ;;  %v3822_v6 = vmul.f32 %v8412_v62, %v7776_v55  ;;  %v8436_v41 = vmov %v8397_v60 }
 0x5a7   : >> { %v8450_v62 = vmov %v8381_v22 }
 0x5a8   : >> { %v5071_v38 = vpop.f32.mrb[24].mxu1 }
 0x5a9   : >> { %v7878_v40 = vadd.f32 %v5071_v38, %v3818_v9   ;;  %v3761_v43 = vpop.f32.mrb[25].mxu1  ;;  %v8458_v9 = vld [vmem:[#allocation54_spill] sm:$0xff] }
 0x5aa   : >> { %v7882_v38 = vadd.f32 %v3816_v34, %v3761_v43   ;;  %v5072_v33 = vpop.f32.mrb[26].mxu1  ;;  %s5394_s12 = spop %5393  ;;  %v8453_v34 = vmov %v8374_v3 }
 0x5ab   : >> { %8401 = vst [vmem:[#allocation55_spill] sm:$0xff] %v7878_v40  ;;  %v8402_v29 = vmov %v7878_v40  ;;  %v7888_v7 = vadd.f32 %v5072_v33, %v3819_v20   ;;  %v3601_v26 = vstv %s5394_s12  ;;  %v3764_v48 = vpop.f32.mrb[27].mxu1  ;;  %v8442_v20 = vmov %v8390_v0 }
 0x5ac   : >> { %8404 = vst [vmem:[#allocation56_spill] sm:$0xff] %v7882_v38  ;;  %v8405_v17 = vmov %v7882_v38  ;;  %v3602_v36 = vadd.f32 %v3601_v26, %v3560_v53   ;;  %v7890_v45 = vadd.f32 %v3817_v19, %v3764_v48   ;;  %v8433_v40 = vmov %v8402_v29 }
 0x5ad   : >> { %8408 = vst [vmem:[#allocation57_spill] sm:$0xff] %v7888_v7  ;;  %v8409_v56 = vmov %v7888_v7  ;;  %v8419_v7 = vld [vmem:[#allocation38_spill] sm:$0xff]  ;;  %v8435_v38 = vmov %v8405_v17  ;;  %v8448_v48 = vmov %v8380_v47  ;;  %v8449_v19 = vmov %v8378_v49 }
 0x5ae   : >> { %8410 = vst [vmem:[#allocation58_spill] sm:$0xff] %v7890_v45  ;;  %v8411_v13 = vmov %v7890_v45  ;;  %v3821_v39 = vmul.f32 %v8419_v7, %v7776_v55  ;;  %v8432_v7 = vmov %v8409_v56  ;;  %v8451_v26 = vmov %v8379_v10  ;;  %v8465_v56 = vld [vmem:[#allocation51_spill] sm:$0xff] (%p7911_p4) }
 0x5af   : >> { %v8434_v45 = vmov %v8411_v13  ;;  %v8452_v33 = vmov %v8376_v52  ;;  %v8454_v53 = vmov %v8377_v51  ;;  %v8460_v43 = vmov %v3602_v36 }
 0x5b0   : >> { %v5075_v35 = vpop.f32.mrb[28].mxu1  ;;  %5750 = vrcp.f32 (%p7911_p4), %v3602_v36 }
 0x5b1   : >> { %v7896_v16 = vadd.f32 %v5075_v35, %v3822_v6   ;;  %v3777_v59 = vpop.f32.mrb[29].mxu1  ;;  %v8438_v6 = vmov %v8398_v24  ;;  %v8445_v35 = vmov %v8382_v21  ;;  %2932 = sbr.rel (!%p7911_p4) target bundleno = 563 (0x233), region = 87 }
 0x5b2   : >> { %v7900_v37 = vadd.f32 %v3820_v30, %v3777_v59   ;;  %v5076_v18 = vpop.f32.mrb[30].mxu1  ;;  %v8444_v59 = vmov %v8384_v50  ;;  %v8447_v30 = vmov %v8383_v12 }
 0x5b3   : >> { %8414 = vst [vmem:[#allocation59_spill] sm:$0xff] %v7896_v16  ;;  %v7904_v15 = vadd.f32 %v5076_v18, %v3823_v4   ;;  %v3780_v23 = vpop.f32.mrb[31].mxu1  ;;  %v8426_v44 = vmov %v7896_v16  ;;  %v8441_v18 = vmov %v8386_v25 }
 0x5b4   : >> { %8417 = vst [vmem:[#allocation60_spill] sm:$0xff] %v7900_v37  ;;  %v7906_v39 = vadd.f32 %v3821_v39, %v3780_v23   ;;  %v8427_v16 = vmov %v8426_v44  ;;  %v8430_v61 = vmov %v7900_v37  ;;  %v8443_v23 = vmov %v8387_v63  ;;  %v8461_v37 = vld [vmem:[#allocation50_spill] sm:$0xff] }
 0x5b5   : >> { %8420 = vst [vmem:[#allocation61_spill] sm:$0xff] %v7904_v15  ;;  %v8421_v1 = vmov %v7904_v15  ;;  %v8431_v4 = vmov %v8430_v61  ;;  %v8466_v37 = vld [vmem:[#allocation53_spill] sm:$0xff] (%p7911_p4) }
 0x5b6   : >> { %8422 = vst [vmem:[#allocation62_spill] sm:$0xff] %v7906_v39  ;;  %v8425_v15 = vmov %v8421_v1  ;;  %v8428_v42 = vmov %v7906_v39  ;;  %v8463_v1 = vld [vmem:[#allocation52_spill] sm:$0xff] (%p7911_p4) }
 0x5b7   : >> { %v8429_v39 = vmov %v8428_v42  ;;  %v8464_v42 = vld [vmem:[#allocation54_spill] sm:$0xff] (%p7911_p4) }
 0x5ba   : > { %v5751_v55 = vpop.eup %5750  ;;  %v8473_v57 = vld [vmem:[#allocation59_spill] sm:$0xff] }
 0x5bb   : > { %v3857_v44 = vmul.f32 %v5751_v55, %v8463_v1  ;;  %v3858_v61 = vmul.f32 %v5751_v55, %v8464_v42  ;;  %v3859_v29 = vmul.f32 %v5751_v55, %v8465_v56  ;;  %v3860_v13 = vmul.f32 %v5751_v55, %v8466_v37  ;;  %v8471_v40 = vld [vmem:[#allocation60_spill] sm:$0xff] }
 0x5bc   : > { %v3861_v17 = vmul.f32 %v5751_v55, %v8375_v5  ;;  %v3862_v16 = vmul.f32 %v5751_v55, %v8377_v51  ;;  %v3863_v45 = vmul.f32 %v5751_v55, %v8374_v3  ;;  %v3864_v58 = vmul.f32 %v5751_v55, %v8376_v52  ;;  %v8474_v38 = vld [vmem:[#allocation61_spill] sm:$0xff] }
 0x5bd   : > { %3889 = vst.msk [vmem:[%s6098_s7] sm:$0xff] %vm449_vm3, %v3857_v44  ;;  %3890 = vst.msk [vmem:[%s6098_s7 + $0x8] sm:$0xff] %vm449_vm3, %v3858_v61  ;;  %v3865_v1 = vmul.f32 %v5751_v55, %v8379_v10  ;;  %v3866_v42 = vmul.f32 %v5751_v55, %v8381_v22  ;;  %v3867_v3 = vmul.f32 %v5751_v55, %v8378_v49  ;;  %v8472_v14 = vld [vmem:[#allocation62_spill] sm:$0xff] }
 0x5be   : > { %3891 = vst.msk [vmem:[%s6098_s7 + $0x10] sm:$0xff] %vm449_vm3, %v3859_v29  ;;  %3892 = vst.msk [vmem:[%s6098_s7 + $0x18] sm:$0xff] %vm449_vm3, %v3860_v13  ;;  %v3868_v5 = vmul.f32 %v5751_v55, %v8380_v47  ;;  %v3869_v13 = vmul.f32 %v5751_v55, %v8383_v12  ;;  %v3870_v44 = vmul.f32 %v5751_v55, %v8385_v27  ;;  %v8467_v27 = vld [vmem:[#allocation56_spill] sm:$0xff] }
 0x5bf   : > { %3893 = vst.msk [vmem:[%s6098_s7 + $0x20] sm:$0xff] %vm449_vm3, %v3861_v17  ;;  %3894 = vst.msk [vmem:[%s6098_s7 + $0x28] sm:$0xff] %vm449_vm3, %v3862_v16  ;;  %v3871_v61 = vmul.f32 %v5751_v55, %v8382_v21  ;;  %v3872_v52 = vmul.f32 %v5751_v55, %v8384_v50  ;;  %v3873_v51 = vmul.f32 %v5751_v55, %v8387_v63  ;;  %v8468_v63 = vld [vmem:[#allocation58_spill] sm:$0xff] }
 0x5c0   : > { %3895 = vst.msk [vmem:[%s6098_s7 + $0x30] sm:$0xff] %vm449_vm3, %v3863_v45  ;;  %3896 = vst.msk [vmem:[%s6098_s7 + $0x38] sm:$0xff] %vm449_vm3, %v3864_v58  ;;  %v3874_v49 = vmul.f32 %v5751_v55, %v8390_v0  ;;  %v3875_v10 = vmul.f32 %v5751_v55, %v8386_v25  ;;  %v3876_v47 = vmul.f32 %v5751_v55, %v8389_v31  ;;  %v8469_v0 = vld [vmem:[#allocation55_spill] sm:$0xff] }
 0x5c1   : > { %3897 = vst.msk [vmem:[%s6098_s7 + $0x40] sm:$0xff] %vm449_vm3, %v3865_v1  ;;  %3898 = vst.msk [vmem:[%s6098_s7 + $0x48] sm:$0xff] %vm449_vm3, %v3866_v42  ;;  %v3877_v22 = vmul.f32 %v5751_v55, %v8395_v11  ;;  %v3878_v21 = vmul.f32 %v5751_v55, %v8398_v24  ;;  %v3879_v12 = vmul.f32 %v5751_v55, %v8393_v2  ;;  %v8470_v11 = vld [vmem:[#allocation57_spill] sm:$0xff] }
 0x5c2   : > { %3899 = vst.msk [vmem:[%s6098_s7 + $0x50] sm:$0xff] %vm449_vm3, %v3867_v3  ;;  %3900 = vst.msk [vmem:[%s6098_s7 + $0x58] sm:$0xff] %vm449_vm3, %v3868_v5  ;;  %v3880_v50 = vmul.f32 %v5751_v55, %v8397_v60  ;;  %v3881_v25 = vmul.f32 %v5751_v55, %v8467_v27  ;;  %v3882_v31 = vmul.f32 %v5751_v55, %v8468_v63 }
 0x5c3   : > { %3901 = vst.msk [vmem:[%s6098_s7 + $0x60] sm:$0xff] %vm449_vm3, %v3869_v13  ;;  %3902 = vst.msk [vmem:[%s6098_s7 + $0x68] sm:$0xff] %vm449_vm3, %v3870_v44  ;;  %v3883_v2 = vmul.f32 %v5751_v55, %v8469_v0  ;;  %v3884_v8 = vmul.f32 %v5751_v55, %v8470_v11  ;;  %v3885_v60 = vmul.f32 %v5751_v55, %v8471_v40 }
 0x5c4   : > { %3903 = vst.msk [vmem:[%s6098_s7 + $0x70] sm:$0xff] %vm449_vm3, %v3871_v61  ;;  %3904 = vst.msk [vmem:[%s6098_s7 + $0x78] sm:$0xff] %vm449_vm3, %v3872_v52  ;;  %v3886_v24 = vmul.f32 %v5751_v55, %v8472_v14  ;;  %v3887_v9 = vmul.f32 %v5751_v55, %v8473_v57  ;;  %v3888_v46 = vmul.f32 %v5751_v55, %v8474_v38 }
 0x5c5   : > { %3905 = vst.msk [vmem:[%s6098_s7 + $0x80] sm:$0xff] %vm449_vm3, %v3873_v51  ;;  %3906 = vst.msk [vmem:[%s6098_s7 + $0x88] sm:$0xff] %vm449_vm3, %v3874_v49 }
 0x5c6   : > { %3907 = vst.msk [vmem:[%s6098_s7 + $0x90] sm:$0xff] %vm449_vm3, %v3875_v10  ;;  %3908 = vst.msk [vmem:[%s6098_s7 + $0x98] sm:$0xff] %vm449_vm3, %v3876_v47 }
 0x5c7   : > { %3909 = vst.msk [vmem:[%s6098_s7 + $0xa0] sm:$0xff] %vm449_vm3, %v3877_v22  ;;  %3910 = vst.msk [vmem:[%s6098_s7 + $0xa8] sm:$0xff] %vm449_vm3, %v3878_v21 }
 0x5c8   : > { %3911 = vst.msk [vmem:[%s6098_s7 + $0xb0] sm:$0xff] %vm449_vm3, %v3879_v12  ;;  %3912 = vst.msk [vmem:[%s6098_s7 + $0xb8] sm:$0xff] %vm449_vm3, %v3880_v50 }
 0x5c9   : > { %3913 = vst.msk [vmem:[%s6098_s7 + $0xc0] sm:$0xff] %vm449_vm3, %v3881_v25  ;;  %3914 = vst.msk [vmem:[%s6098_s7 + $0xc8] sm:$0xff] %vm449_vm3, %v3882_v31 }
 0x5ca   : > { %3915 = vst.msk [vmem:[%s6098_s7 + $0xd0] sm:$0xff] %vm449_vm3, %v3883_v2  ;;  %3916 = vst.msk [vmem:[%s6098_s7 + $0xd8] sm:$0xff] %vm449_vm3, %v3884_v8 }
 0x5cb   : > { %3917 = vst.msk [vmem:[%s6098_s7 + $0xe0] sm:$0xff] %vm449_vm3, %v3885_v60  ;;  %3918 = vst.msk [vmem:[%s6098_s7 + $0xe8] sm:$0xff] %vm449_vm3, %v3886_v24 }
 0x5cc   : > { %3919 = vst.msk [vmem:[%s6098_s7 + $0xf0] sm:$0xff] %vm449_vm3, %v3887_v9  ;;  %3920 = vst.msk [vmem:[%s6098_s7 + $0xf8] sm:$0xff] %vm449_vm3, %v3888_v46 }
 0x5cd PF: > { %s15_s18 = sadd.s32 1, %s5898_s18  }
 0x5ce   : > { %p12_p5 = scmp.ge.s32.totalorder %s15_s18, 4  }
 0x5d0   :  { %14 = sbr.rel (!%p12_p5) target bundleno = 1 (0x1), region = 98 }

</bundles_post_ra>
